<compile_context>
chip_gen: v7x
topology: tpu7x:2x2x1
jax: 0.10.0
libtpu: 0.0.40
codegen_flags: <defaults>
</compile_context>

<pallas_src>
import functools

import numpy as np
import jax
import jax.numpy as jnp
from jax.experimental import pallas as pl
from jax.experimental.pallas import tpu as pltpu


# -------------------- stage A: Temp1 + Spat1(1x1) + GNN (indicator==0) --------------------

def _stage_a_kernel(x_ref, w1_ref, ws_ref, wg_ref, bg_ref, xin_ref, z_ref, *, S2):
    # x_ref: (1, 8, first*7) node-layout activations of one batch element.
    xg = x_ref[0]                                                        # (8, first*7)
    y = jnp.dot(xg, w1_ref[...], preferred_element_type=jnp.float32)     # (8, 2*S2)
    t1 = y[:, :S2] * jax.nn.sigmoid(y[:, S2:])                           # folded Temp1 GLU
    # Spat1 1x1 conv (BatchNorm1 eval-scale folded into ws).
    xin_ref[0] = jnp.dot(t1, ws_ref[...], preferred_element_type=jnp.float32)
    # GNN indicator==0: bmm(ones(8,8)/8, xg) == mean over the 8 nodes, then linear.
    xm = jnp.mean(t1, axis=0, keepdims=True)                             # (1, S2)
    z_ref[0] = jnp.dot(xm, wg_ref[...], preferred_element_type=jnp.float32) + bg_ref[...]


def stage_a(xg_in, w1_node, ws_node, w_gnn, b_gnn, *, second):
    B, _, S1 = xg_in.shape
    S2 = second * 7
    return pl.pallas_call(
        functools.partial(_stage_a_kernel, S2=S2),
        grid=(B,),
        in_specs=[
            pl.BlockSpec((1, 8, S1), lambda b: (b, 0, 0)),
            pl.BlockSpec((S1, 2 * S2), lambda b: (0, 0)),
            pl.BlockSpec((S2, S2), lambda b: (0, 0)),
            pl.BlockSpec((S2, S2), lambda b: (0, 0)),
            pl.BlockSpec((1, S2), lambda b: (0, 0)),
        ],
        out_specs=(
            pl.BlockSpec((1, 8, S2), lambda b: (b, 0, 0)),
            pl.BlockSpec((1, 1, S2), lambda b: (b, 0, 0)),
        ),
        out_shape=(
            jax.ShapeDtypeStruct((B, 8, S2), jnp.float32),
            jax.ShapeDtypeStruct((B, 1, S2), jnp.float32),
        ),
        compiler_params=pltpu.CompilerParams(dimension_semantics=("parallel",)),
    )(xg_in, w1_node, ws_node, w_gnn, b_gnn)


# -------------------- stage B: add+ReLU + Temp2 + Temp3 ------------------------------------

def _stage_b_kernel(xin_ref, z_ref, w2_ref, w3_ref, o_ref, *, S3, S4):
    s1 = jnp.maximum(xin_ref[0] + z_ref[0], 0.0)                          # add + ReLU
    y2 = jnp.dot(s1, w2_ref[...], preferred_element_type=jnp.float32)     # (8, 2*S3)
    t2 = y2[:, :S3] * jax.nn.sigmoid(y2[:, S3:])                          # Temp2 GLU
    y3 = jnp.dot(t2, w3_ref[...], preferred_element_type=jnp.float32)     # (8, 2*S4)
    o_ref[0] = y3[:, :S4] * jax.nn.sigmoid(y3[:, S4:])                    # Temp3 GLU (BN2 folded)


def stage_b(x_input_node, z_node, w2_node, w3_node, *, third, fourth):
    B, _, S2 = x_input_node.shape
    S3, S4 = third * 7, fourth * 7
    return pl.pallas_call(
        functools.partial(_stage_b_kernel, S3=S3, S4=S4),
        grid=(B,),
        in_specs=[
            pl.BlockSpec((1, 8, S2), lambda b: (b, 0, 0)),
            pl.BlockSpec((1, 8, S2), lambda b: (b, 0, 0)),
            pl.BlockSpec((S2, 2 * S3), lambda b: (0, 0)),
            pl.BlockSpec((S3, 2 * S4), lambda b: (0, 0)),
        ],
        out_specs=pl.BlockSpec((1, 8, S4), lambda b: (b, 0, 0)),
        out_shape=jax.ShapeDtypeStruct((B, 8, S4), jnp.float32),
        compiler_params=pltpu.CompilerParams(dimension_semantics=("parallel",)),
    )(x_input_node, z_node, w2_node, w3_node)


# -------------------- stage C: MLP1 + MLP2 + MLP3 + log_softmax ----------------------------

def _mlp_kernel(x_ref, w1_ref, b1_ref, w2_ref, b2_ref, w3_ref, b3_ref, o_ref,
                h1_ref, acc_ref):
    j = pl.program_id(0)

    @pl.when(j == 0)
    def _():
        h1 = jnp.dot(x_ref[...].astype(jnp.bfloat16), w1_ref[...],
                     preferred_element_type=jnp.float32) + b1_ref[...]
        h1_ref[...] = jnp.maximum(h1, 0.0)
        acc_ref[...] = jnp.zeros_like(acc_ref)

    # mlp2 / mlp3 weight tiles stream (double-buffered) over the padded hidden dim.
    h2 = jnp.dot(h1_ref[...].astype(jnp.bfloat16), w2_ref[...],
                 preferred_element_type=jnp.float32) + b2_ref[...]
    h2 = jnp.maximum(h2, 0.0)
    acc_ref[...] += jnp.dot(h2.astype(jnp.bfloat16), w3_ref[...],
                            preferred_element_type=jnp.float32)

    @pl.when(j == pl.num_programs(0) - 1)
    def _():
        logits = acc_ref[...] + b3_ref[...]
        m = jnp.max(logits, axis=1, keepdims=True)
        lse = jnp.log(jnp.sum(jnp.exp(logits - m), axis=1, keepdims=True)) + m
        o_ref[...] = logits - lse


def mlp_head(flat, w1, b1, w2, b2, w3, b3, *, tile=512):
    B, K1 = flat.shape
    H1 = w1.shape[1]
    H2 = w2.shape[1]
    C = w3.shape[1]
    assert H2 % tile == 0
    return pl.pallas_call(
        _mlp_kernel,
        grid=(H2 // tile,),
        in_specs=[
            pl.BlockSpec((B, K1), lambda j: (0, 0)),
            pl.BlockSpec((K1, H1), lambda j: (0, 0)),
            pl.BlockSpec((1, H1), lambda j: (0, 0)),
            pl.BlockSpec((H1, tile), lambda j: (0, j)),
            pl.BlockSpec((1, tile), lambda j: (0, j)),
            pl.BlockSpec((tile, C), lambda j: (j, 0)),
            pl.BlockSpec((1, C), lambda j: (0, 0)),
        ],
        out_specs=pl.BlockSpec((B, C), lambda j: (0, 0)),
        out_shape=jax.ShapeDtypeStruct((B, C), jnp.float32),
        scratch_shapes=[pltpu.VMEM((B, H1), jnp.float32),
                        pltpu.VMEM((B, C), jnp.float32)],
        compiler_params=pltpu.CompilerParams(dimension_semantics=("arbitrary",)),
    )(flat, w1, b1, w2, b2, w3, b3)


# ------------------------------------- parameters ------------------------------------------

def make_params(channels, num_classes, key, *, mlp_tile=512):
    first, second, third, fourth = channels
    S2, S4 = second * 7, fourth * 7
    bn_scale = np.float32(1.0 / np.sqrt(1.0 + 1e-5))   # eval-mode BatchNorm2d, default stats
    keys = iter(jax.random.split(key, 32))

    def xavier(shape):
        limit = np.sqrt(6.0 / (shape[0] + shape[1]))
        return jax.random.uniform(next(keys), shape, jnp.float32, -limit, limit)

    def randn(shape, scale=1.0):
        return jax.random.normal(next(keys), shape, jnp.float32) * scale

    eye7 = jnp.eye(7, dtype=jnp.float32)

    def node_expand(w):      # (C_in, C_out) 1x1-conv weight -> (C_in*7, C_out*7) node weight
        return jnp.kron(w, eye7)

    # Temporal 1 (first -> second): fold WT_glu[:out] + WT_input, concat with the gate half.
    t1_wi, t1_wg1, t1_wg2 = (xavier((first, second)) for _ in range(3))
    w1_node = node_expand(jnp.concatenate([t1_wi + t1_wg1, t1_wg2], axis=1))

    # Spatial layer (indicator == 0); BatchNorm1 folded into its consumers.
    spat_ws = xavier((second, second)) * bn_scale
    ws_node = node_expand(spat_ws)
    w_gnn = xavier((S2, S2)) * bn_scale
    b_gnn = randn((1, S2))

    # Temporal 2 (second -> third)
    t2_wi, t2_wg1, t2_wg2 = (xavier((second, third)) for _ in range(3))
    w2_node = node_expand(jnp.concatenate([t2_wi + t2_wg1, t2_wg2], axis=1))

    # Temporal 3 (third -> fourth); BatchNorm2 folded in.
    t3_wi, t3_wg1, t3_wg2 = (xavier((third, fourth)) for _ in range(3))
    w3_node = node_expand(jnp.concatenate([t3_wi + t3_wg1, t3_wg2], axis=1) * bn_scale)

    # MLP head: permute mlp1 rows so it consumes the (h, c, w)-ordered flatten of stage B's
    # node-layout output; store the big weights in bf16 (weight-DMA-bound head).
    mlp1_w, mlp1_b = xavier((fourth * 56, 500)), randn((1, 500), 0.01)
    perm = np.arange(fourth * 56).reshape(fourth, 8, 7).transpose(1, 0, 2).reshape(-1)
    mlp1_w_node = mlp1_w[perm]
    mlp2_w, mlp2_b = xavier((500, 2000)), randn((1, 2000), 0.01)
    mlp3_w, mlp3_b = xavier((2000, num_classes)), randn((1, num_classes), 0.01)

    # Pad the 2000-wide hidden dim up to a multiple of the weight tile (zeros -> exact).
    h2p = ((2000 + mlp_tile - 1) // mlp_tile) * mlp_tile
    mlp2_w_p = jnp.zeros((500, h2p), jnp.float32).at[:, :2000].set(mlp2_w)
    mlp2_b_p = jnp.zeros((1, h2p), jnp.float32).at[:, :2000].set(mlp2_b)
    mlp3_w_p = jnp.zeros((h2p, num_classes), jnp.float32).at[:2000, :].set(mlp3_w)

    return dict(
        w1_node=w1_node, ws_node=ws_node, w_gnn=w_gnn, b_gnn=b_gnn,
        w2_node=w2_node, w3_node=w3_node,
        mlp1_w=mlp1_w_node.astype(jnp.bfloat16), mlp1_b=mlp1_b,
        mlp2_w=mlp2_w_p.astype(jnp.bfloat16), mlp2_b=mlp2_b_p,
        mlp3_w=mlp3_w_p.astype(jnp.bfloat16), mlp3_b=mlp3_b,
    )


# -------------------------------------- forward --------------------------------------------

def armband_forward(params, x, channels, mlp_tile=512):
    first, second, third, fourth = channels
    S2, S4 = second * 7, fourth * 7
    B = x.shape[0]
    assert x.shape[1:] == (first, 8, 7), "model requires NCHW input (B, first, 8, 7)"

    # NCHW -> per-batch node layout (8 nodes, (channel, w) features).  This is the only
    # wrapper-level layout op on activations in the whole forward.
    xg_in = jnp.transpose(x, (0, 2, 1, 3)).reshape(B, 8, first * 7)

    x_input_node, z = stage_a(xg_in, params["w1_node"], params["ws_node"],
                              params["w_gnn"], params["b_gnn"], second=second)
    z = z[:, 0, :]                                                   # (B, S2)

    # PyTorch raw-reshape "scramble" of the node-broadcast GNN output, kept bit-exact on the
    # tiny (B, 8, S2) tensor, then converted to the node layout stage B consumes.
    z_b = jnp.broadcast_to(z[:, None, :], (B, 8, S2))
    z_nchw = jnp.transpose(z_b.reshape(8, second, B, 7), (2, 1, 0, 3))   # torch.transpose(.,0,2)
    z_node = jnp.transpose(z_nchw, (0, 2, 1, 3)).reshape(B, 8, S2)

    t3_node = stage_b(x_input_node, z_node, params["w2_node"], params["w3_node"],
                      third=third, fourth=fourth)

    # (h, c, w)-ordered flatten; mlp1_w rows were permuted to match x.view(bs, -1) semantics.
    flat = t3_node.reshape(B, 8 * S4)
    return mlp_head(flat, params["mlp1_w"], params["mlp1_b"],
                    params["mlp2_w"], params["mlp2_b"],
                    params["mlp3_w"], params["mlp3_b"], tile=mlp_tile)


# ------------------------------- pure-jnp reference (self-check) ---------------------------

def reference_forward(params, x, channels):
    first, second, third, fourth = channels
    S2, S3, S4 = second * 7, third * 7, fourth * 7
    B = x.shape[0]
    xg = jnp.transpose(x, (0, 2, 1, 3)).reshape(B, 8, first * 7)
    y = jnp.einsum("bnk,ko->bno", xg, params["w1_node"])
    t1 = y[..., :S2] * jax.nn.sigmoid(y[..., S2:])
    x_in = jnp.einsum("bnk,ko->bno", t1, params["ws_node"])
    xm = jnp.mean(t1, axis=1)
    z = xm @ params["w_gnn"] + params["b_gnn"]
    z_b = jnp.broadcast_to(z[:, None, :], (B, 8, S2))
    z_nchw = jnp.transpose(z_b.reshape(8, second, B, 7), (2, 1, 0, 3))
    z_node = jnp.transpose(z_nchw, (0, 2, 1, 3)).reshape(B, 8, S2)
    s1 = jnp.maximum(x_in + z_node, 0.0)
    y2 = jnp.einsum("bnk,ko->bno", s1, params["w2_node"])
    t2 = y2[..., :S3] * jax.nn.sigmoid(y2[..., S3:])
    y3 = jnp.einsum("bnk,ko->bno", t2, params["w3_node"])
    t3 = y3[..., :S4] * jax.nn.sigmoid(y3[..., S4:])
    flat = t3.reshape(B, 8 * S4)
    h1 = jnp.maximum(jnp.dot(flat.astype(jnp.bfloat16), params["mlp1_w"],
                             preferred_element_type=jnp.float32) + params["mlp1_b"], 0.0)
    h2 = jnp.maximum(jnp.dot(h1.astype(jnp.bfloat16), params["mlp2_w"],
                             preferred_element_type=jnp.float32) + params["mlp2_b"], 0.0)
    logits = jnp.dot(h2.astype(jnp.bfloat16), params["mlp3_w"],
                     preferred_element_type=jnp.float32) + params["mlp3_b"]
    return jax.nn.log_softmax(logits, axis=-1)


# ---------------------------------------- main ---------------------------------------------

if __name__ == "__main__":
    channels = (4, 8, 12, 16)      # (first, second, third, fourth)
    num_classes = 7
    B = 2                          # GNN hard-codes 8 nodes and the *7 feature factor

    key = jax.random.PRNGKey(0)
    pkey, xkey = jax.random.split(key)
    params = make_params(channels, num_classes, pkey)
    x = jax.random.normal(xkey, (B, channels[0], 8, 7), jnp.float32)

    fwd = jax.jit(functools.partial(armband_forward, channels=channels))
    out = jax.block_until_ready(fwd(params, x))

    ref = jax.block_until_ready(reference_forward(params, x, channels))

    assert out.shape == (B, num_classes)
    assert bool(jnp.all(jnp.isfinite(out)))
    np.testing.assert_allclose(np.asarray(out), np.asarray(ref), rtol=5e-2, atol=5e-2)
    print("KERNEL_OK")
</pallas_src>

<mosaic_0001>
module attributes {stable_mosaic.version = 11 : i64} {
  func.func @_stage_a_kernel(%arg0: i32, %arg1: memref<1x8x28xf32, #tpu.memory_space<vmem>>, %arg2: memref<28x112xf32, #tpu.memory_space<vmem>>, %arg3: memref<56x56xf32, #tpu.memory_space<vmem>>, %arg4: memref<56x56xf32, #tpu.memory_space<vmem>>, %arg5: memref<1x56xf32, #tpu.memory_space<vmem>>, %arg6: memref<1x8x56xf32, #tpu.memory_space<vmem>>, %arg7: memref<1x1x56xf32, #tpu.memory_space<vmem>>) attributes {dimension_semantics = [#tpu.dimension_semantics<parallel>], iteration_bounds = array<i64: 2>, scalar_prefetch = 0 : i64, scratch_operands = 0 : i64, tpu.core_type = #tpu.core_type<tc>, window_params = [{transform_indices = @transform_0, window_bounds = array<i64: 1, 8, 28>}, {pipeline_mode = #tpu.pipeline_mode<synchronous>, transform_indices = @transform_1, window_bounds = array<i64: 28, 112>}, {pipeline_mode = #tpu.pipeline_mode<synchronous>, transform_indices = @transform_2, window_bounds = array<i64: 56, 56>}, {pipeline_mode = #tpu.pipeline_mode<synchronous>, transform_indices = @transform_3, window_bounds = array<i64: 56, 56>}, {pipeline_mode = #tpu.pipeline_mode<synchronous>, transform_indices = @transform_4, window_bounds = array<i64: 1, 56>}, {transform_indices = @transform_5, window_bounds = array<i64: 1, 8, 56>}, {transform_indices = @transform_6, window_bounds = array<i64: 1, 1, 56>}]} {
    %c0 = arith.constant 0 : index
    %c0_0 = arith.constant 0 : index
    %c0_1 = arith.constant 0 : index
    %0 = vector.load %arg1[%c0, %c0_0, %c0_1] : memref<1x8x28xf32, #tpu.memory_space<vmem>>, vector<1x8x28xf32>
    %1 = vector.shape_cast %0 : vector<1x8x28xf32> to vector<8x28xf32>
    %c0_2 = arith.constant 0 : index
    %c0_3 = arith.constant 0 : index
    %2 = vector.load %arg2[%c0_2, %c0_3] : memref<28x112xf32, #tpu.memory_space<vmem>>, vector<28x112xf32>
    %cst = arith.constant dense<0.000000e+00> : vector<8x112xf32>
    %3 = tpu.matmul %1, %2, %cst {dimension_numbers = #tpu.dot_dimension_numbers<[1], [0], [0], [1], [0, 0, 1, 1], [], []>} : vector<8x28xf32>, vector<28x112xf32>, vector<8x112xf32> -> vector<8x112xf32>
    %4 = vector.extract_strided_slice %3 {offsets = [0, 0], sizes = [8, 56], strides = [1, 1]} : vector<8x112xf32> to vector<8x56xf32>
    %5 = vector.extract_strided_slice %3 {offsets = [0, 56], sizes = [8, 56], strides = [1, 1]} : vector<8x112xf32> to vector<8x56xf32>
    %6 = arith.negf %5 : vector<8x56xf32>
    %7 = math.exp %6 : vector<8x56xf32>
    %cst_4 = arith.constant 1.000000e+00 : f32
    %8 = vector.broadcast %cst_4 : f32 to vector<8x56xf32>
    %9 = arith.addf %8, %7 : vector<8x56xf32>
    %10 = arith.divf %8, %9 : vector<8x56xf32>
    %11 = arith.mulf %4, %10 : vector<8x56xf32>
    %c0_5 = arith.constant 0 : index
    %c0_6 = arith.constant 0 : index
    %12 = vector.load %arg3[%c0_5, %c0_6] : memref<56x56xf32, #tpu.memory_space<vmem>>, vector<56x56xf32>
    %cst_7 = arith.constant dense<0.000000e+00> : vector<8x56xf32>
    %13 = tpu.matmul %11, %12, %cst_7 {dimension_numbers = #tpu.dot_dimension_numbers<[1], [0], [0], [1], [0, 0, 1, 1], [], []>} : vector<8x56xf32>, vector<56x56xf32>, vector<8x56xf32> -> vector<8x56xf32>
    %c0_8 = arith.constant 0 : index
    %c0_9 = arith.constant 0 : index
    %c0_10 = arith.constant 0 : index
    %14 = vector.load %arg6[%c0_8, %c0_9, %c0_10] : memref<1x8x56xf32, #tpu.memory_space<vmem>>, vector<1x8x56xf32>
    %15 = vector.shape_cast %14 : vector<1x8x56xf32> to vector<8x56xf32>
    %16 = vector.shape_cast %13 : vector<8x56xf32> to vector<1x8x56xf32>
    tpu.vector_store %arg6[%c0_8, %c0_9, %c0_10], %16 {strides = array<i32>} : memref<1x8x56xf32, #tpu.memory_space<vmem>>, vector<1x8x56xf32>,
    %cst_11 = arith.constant dense<0.000000e+00> : vector<56xf32>
    %17 = vector.multi_reduction <add>, %11, %cst_11 [0] : vector<8x56xf32> to vector<56xf32>
    %18 = vector.shape_cast %17 : vector<56xf32> to vector<1x56xf32>
    %cst_12 = arith.constant 8.000000e+00 : f32
    %19 = vector.broadcast %cst_12 : f32 to vector<1x56xf32>
    %20 = arith.divf %18, %19 : vector<1x56xf32>
    %c0_13 = arith.constant 0 : index
    %c0_14 = arith.constant 0 : index
    %21 = vector.load %arg4[%c0_13, %c0_14] : memref<56x56xf32, #tpu.memory_space<vmem>>, vector<56x56xf32>
    %cst_15 = arith.constant dense<0.000000e+00> : vector<1x56xf32>
    %22 = tpu.matmul %20, %21, %cst_15 {dimension_numbers = #tpu.dot_dimension_numbers<[1], [0], [0], [1], [0, 0, 1, 1], [], []>} : vector<1x56xf32>, vector<56x56xf32>, vector<1x56xf32> -> vector<1x56xf32>
    %c0_16 = arith.constant 0 : index
    %c0_17 = arith.constant 0 : index
    %23 = vector.load %arg5[%c0_16, %c0_17] : memref<1x56xf32, #tpu.memory_space<vmem>>, vector<1x56xf32>
    %24 = arith.addf %22, %23 : vector<1x56xf32>
    %c0_18 = arith.constant 0 : index
    %c0_19 = arith.constant 0 : index
    %c0_20 = arith.constant 0 : index
    %25 = vector.load %arg7[%c0_18, %c0_19, %c0_20] : memref<1x1x56xf32, #tpu.memory_space<vmem>>, vector<1x1x56xf32>
    %26 = vector.shape_cast %25 : vector<1x1x56xf32> to vector<1x56xf32>
    %27 = vector.shape_cast %24 : vector<1x56xf32> to vector<1x1x56xf32>
    tpu.vector_store %arg7[%c0_18, %c0_19, %c0_20], %27 {strides = array<i32>} : memref<1x1x56xf32, #tpu.memory_space<vmem>>, vector<1x1x56xf32>,
    return
  }
  func.func @transform_0(%arg0: i32) -> (i32, i32, i32) {
    %c0_i32 = arith.constant 0 : i32
    %c0_i32_0 = arith.constant 0 : i32
    %c0_i32_1 = arith.constant 0 : i32
    return %arg0, %c0_i32, %c0_i32_0 : i32, i32, i32
  }
  func.func @transform_1(%arg0: i32) -> (i32, i32) {
    %c0_i32 = arith.constant 0 : i32
    %c0_i32_0 = arith.constant 0 : i32
    %c0_i32_1 = arith.constant 0 : i32
    return %c0_i32, %c0_i32_0 : i32, i32
  }
  func.func @transform_2(%arg0: i32) -> (i32, i32) {
    %c0_i32 = arith.constant 0 : i32
    %c0_i32_0 = arith.constant 0 : i32
    %c0_i32_1 = arith.constant 0 : i32
    return %c0_i32, %c0_i32_0 : i32, i32
  }
  func.func @transform_3(%arg0: i32) -> (i32, i32) {
    %c0_i32 = arith.constant 0 : i32
    %c0_i32_0 = arith.constant 0 : i32
    %c0_i32_1 = arith.constant 0 : i32
    return %c0_i32, %c0_i32_0 : i32, i32
  }
  func.func @transform_4(%arg0: i32) -> (i32, i32) {
    %c0_i32 = arith.constant 0 : i32
    %c0_i32_0 = arith.constant 0 : i32
    %c0_i32_1 = arith.constant 0 : i32
    return %c0_i32, %c0_i32_0 : i32, i32
  }
  func.func @transform_5(%arg0: i32) -> (i32, i32, i32) {
    %c0_i32 = arith.constant 0 : i32
    %c0_i32_0 = arith.constant 0 : i32
    %c0_i32_1 = arith.constant 0 : i32
    return %arg0, %c0_i32, %c0_i32_0 : i32, i32, i32
  }
  func.func @transform_6(%arg0: i32) -> (i32, i32, i32) {
    %c0_i32 = arith.constant 0 : i32
    %c0_i32_0 = arith.constant 0 : i32
    %c0_i32_1 = arith.constant 0 : i32
    return %arg0, %c0_i32, %c0_i32_0 : i32, i32, i32
  }
}

module attributes {stable_mosaic.version = 11 : i64} {
  func.func @_stage_b_kernel(%arg0: i32, %arg1: memref<1x8x56xf32, #tpu.memory_space<vmem>>, %arg2: memref<1x8x56xf32, #tpu.memory_space<vmem>>, %arg3: memref<56x168xf32, #tpu.memory_space<vmem>>, %arg4: memref<84x224xf32, #tpu.memory_space<vmem>>, %arg5: memref<1x8x112xf32, #tpu.memory_space<vmem>>) attributes {dimension_semantics = [#tpu.dimension_semantics<parallel>], iteration_bounds = array<i64: 2>, scalar_prefetch = 0 : i64, scratch_operands = 0 : i64, tpu.core_type = #tpu.core_type<tc>, window_params = [{transform_indices = @transform_0, window_bounds = array<i64: 1, 8, 56>}, {transform_indices = @transform_1, window_bounds = array<i64: 1, 8, 56>}, {pipeline_mode = #tpu.pipeline_mode<synchronous>, transform_indices = @transform_2, window_bounds = array<i64: 56, 168>}, {pipeline_mode = #tpu.pipeline_mode<synchronous>, transform_indices = @transform_3, window_bounds = array<i64: 84, 224>}, {transform_indices = @transform_4, window_bounds = array<i64: 1, 8, 112>}]} {
    %c0 = arith.constant 0 : index
    %c0_0 = arith.constant 0 : index
    %c0_1 = arith.constant 0 : index
    %0 = vector.load %arg1[%c0, %c0_0, %c0_1] : memref<1x8x56xf32, #tpu.memory_space<vmem>>, vector<1x8x56xf32>
    %1 = vector.shape_cast %0 : vector<1x8x56xf32> to vector<8x56xf32>
    %c0_2 = arith.constant 0 : index
    %c0_3 = arith.constant 0 : index
    %c0_4 = arith.constant 0 : index
    %2 = vector.load %arg2[%c0_2, %c0_3, %c0_4] : memref<1x8x56xf32, #tpu.memory_space<vmem>>, vector<1x8x56xf32>
    %3 = vector.shape_cast %2 : vector<1x8x56xf32> to vector<8x56xf32>
    %4 = arith.addf %1, %3 : vector<8x56xf32>
    %cst = arith.constant 0.000000e+00 : f32
    %5 = vector.broadcast %cst : f32 to vector<8x56xf32>
    %6 = arith.maximumf %4, %5 : vector<8x56xf32>
    %c0_5 = arith.constant 0 : index
    %c0_6 = arith.constant 0 : index
    %7 = vector.load %arg3[%c0_5, %c0_6] : memref<56x168xf32, #tpu.memory_space<vmem>>, vector<56x168xf32>
    %cst_7 = arith.constant dense<0.000000e+00> : vector<8x168xf32>
    %8 = tpu.matmul %6, %7, %cst_7 {dimension_numbers = #tpu.dot_dimension_numbers<[1], [0], [0], [1], [0, 0, 1, 1], [], []>} : vector<8x56xf32>, vector<56x168xf32>, vector<8x168xf32> -> vector<8x168xf32>
    %9 = vector.extract_strided_slice %8 {offsets = [0, 0], sizes = [8, 84], strides = [1, 1]} : vector<8x168xf32> to vector<8x84xf32>
    %10 = vector.extract_strided_slice %8 {offsets = [0, 84], sizes = [8, 84], strides = [1, 1]} : vector<8x168xf32> to vector<8x84xf32>
    %11 = arith.negf %10 : vector<8x84xf32>
    %12 = math.exp %11 : vector<8x84xf32>
    %cst_8 = arith.constant 1.000000e+00 : f32
    %13 = vector.broadcast %cst_8 : f32 to vector<8x84xf32>
    %14 = arith.addf %13, %12 : vector<8x84xf32>
    %15 = arith.divf %13, %14 : vector<8x84xf32>
    %16 = arith.mulf %9, %15 : vector<8x84xf32>
    %c0_9 = arith.constant 0 : index
    %c0_10 = arith.constant 0 : index
    %17 = vector.load %arg4[%c0_9, %c0_10] : memref<84x224xf32, #tpu.memory_space<vmem>>, vector<84x224xf32>
    %cst_11 = arith.constant dense<0.000000e+00> : vector<8x224xf32>
    %18 = tpu.matmul %16, %17, %cst_11 {dimension_numbers = #tpu.dot_dimension_numbers<[1], [0], [0], [1], [0, 0, 1, 1], [], []>} : vector<8x84xf32>, vector<84x224xf32>, vector<8x224xf32> -> vector<8x224xf32>
    %19 = vector.extract_strided_slice %18 {offsets = [0, 0], sizes = [8, 112], strides = [1, 1]} : vector<8x224xf32> to vector<8x112xf32>
    %20 = vector.extract_strided_slice %18 {offsets = [0, 112], sizes = [8, 112], strides = [1, 1]} : vector<8x224xf32> to vector<8x112xf32>
    %21 = arith.negf %20 : vector<8x112xf32>
    %22 = math.exp %21 : vector<8x112xf32>
    %cst_12 = arith.constant 1.000000e+00 : f32
    %23 = vector.broadcast %cst_12 : f32 to vector<8x112xf32>
    %24 = arith.addf %23, %22 : vector<8x112xf32>
    %25 = arith.divf %23, %24 : vector<8x112xf32>
    %26 = arith.mulf %19, %25 : vector<8x112xf32>
    %c0_13 = arith.constant 0 : index
    %c0_14 = arith.constant 0 : index
    %c0_15 = arith.constant 0 : index
    %27 = vector.load %arg5[%c0_13, %c0_14, %c0_15] : memref<1x8x112xf32, #tpu.memory_space<vmem>>, vector<1x8x112xf32>
    %28 = vector.shape_cast %27 : vector<1x8x112xf32> to vector<8x112xf32>
    %29 = vector.shape_cast %26 : vector<8x112xf32> to vector<1x8x112xf32>
    tpu.vector_store %arg5[%c0_13, %c0_14, %c0_15], %29 {strides = array<i32>} : memref<1x8x112xf32, #tpu.memory_space<vmem>>, vector<1x8x112xf32>,
    return
  }
  func.func @transform_0(%arg0: i32) -> (i32, i32, i32) {
    %c0_i32 = arith.constant 0 : i32
    %c0_i32_0 = arith.constant 0 : i32
    %c0_i32_1 = arith.constant 0 : i32
    return %arg0, %c0_i32, %c0_i32_0 : i32, i32, i32
  }
  func.func @transform_1(%arg0: i32) -> (i32, i32, i32) {
    %c0_i32 = arith.constant 0 : i32
    %c0_i32_0 = arith.constant 0 : i32
    %c0_i32_1 = arith.constant 0 : i32
    return %arg0, %c0_i32, %c0_i32_0 : i32, i32, i32
  }
  func.func @transform_2(%arg0: i32) -> (i32, i32) {
    %c0_i32 = arith.constant 0 : i32
    %c0_i32_0 = arith.constant 0 : i32
    %c0_i32_1 = arith.constant 0 : i32
    return %c0_i32, %c0_i32_0 : i32, i32
  }
  func.func @transform_3(%arg0: i32) -> (i32, i32) {
    %c0_i32 = arith.constant 0 : i32
    %c0_i32_0 = arith.constant 0 : i32
    %c0_i32_1 = arith.constant 0 : i32
    return %c0_i32, %c0_i32_0 : i32, i32
  }
  func.func @transform_4(%arg0: i32) -> (i32, i32, i32) {
    %c0_i32 = arith.constant 0 : i32
    %c0_i32_0 = arith.constant 0 : i32
    %c0_i32_1 = arith.constant 0 : i32
    return %arg0, %c0_i32, %c0_i32_0 : i32, i32, i32
  }
}

module attributes {stable_mosaic.version = 11 : i64} {
  func.func @_mlp_kernel(%arg0: i32, %arg1: memref<2x896xf32, #tpu.memory_space<vmem>>, %arg2: memref<896x500xbf16, #tpu.memory_space<vmem>>, %arg3: memref<1x500xf32, #tpu.memory_space<vmem>>, %arg4: memref<500x512xbf16, #tpu.memory_space<vmem>>, %arg5: memref<1x512xf32, #tpu.memory_space<vmem>>, %arg6: memref<512x7xbf16, #tpu.memory_space<vmem>>, %arg7: memref<1x7xf32, #tpu.memory_space<vmem>>, %arg8: memref<2x7xf32, #tpu.memory_space<vmem>>, %arg9: memref<2x500xf32, #tpu.memory_space<vmem>>, %arg10: memref<2x7xf32, #tpu.memory_space<vmem>>) attributes {dimension_semantics = [#tpu.dimension_semantics<arbitrary>], iteration_bounds = array<i64: 4>, scalar_prefetch = 0 : i64, scratch_operands = 2 : i64, tpu.core_type = #tpu.core_type<tc>, window_params = [{pipeline_mode = #tpu.pipeline_mode<synchronous>, transform_indices = @transform_0, window_bounds = array<i64: 2, 896>}, {pipeline_mode = #tpu.pipeline_mode<synchronous>, transform_indices = @transform_1, window_bounds = array<i64: 896, 500>}, {pipeline_mode = #tpu.pipeline_mode<synchronous>, transform_indices = @transform_2, window_bounds = array<i64: 1, 500>}, {transform_indices = @transform_3, window_bounds = array<i64: 500, 512>}, {transform_indices = @transform_4, window_bounds = array<i64: 1, 512>}, {transform_indices = @transform_5, window_bounds = array<i64: 512, 7>}, {pipeline_mode = #tpu.pipeline_mode<synchronous>, transform_indices = @transform_6, window_bounds = array<i64: 1, 7>}, {pipeline_mode = #tpu.pipeline_mode<synchronous>, transform_indices = @transform_7, window_bounds = array<i64: 2, 7>}]} {
    %c0_i32 = arith.constant 0 : i32
    %0 = arith.cmpi eq, %arg0, %c0_i32 : i32
    %1 = arith.extui %0 : i1 to i32
    %c0_i32_0 = arith.constant 0 : i32
    %2 = arith.cmpi ne, %1, %c0_i32_0 : i32
    scf.if %2 {
      %c0_15 = arith.constant 0 : index
      %c0_16 = arith.constant 0 : index
      %21 = vector.load %arg1[%c0_15, %c0_16] : memref<2x896xf32, #tpu.memory_space<vmem>>, vector<2x896xf32>
      %22 = arith.truncf %21 : vector<2x896xf32> to vector<2x896xbf16>
      %c0_17 = arith.constant 0 : index
      %c0_18 = arith.constant 0 : index
      %23 = vector.load %arg2[%c0_17, %c0_18] : memref<896x500xbf16, #tpu.memory_space<vmem>>, vector<896x500xbf16>
      %cst_19 = arith.constant dense<0.000000e+00> : vector<2x500xf32>
      %24 = tpu.matmul %22, %23, %cst_19 {dimension_numbers = #tpu.dot_dimension_numbers<[1], [0], [0], [1], [0, 0, 1, 1], [], []>} : vector<2x896xbf16>, vector<896x500xbf16>, vector<2x500xf32> -> vector<2x500xf32>
      %c0_20 = arith.constant 0 : index
      %c0_21 = arith.constant 0 : index
      %25 = vector.load %arg3[%c0_20, %c0_21] : memref<1x500xf32, #tpu.memory_space<vmem>>, vector<1x500xf32>
      %26 = vector.broadcast %25 : vector<1x500xf32> to vector<2x500xf32>
      %27 = arith.addf %24, %26 : vector<2x500xf32>
      %cst_22 = arith.constant 0.000000e+00 : f32
      %28 = vector.broadcast %cst_22 : f32 to vector<2x500xf32>
      %29 = arith.maximumf %27, %28 : vector<2x500xf32>
      %c0_23 = arith.constant 0 : index
      %c0_24 = arith.constant 0 : index
      %30 = vector.load %arg9[%c0_23, %c0_24] : memref<2x500xf32, #tpu.memory_space<vmem>>, vector<2x500xf32>
      tpu.vector_store %arg9[%c0_23, %c0_24], %29 {strides = array<i32>} : memref<2x500xf32, #tpu.memory_space<vmem>>, vector<2x500xf32>,
      %cst_25 = arith.constant 0.000000e+00 : f32
      %31 = vector.broadcast %cst_25 : f32 to vector<2x7xf32>
      %c0_26 = arith.constant 0 : index
      %c0_27 = arith.constant 0 : index
      %32 = vector.load %arg10[%c0_26, %c0_27] : memref<2x7xf32, #tpu.memory_space<vmem>>, vector<2x7xf32>
      tpu.vector_store %arg10[%c0_26, %c0_27], %31 {strides = array<i32>} : memref<2x7xf32, #tpu.memory_space<vmem>>, vector<2x7xf32>,
    } else {
    }
    %c0 = arith.constant 0 : index
    %c0_1 = arith.constant 0 : index
    %3 = vector.load %arg9[%c0, %c0_1] : memref<2x500xf32, #tpu.memory_space<vmem>>, vector<2x500xf32>
    %4 = arith.truncf %3 : vector<2x500xf32> to vector<2x500xbf16>
    %c0_2 = arith.constant 0 : index
    %c0_3 = arith.constant 0 : index
    %5 = vector.load %arg4[%c0_2, %c0_3] : memref<500x512xbf16, #tpu.memory_space<vmem>>, vector<500x512xbf16>
    %cst = arith.constant dense<0.000000e+00> : vector<2x512xf32>
    %6 = tpu.matmul %4, %5, %cst {dimension_numbers = #tpu.dot_dimension_numbers<[1], [0], [0], [1], [0, 0, 1, 1], [], []>} : vector<2x500xbf16>, vector<500x512xbf16>, vector<2x512xf32> -> vector<2x512xf32>
    %c0_4 = arith.constant 0 : index
    %c0_5 = arith.constant 0 : index
    %7 = vector.load %arg5[%c0_4, %c0_5] : memref<1x512xf32, #tpu.memory_space<vmem>>, vector<1x512xf32>
    %8 = vector.broadcast %7 : vector<1x512xf32> to vector<2x512xf32>
    %9 = arith.addf %6, %8 : vector<2x512xf32>
    %cst_6 = arith.constant 0.000000e+00 : f32
    %10 = vector.broadcast %cst_6 : f32 to vector<2x512xf32>
    %11 = arith.maximumf %9, %10 : vector<2x512xf32>
    %c0_7 = arith.constant 0 : index
    %c0_8 = arith.constant 0 : index
    %12 = vector.load %arg10[%c0_7, %c0_8] : memref<2x7xf32, #tpu.memory_space<vmem>>, vector<2x7xf32>
    %13 = arith.truncf %11 : vector<2x512xf32> to vector<2x512xbf16>
    %c0_9 = arith.constant 0 : index
    %c0_10 = arith.constant 0 : index
    %14 = vector.load %arg6[%c0_9, %c0_10] : memref<512x7xbf16, #tpu.memory_space<vmem>>, vector<512x7xbf16>
    %cst_11 = arith.constant dense<0.000000e+00> : vector<2x7xf32>
    %15 = tpu.matmul %13, %14, %cst_11 {dimension_numbers = #tpu.dot_dimension_numbers<[1], [0], [0], [1], [0, 0, 1, 1], [], []>} : vector<2x512xbf16>, vector<512x7xbf16>, vector<2x7xf32> -> vector<2x7xf32>
    %16 = arith.addf %12, %15 : vector<2x7xf32>
    %c0_12 = arith.constant 0 : index
    %c0_13 = arith.constant 0 : index
    %17 = vector.load %arg10[%c0_12, %c0_13] : memref<2x7xf32, #tpu.memory_space<vmem>>, vector<2x7xf32>
    tpu.vector_store %arg10[%c0_12, %c0_13], %16 {strides = array<i32>} : memref<2x7xf32, #tpu.memory_space<vmem>>, vector<2x7xf32>,
    %c3_i32 = arith.constant 3 : i32
    %18 = arith.cmpi eq, %arg0, %c3_i32 : i32
    %19 = arith.extui %18 : i1 to i32
    %c0_i32_14 = arith.constant 0 : i32
    %20 = arith.cmpi ne, %19, %c0_i32_14 : i32
    scf.if %20 {
      %c0_15 = arith.constant 0 : index
      %c0_16 = arith.constant 0 : index
      %21 = vector.load %arg10[%c0_15, %c0_16] : memref<2x7xf32, #tpu.memory_space<vmem>>, vector<2x7xf32>
      %c0_17 = arith.constant 0 : index
      %c0_18 = arith.constant 0 : index
      %22 = vector.load %arg7[%c0_17, %c0_18] : memref<1x7xf32, #tpu.memory_space<vmem>>, vector<1x7xf32>
      %23 = vector.broadcast %22 : vector<1x7xf32> to vector<2x7xf32>
      %24 = arith.addf %21, %23 : vector<2x7xf32>
      %cst_19 = arith.constant dense<0xFF800000> : vector<2xf32>
      %25 = vector.multi_reduction <maximumf>, %24, %cst_19 [1] : vector<2x7xf32> to vector<2xf32>
      %26 = vector.shape_cast %25 : vector<2xf32> to vector<2x1xf32>
      %27 = vector.broadcast %26 : vector<2x1xf32> to vector<2x7xf32>
      %28 = arith.subf %24, %27 : vector<2x7xf32>
      %29 = math.exp %28 : vector<2x7xf32>
      %cst_20 = arith.constant dense<0.000000e+00> : vector<2xf32>
      %30 = vector.multi_reduction <add>, %29, %cst_20 [1] : vector<2x7xf32> to vector<2xf32>
      %31 = vector.shape_cast %30 : vector<2xf32> to vector<2x1xf32>
      %32 = math.log %31 : vector<2x1xf32>
      %33 = arith.addf %32, %26 : vector<2x1xf32>
      %34 = vector.broadcast %33 : vector<2x1xf32> to vector<2x7xf32>
      %35 = arith.subf %24, %34 : vector<2x7xf32>
      %c0_21 = arith.constant 0 : index
      %c0_22 = arith.constant 0 : index
      %36 = vector.load %arg8[%c0_21, %c0_22] : memref<2x7xf32, #tpu.memory_space<vmem>>, vector<2x7xf32>
      tpu.vector_store %arg8[%c0_21, %c0_22], %35 {strides = array<i32>} : memref<2x7xf32, #tpu.memory_space<vmem>>, vector<2x7xf32>,
    } else {
    }
    return
  }
  func.func @transform_0(%arg0: i32) -> (i32, i32) {
    %c0_i32 = arith.constant 0 : i32
    %c0_i32_0 = arith.constant 0 : i32
    %c0_i32_1 = arith.constant 0 : i32
    return %c0_i32, %c0_i32_0 : i32, i32
  }
  func.func @transform_1(%arg0: i32) -> (i32, i32) {
    %c0_i32 = arith.constant 0 : i32
    %c0_i32_0 = arith.constant 0 : i32
    %c0_i32_1 = arith.constant 0 : i32
    return %c0_i32, %c0_i32_0 : i32, i32
  }
  func.func @transform_2(%arg0: i32) -> (i32, i32) {
    %c0_i32 = arith.constant 0 : i32
    %c0_i32_0 = arith.constant 0 : i32
    %c0_i32_1 = arith.constant 0 : i32
    return %c0_i32, %c0_i32_0 : i32, i32
  }
  func.func @transform_3(%arg0: i32) -> (i32, i32) {
    %c0_i32 = arith.constant 0 : i32
    %c0_i32_0 = arith.constant 0 : i32
    return %c0_i32, %arg0 : i32, i32
  }
  func.func @transform_4(%arg0: i32) -> (i32, i32) {
    %c0_i32 = arith.constant 0 : i32
    %c0_i32_0 = arith.constant 0 : i32
    return %c0_i32, %arg0 : i32, i32
  }
  func.func @transform_5(%arg0: i32) -> (i32, i32) {
    %c0_i32 = arith.constant 0 : i32
    %c0_i32_0 = arith.constant 0 : i32
    return %arg0, %c0_i32 : i32, i32
  }
  func.func @transform_6(%arg0: i32) -> (i32, i32) {
    %c0_i32 = arith.constant 0 : i32
    %c0_i32_0 = arith.constant 0 : i32
    %c0_i32_1 = arith.constant 0 : i32
    return %c0_i32, %c0_i32_0 : i32, i32
  }
  func.func @transform_7(%arg0: i32) -> (i32, i32) {
    %c0_i32 = arith.constant 0 : i32
    %c0_i32_0 = arith.constant 0 : i32
    %c0_i32_1 = arith.constant 0 : i32
    return %c0_i32, %c0_i32_0 : i32, i32
  }
}

</mosaic_0001>

<bundles_post_ra>
// kernel: armband_forward.3
= control target key start
LH: loop header
LB: loop body
LE: loop exit
PB: predicated region body
PF: predicated region fallthrough
CT: control target
= control target key end

     0   :  { %12 = vsyncpa [#allocation3], 0  ;;  %s1229_s0 = inlined_call_operand.vmem [shape: f32[2,8,28], index: 0, kind: input, shape index: {}]   ;;  %s1230_s1 = inlined_call_operand.hbm [shape: f32[28,112], index: 1, kind: input, shape index: {}]   ;;  %s1231_s2 = inlined_call_operand.hbm [shape: f32[56,56], index: 2, kind: input, shape index: {}]   ;;  %s1232_s3 = inlined_call_operand.hbm [shape: f32[56,56], index: 3, kind: input, shape index: {}]   ;;  %s1233_s4 = inlined_call_operand.hbm [shape: f32[1,56], index: 4, kind: input, shape index: {}]   ;;  %s1234_s5 = inlined_call_operand.vmem [shape: f32[2,8,56], index: 5, kind: output, shape index: {0}]   ;;  %s1235_s6 = inlined_call_operand.vmem [shape: f32[2,1,56], index: 6, kind: output, shape index: {1}]  }
   0x1   :  { %13 = vsyncpa [#allocation5], 0 }
   0x2   :  { %14 = vsyncpa [#allocation8], 0  ;;  %s1051_s21 = smov 0  }
   0x3 LB: > { %s1057_s22 = sadd.s32 4294967295, %s1003_s21   ;;  %p702_p0 = scmp.ge.s32.totalorder %s1003_s21, 1  ;;  %s1003_s21 = sphi %s1051_s21, %s20_s21  }
   0x4   : > { %p187_p1 = scmp.lt.s32.totalorder %s1003_s21, 3  ;;  %p1236_p2 = scmp.eq.s32.totalorder %s1057_s22, 0 }
   0x5   : > { %s1005_s24 = smov [#allocation4]   ;;  %s1006_s26 = smov [#allocation2]  }
   0x6   : > { %p1062_p3 = pnand %p702_p0, %p187_p1  ;;  %s212_s25 = sshll.u32 %s1005_s24, 4  ;;  %s1066_s25 = int_to_ptr.vmem [resolvable:$true] %s212_s25 }
   0x7   : > { %s199_s27 = sshll.u32 %s1006_s26, 4  ;;  %s1007_s29 = smov [#allocation6]   ;;  %s1070_s27 = int_to_ptr.vmem [resolvable:$true] %s199_s27 }
   0x8   : > { %s1238_s23 = scalar_select %p1062_p3, 1, 0 }
   0x9   : > { %p829_p4 = pneg %p1062_p3  ;;  %s225_s30 = sshll.u32 %s1007_s29, 4  ;;  %s1078_s30 = int_to_ptr.vmem [resolvable:$true] %s225_s30 }
   0xa   : > { %s1008_s7 = smov [#allocation7]   ;;  %s873_s11 = scalar_lea.hbm %s1231_s2, 896 }
   0xb   : > { %p1074_p5 = pnand %p1236_p2, %p829_p4  ;;  %s1080_s8 = sshll.u32 %s1008_s7, 4  ;;  %s240_s8 = int_to_ptr.vmem [resolvable:$true] %s1080_s8 }
   0xc   : > { %p874_p6 = scmp.ne.s32.totalorder %s1231_s2, %s873_s11  ;;  %p880_p10 = scmp.lt.u32.totalorder %s873_s11, %s1231_s2 }
   0xd   : > { %p1090_p7 = pneg %p1074_p5 }
   0xf   : > { %p876_p8 = pnand %p1090_p7, %p874_p6 }
  0x11   : > { %p877_p9 = pneg %p876_p8 }
  0x13   : > { %p882_p11 = pnand %p880_p10, %p877_p9 }
  0x15   : > { %885 = shalt.err (!%p882_p11)
}
  0x16   : > { %s886_s17 = scalar_lea.vmem %s1066_s25, 896  ;;  %p894_p1 = scmp.lt.s32.totalorder %s1066_s25, %s1066_s25 }
  0x17   : > { %p887_p12 = scmp.ne.s32.totalorder %s1066_s25, %s886_s17  ;;  %p895_p4 = scmp.lt.s32.totalorder %s886_s17, %s886_s17 }
  0x19   : > { %p889_p13 = pnand %p887_p12, %p1090_p7  ;;  %p896_p6 = por %p895_p4, %p894_p1 }
  0x1b   : > { %p890_p0 = pneg %p889_p13 }
  0x1d   : > { %p897_p8 = pnand %p896_p6, %p890_p0 }
  0x1f   : > { %900 = shalt.err (!%p897_p8)
}
  0x20   : > { %s1009_s18 = smov 128   ;;  %s1010_s19 = smov 8  }
  0x21   : > { %835 = dma.hbm_to_vmem [thread:$0]  (!%p1074_p5), %s1231_s2, 896, %s1066_s25, [#allocation5], %s1009_s18, %s1009_s18, %s1010_s19  }
  0x22   : > { %s901_s7 = scalar_lea.hbm %s1230_s1, 512 }
  0x23   : > { %p902_p9 = scmp.ne.s32.totalorder %s1230_s1, %s901_s7  ;;  %p908_p12 = scmp.lt.u32.totalorder %s901_s7, %s1230_s1 }
  0x25   : > { %p904_p10 = pnand %p902_p9, %p1090_p7 }
  0x27   : > { %p905_p11 = pneg %p904_p10 }
  0x29   : > { %p910_p13 = pnand %p908_p12, %p905_p11 }
  0x2b   : > { %913 = shalt.err (!%p910_p13)
}
  0x2c   : > { %s914_s25 = scalar_lea.vmem %s1070_s27, 512  ;;  %p922_p6 = scmp.lt.s32.totalorder %s1070_s27, %s1070_s27 }
  0x2d   : > { %p915_p0 = scmp.ne.s32.totalorder %s1070_s27, %s914_s25  ;;  %p923_p8 = scmp.lt.s32.totalorder %s914_s25, %s914_s25 }
  0x2f   : > { %p917_p1 = pnand %p915_p0, %p1090_p7  ;;  %p924_p9 = por %p923_p8, %p922_p6 }
  0x31   : > { %p918_p4 = pneg %p917_p1 }
  0x33   : > { %p925_p10 = pnand %p924_p9, %p918_p4 }
  0x35   : > { %928 = shalt.err (!%p925_p10)
}
  0x36   : > { %832 = dma.hbm_to_vmem [thread:$0]  (!%p1074_p5), %s1230_s1, 512, %s1070_s27, [#allocation3], %s1009_s18, %s1009_s18, %s1010_s19  }
  0x37   : > { %s929_s20 = scalar_lea.hbm %s1232_s3, 896 }
  0x38   : > { %p930_p11 = scmp.ne.s32.totalorder %s1232_s3, %s929_s20  ;;  %p936_p0 = scmp.lt.u32.totalorder %s929_s20, %s1232_s3 }
  0x3a   : > { %p932_p12 = pnand %p930_p11, %p1090_p7 }
  0x3c   : > { %p933_p13 = pneg %p932_p12 }
  0x3e   : > { %p938_p1 = pnand %p936_p0, %p933_p13 }
  0x40   : > { %941 = shalt.err (!%p938_p1)
}
  0x41   : > { %s942_s27 = scalar_lea.vmem %s1078_s30, 896  ;;  %p950_p9 = scmp.lt.s32.totalorder %s1078_s30, %s1078_s30 }
  0x42   : > { %p943_p4 = scmp.ne.s32.totalorder %s1078_s30, %s942_s27  ;;  %p951_p10 = scmp.lt.s32.totalorder %s942_s27, %s942_s27 }
  0x44   : > { %p945_p6 = pnand %p943_p4, %p1090_p7  ;;  %p952_p11 = por %p951_p10, %p950_p9 }
  0x46   : > { %p946_p8 = pneg %p945_p6 }
  0x48   : > { %p953_p12 = pnand %p952_p11, %p946_p8 }
  0x4a   : > { %956 = shalt.err (!%p953_p12)
}
  0x4b   : > { %838 = dma.hbm_to_vmem [thread:$0]  (!%p1074_p5), %s1232_s3, 896, %s1078_s30, [#allocation5], %s1009_s18, %s1009_s18, %s1010_s19  }
  0x4c   : > { %s957_s25 = scalar_lea.hbm %s1233_s4, 16 }
  0x4d   : > { %p958_p13 = scmp.ne.s32.totalorder %s1233_s4, %s957_s25  ;;  %p964_p4 = scmp.lt.u32.totalorder %s957_s25, %s1233_s4 }
  0x4f   : > { %p960_p0 = pnand %p958_p13, %p1090_p7 }
  0x51   : > { %p961_p1 = pneg %p960_p0 }
  0x53   : > { %p966_p6 = pnand %p964_p4, %p961_p1 }
  0x55   : > { %969 = shalt.err (!%p966_p6)
}
  0x56   : > { %s970_s20 = scalar_lea.vmem %s240_s8, 16  ;;  %s977_s30 = scalar_lea.vmem %s240_s8, 32 }
  0x57   : > { %p971_p8 = scmp.ne.s32.totalorder %s240_s8, %s970_s20  ;;  %p978_p11 = scmp.lt.s32.totalorder %s240_s8, %s240_s8 }
  0x58   : > { %p979_p12 = scmp.lt.s32.totalorder %s977_s30, %s970_s20 }
  0x59   : > { %p973_p9 = pnand %p971_p8, %p1090_p7 }
  0x5a   : > { %p980_p2 = por %p979_p12, %p978_p11 }
  0x5b   : > { %p974_p10 = pneg %p973_p9 }
  0x5d   : > { %p981_p3 = pnand %p980_p2, %p974_p10 }
  0x5f   : > { %984 = shalt.err (!%p981_p3)
}
  0x60   : > { %841 = dma.hbm_to_vmem [thread:$0]  (!%p1074_p5), %s1233_s4, 16, %s240_s8, [#allocation8]  }
  0x61   : > { %p1241_p13 = scmp.ne.s32.totalorder %s1238_s23, 0 }
  0x62   : > { %p1242_p0 = scmp.eq.s32.totalorder (!%p1241_p13), %s1057_s22, 0 }
  0x63   : > { %259 = sbr.rel (%p1241_p13) target bundleno = 708 (0x2c4), region = 40 }
  0x6a   : > { %990 = dma.done.wait (%p1242_p0), [#allocation3], 512   ;;  %p1243_p7 = pmov %p1242_p0 }
  0x6b   : > { %p1244_p1 = pmov %p1242_p0 }
  0x6c   : > { %992 = vsyncadd (%p1243_p7), [#allocation3], 4294966784 }
  0x6d   : > { %994 = dma.done.wait (%p1244_p1), [#allocation5], 1792   ;;  %p1245_p2 = pmov %p1242_p0 }
  0x6e   : > { %p1246_p3 = pmov %p1242_p0 }
  0x6f   : > { %996 = vsyncadd (%p1245_p2), [#allocation5], 4294965504 }
  0x70   : > { %998 = dma.done.wait (%p1246_p3), [#allocation8], 16   ;;  %p1247_p5 = pmov %p1242_p0 }
  0x71   : > { %v1011_v0 = vmov 0.0|0.0   ;;  %p302_p4 = scmp.lt.s32.totalorder %s1057_s22, 1  ;;  %vm1012_vm0 = vmmov 0   ;;  %v1013_v1 = vmov 0.0   ;;  %v314_v2 = vld [vmem:[#allocation2] sm:$0xff]  ;;  %v315_v3 = vld [vmem:[#allocation2 + $0x8] sm:$0xff] }
  0x72   : > { %1000 = vsyncadd (%p1247_p5), [#allocation8], 4294967280  ;;  %788 = vmatprep.subr.bf16.mxu0 %v1011_v0  ;;  %795 = vmatprep.subr.bf16.mxu1 %v1011_v0  ;;  %v316_v4 = vld [vmem:[#allocation2 + $0x10] sm:$0xff]  ;;  %v789_v5 = vpack.c.bf16 %v315_v3, %v314_v2  ;;  %v317_v6 = vld [vmem:[#allocation2 + $0x18] sm:$0xf]  ;;  %vm322_vm1 = vcmask 1043456  }
  0x73   : > { %751 = vmatprep.mubr.msk.f32.mxu0 %vm1012_vm0, %v1013_v1  ;;  %768 = vmatprep.mubr.msk.f32.mxu1 %vm1012_vm0, %v1013_v1  ;;  %s1249_s22 = smov (!%p302_p4, %s1057_s22), 1  ;;  %v792_v7 = vpack.c.bf16 %v317_v6, %v316_v4  ;;  %vm1014_vm2 = vmmov 1   ;;  %vm318_vm4 = vcmask 228352   ;;  %v407_v9 = vld [vmem:[#allocation4] sm:$0xff]  ;;  %v408_v10 = vld [vmem:[#allocation4 + $0x8] sm:$0xff]  ;;  %v409_v11 = vld [vmem:[#allocation4 + $0x10] sm:$0xff] }
  0x74   : > { %s713_s23 = sshll.u32 %s1249_s22, 3  ;;  %790 = vmatpush3.bf16.msra.mxu0 %v789_v5  ;;  %vm793_vm3 = vmpackc.low %vm322_vm1, %vm1014_vm2  ;;  %v796_v12 = vpack.c.bf16 %v408_v10, %v407_v9  ;;  %v410_v13 = vld [vmem:[#allocation4 + $0x18] sm:$0xff]  ;;  %v411_v15 = vld [vmem:[#allocation4 + $0x20] sm:$0xff]  ;;  %s1015_s24 = smov 72   ;;  %vm414_vm5 = vcmask 457728   ;;  %vm579_vm6 = vcmask 450560  }
  0x75   : > { %791 = vmatprep.subr.bf16.mxu0 %v1011_v0  ;;  %s305_s14 = scalar_lea.vmem %s1229_s0, %s713_s23  ;;  %v799_v14 = vpack.c.bf16 %v410_v13, %v409_v11  ;;  %v412_v16 = vld [vmem:[#allocation4 + $0x28] sm:$0xff]  ;;  %v413_v23 = vld [vmem:[#allocation4 + $0x30] sm:$0xff]  ;;  %v498_v24 = vld [vmem:[#allocation6] sm:$0xff]  ;;  %s309_s7 = scalar_lea.vmem %s1234_s5, %s713_s23 }
  0x76   : > { %v313_v8 = vld [vmem:[%s305_s14] sm:$0xff]  ;;  %797 = vmatpush3.bf16.msra.mxu1 %v796_v12  ;;  %v802_v17 = vpack.c.bf16 %v412_v16, %v411_v15  ;;  %v500_v27 = vld [vmem:[#allocation6 + $0x10] sm:$0xff]  ;;  %v501_v28 = vld [vmem:[#allocation6 + $0x18] sm:$0xff]  ;;  %s312_s10 = scalar_lea.vmem %s1235_s6, %s1249_s22 }
  0x77   : > { %798 = vmatprep.subr.bf16.mxu1 %v1011_v0  ;;  %v499_v25 = vld [vmem:[#allocation6 + $0x8] sm:$0xff]  ;;  %v808_v29 = vpack.c.bf16 %v501_v28, %v500_v27  ;;  %v502_v30 = vld [vmem:[#allocation6 + $0x20] sm:$0xff]  ;;  %v504_v34 = vld [vmem:[#allocation6 + $0x30] sm:$0xff] }
  0x78   : > { %794 = vmatpush3.bf16.msk.msra.mxu0 %vm793_vm3, %v792_v7  ;;  %v805_v26 = vpack.c.bf16 %v499_v25, %v498_v24  ;;  %v503_v31 = vld [vmem:[#allocation6 + $0x28] sm:$0xff]  ;;  %v505_v47 = vld [vmem:[#allocation7] sm:$0x1] }
  0x79   : > { %804 = vmatprep.subr.bf16.mxu0 %v1011_v0  ;;  %v811_v32 = vpack.c.bf16 %v503_v31, %v502_v30 }
  0x7a   : > { %800 = vmatpush3.bf16.msra.mxu1 %v799_v14 }
  0x7b   : > { %752 = vmatmul.mubr.msk.f32.vlgmr.msra.gmra.mrb[0].mxu0 %vm318_vm4, %v313_v8  ;;  %801 = vmatprep.subr.bf16.mxu1 %v1011_v0 }
  0x7c   : > { %785 = vmatprep.mubr.msk.f32.mxu0 %vm1012_vm0, %v1013_v1  ;;  %806 = vmatpush3.bf16.msra.mxu0 %v805_v26 }
  0x7d   : > { %807 = vmatprep.subr.bf16.mxu0 %v1011_v0 }
  0x7e   : > { %803 = vmatpush3.bf16.msra.mxu1 %v802_v17 }
  0x7f   : > { %766 = vmatprep.subr.mxu1 %v1013_v1 }
  0x80   : > { %809 = vmatpush3.bf16.msra.mxu0 %v808_v29 }
  0x81   : > { %810 = vmatprep.subr.bf16.mxu0 %v1011_v0 }
  0x82   : > { %767 = vmatpush3.msra.mxu1 %v413_v23 }
  0x84   : > { %812 = vmatpush3.bf16.msra.mxu0 %v811_v32 }
  0x85   : > { %783 = vmatprep.subr.mxu0 %v1013_v1 }
  0x88   : > { %784 = vmatpush3.msra.mxu0 %v504_v34 }
 0x14e   : > { %v392_v18 = vpop.f32.mrb[0].mxu0 }
 0x14f   : > { %v717_v19 = vmul.f32 -1.442695, %v392_v18  ;;  %v753_v20 = vpop.f32.mrb[1].mxu0 }
 0x151   : > { %869 = vpow2.f32 %v717_v19 }
 0x15b   : > { %v870_v21 = vpop.eup %869 }
 0x15c   : > { %v399_v22 = vadd.f32 1.0, %v870_v21 }
 0x15e   : > { %871 = vrcp.f32 %v399_v22 }
 0x168   : > { %v872_v33 = vpop.eup %871 }
 0x169   : > { %403 = vrot.lane.b32.xlu0 %v872_v33, %s1015_s24 }
 0x1db   : > { %v404_v35 = vpop.permute.xlu0 %403 }
 0x1dc   : > { %v406_v36 = vmul.f32 %v404_v35, %v392_v18 }
 0x1de   : > { %v489_v37 = vsel %vm414_vm5, %v406_v36, 0.0  ;;  %769 = vmatmul.mubr.msk.f32.vlgmr.msra.gmra.mrb[0].mxu1 %vm414_vm5, %v406_v36 }
 0x1df   : > { %v490_v38 = vrot.slane %v489_v37, 4 }
 0x1e1   : > { %v491_v39 = vadd.f32 %v490_v38, %v489_v37 }
 0x1e3   : > { %v492_v40 = vrot.slane %v491_v39, 2 }
 0x1e5   : > { %v493_v41 = vadd.f32 %v492_v40, %v491_v39 }
 0x1e7   : > { %v494_v42 = vrot.slane %v493_v41, 1 }
 0x1e9   : > { %v495_v43 = vadd.f32 %v494_v42, %v493_v41 }
 0x1eb   : > { %v497_v44 = vmul.f32 0.125, %v495_v43 }
 0x1ed   : > { %786 = vmatmul.mubr.msk.f32.vlgmr.msra.gmra.mrb[2].mxu0 %vm414_vm5, %v497_v44 }
 0x2b1   : > { %v484_v45 = vpop.f32.mrb[0].mxu1 }
 0x2b2   : > { %488 = vst.msk [vmem:[%s309_s7] sm:$0xff] %vm414_vm5, %v484_v45  ;;  %v770_v46 = vpop.f32.mrb[1].mxu1 }
 0x2c0   : > { %v575_v48 = vpop.f32.mrb[2].mxu0 }
 0x2c1   : > { %v576_v49 = vadd.f32 %v575_v48, %v505_v47  ;;  %v787_v50 = vpop.f32.mrb[3].mxu0 }
 0x2c3   : > { %580 = vst.msk [vmem:[%s312_s10] sm:$0x1] %vm579_vm6, %v576_v49 }
 0x2c4 PF: > { %s20_s21 = sadd.s32 1, %s1003_s21  }
 0x2c5   : > { %p17_p6 = scmp.ge.s32.totalorder %s20_s21, 4  }
 0x2c7   :  { %19 = sbr.rel (!%p17_p6) target bundleno = 3 (0x3), region = 99 }
 0x2ce   :  { %612 = vsyncpa [#allocation3], 1 }
 0x2cf   :  { %614 = vsyncpa [#allocation3 + $0x1], 1 }
 0x2d0   :  { %615 = vsyncpa [#allocation5], 1 }
 0x2d1   :  { %616 = vsyncpa [#allocation8], 1 }

// kernel: armband_forward.4
= control target key start
LH: loop header
LB: loop body
LE: loop exit
PB: predicated region body
PF: predicated region fallthrough
CT: control target
= control target key end

     0   :  { %9 = vsyncpa [#allocation3], 0  ;;  %s879_s0 = inlined_call_operand.vmem [shape: f32[2,8,56], index: 0, kind: input, shape index: {}]   ;;  %s880_s1 = inlined_call_operand.vmem [shape: f32[2,8,56], index: 1, kind: input, shape index: {}]   ;;  %s881_s2 = inlined_call_operand.hbm [shape: f32[56,168], index: 2, kind: input, shape index: {}]   ;;  %s882_s3 = inlined_call_operand.hbm [shape: f32[84,224], index: 3, kind: input, shape index: {}]   ;;  %s883_s4 = inlined_call_operand.vmem [shape: f32[2,8,112], index: 4, kind: output, shape index: {}]  }
   0x1   :  { %10 = vsyncpa [#allocation5], 0  ;;  %s778_s15 = smov 0  }
   0x2 LB: > { %s784_s16 = sadd.s32 4294967295, %s744_s15   ;;  %p572_p0 = scmp.ge.s32.totalorder %s744_s15, 1  ;;  %s744_s15 = sphi %s778_s15, %s16_s15  }
   0x3   : > { %p141_p1 = scmp.lt.s32.totalorder %s744_s15, 3  ;;  %s746_s17 = smov [#allocation2]  }
   0x4   : > { %s153_s18 = sshll.u32 %s746_s17, 4  ;;  %p884_p3 = scmp.eq.s32.totalorder %s784_s16, 0  ;;  %s154_s18 = int_to_ptr.vmem [resolvable:$true] %s153_s18 }
   0x5   : > { %p788_p2 = pnand %p572_p0, %p141_p1  ;;  %s747_s20 = smov [#allocation4]  }
   0x6   : > { %s166_s21 = sshll.u32 %s747_s20, 4  ;;  %s674_s25 = scalar_lea.hbm %s881_s2, 1792  ;;  %s801_s21 = int_to_ptr.vmem [resolvable:$true] %s166_s21 }
   0x7   : > { %s886_s19 = scalar_select %p788_p2, 1, 0 }
   0x8   : > { %p632_p4 = pneg %p788_p2  ;;  %p675_p6 = scmp.ne.s32.totalorder %s881_s2, %s674_s25 }
   0x9   : > { %p681_p10 = scmp.lt.u32.totalorder %s674_s25, %s881_s2 }
   0xa   : > { %p797_p5 = pnand %p884_p3, %p632_p4 }
   0xc   : > { %p676_p7 = pneg %p797_p5 }
   0xe   : > { %p677_p8 = pnand %p676_p7, %p675_p6 }
  0x10   : > { %p678_p9 = pneg %p677_p8 }
  0x12   : > { %p683_p11 = pnand %p681_p10, %p678_p9 }
  0x14   : > { %686 = shalt.err (!%p683_p11)
}
  0x15   : > { %s687_s30 = scalar_lea.vmem %s154_s18, 1792  ;;  %p695_p1 = scmp.lt.s32.totalorder %s154_s18, %s154_s18 }
  0x16   : > { %p688_p12 = scmp.ne.s32.totalorder %s154_s18, %s687_s30  ;;  %p696_p4 = scmp.lt.s32.totalorder %s687_s30, %s687_s30 }
  0x18   : > { %p690_p13 = pnand %p688_p12, %p676_p7  ;;  %p697_p3 = por %p696_p4, %p695_p1 }
  0x1a   : > { %p691_p0 = pneg %p690_p13 }
  0x1c   : > { %p698_p2 = pnand %p697_p3, %p691_p0 }
  0x1e   : > { %701 = shalt.err (!%p698_p2)
}
  0x1f   : > { %s748_s5 = smov 256   ;;  %s749_s6 = smov 16  }
  0x20   : > { %635 = dma.hbm_to_vmem [thread:$0]  (!%p797_p5), %s881_s2, 1792, %s154_s18, [#allocation3], %s748_s5, %s748_s5, %s749_s6  }
  0x21   : > { %s702_s11 = scalar_lea.hbm %s882_s3, 2816 }
  0x22   : > { %p703_p6 = scmp.ne.s32.totalorder %s882_s3, %s702_s11  ;;  %p709_p8 = scmp.lt.u32.totalorder %s702_s11, %s882_s3 }
  0x24   : > { %p705_p2 = pnand %p703_p6, %p676_p7 }
  0x26   : > { %p706_p3 = pneg %p705_p2 }
  0x28   : > { %p711_p9 = pnand %p709_p8, %p706_p3 }
  0x2a   : > { %714 = shalt.err (!%p711_p9)
}
  0x2b   : > { %s715_s18 = scalar_lea.vmem %s801_s21, 2816  ;;  %p723_p13 = scmp.lt.s32.totalorder %s801_s21, %s801_s21 }
  0x2c   : > { %p716_p10 = scmp.ne.s32.totalorder %s801_s21, %s715_s18  ;;  %p724_p0 = scmp.lt.s32.totalorder %s715_s18, %s715_s18 }
  0x2e   : > { %p718_p11 = pnand %p716_p10, %p676_p7  ;;  %p725_p1 = por %p724_p0, %p723_p13 }
  0x30   : > { %p719_p12 = pneg %p718_p11 }
  0x32   : > { %p726_p4 = pnand %p725_p1, %p719_p12 }
  0x34   : > { %729 = shalt.err (!%p726_p4)
}
  0x35   : > { %638 = dma.hbm_to_vmem [thread:$0]  (!%p797_p5), %s882_s3, 2816, %s801_s21, [#allocation5], %s748_s5, %s748_s5, %s749_s6  }
  0x36   : > { %p888_p6 = scmp.ne.s32.totalorder %s886_s19, 0 }
  0x37   : > { %p889_p2 = scmp.eq.s32.totalorder (!%p888_p6), %s784_s16, 0 }
  0x38   : > { %196 = sbr.rel (%p888_p6) target bundleno = 805 (0x325), region = 36 }
  0x3f   : > { %735 = dma.done.wait (%p889_p2), [#allocation3], 1792   ;;  %p890_p7 = pmov %p889_p2 }
  0x40   : > { %p891_p3 = pmov %p889_p2 }
  0x41   : > { %737 = vsyncadd (%p890_p7), [#allocation3], 4294965504 }
  0x42   : > { %739 = dma.done.wait (%p891_p3), [#allocation5], 2816   ;;  %p892_p8 = pmov %p889_p2 }
  0x43   : > { %p228_p9 = scmp.lt.s32.totalorder %s784_s16, 1  ;;  %v750_v0 = vmov 0.0   ;;  %v245_v1 = vld [vmem:[#allocation2 + $0x8] sm:$0xff]  ;;  %v247_v2 = vld [vmem:[#allocation2 + $0x18] sm:$0xff]  ;;  %v244_v3 = vld [vmem:[#allocation2] sm:$0xff]  ;;  %vm258_vm0 = vcmask 457728  }
  0x44   : > { %741 = vsyncadd (%p892_p8), [#allocation5], 4294964480  ;;  %326 = vmatprep.mubr.f32.mxu0 %v750_v0  ;;  %452 = vmatprep.mubr.f32.mxu1 %v750_v0  ;;  %v592_v4 = vpack.c.bf16 %v247_v2, %v245_v1  ;;  %v246_v5 = vld [vmem:[#allocation2 + $0x10] sm:$0xff]  ;;  %v249_v6 = vld [vmem:[#allocation2 + $0x28] sm:$0xff]  ;;  %vm381_vm1 = vcmask 1043456   ;;  %s751_s27 = smov 44  }
  0x45   : > { %s894_s16 = smov (!%p228_p9, %s784_s16), 1  ;;  %v251_v7 = vld [vmem:[#allocation2 + $0x38] sm:$0xff]  ;;  %v594_v8 = vpack.c.bf16 %v246_v5, %v244_v3  ;;  %v248_v10 = vld [vmem:[#allocation2 + $0x20] sm:$0xff]  ;;  %v250_v11 = vld [vmem:[#allocation2 + $0x30] sm:$0xff]  ;;  %vm351_vm2 = vcmask 359424   ;;  %vm377_vm3 = vcmask 687104  }
  0x46   : > { %s862_s19 = sshll.u32 %s894_s16, 3  ;;  %v596_v9 = vpack.c.bf16 %v251_v7, %v249_v6  ;;  %v253_v12 = vld [vmem:[#allocation2 + $0x48] sm:$0xff]  ;;  %593 = vmatprep.subr.bf16.mxu0 %v592_v4  ;;  %v255_v13 = vld [vmem:[#allocation2 + $0x58] sm:$0xff]  ;;  %v598_v14 = vpack.c.bf16 %v250_v11, %v248_v10  ;;  %v252_v16 = vld [vmem:[#allocation2 + $0x40] sm:$0xff]  ;;  %s752_s28 = smov 16   ;;  %vm477_vm4 = vcmask 130048  }
  0x47   : > { %s231_s24 = scalar_lea.vmem %s879_s0, %s862_s19  ;;  %s235_s26 = scalar_lea.vmem %s880_s1, %s862_s19  ;;  %595 = vmatpush1.bf16.msra.mxu0 %v594_v8  ;;  %v600_v15 = vpack.c.bf16 %v255_v13, %v253_v12  ;;  %v254_v17 = vld [vmem:[#allocation2 + $0x50] sm:$0xff]  ;;  %v257_v22 = vld [vmem:[#allocation2 + $0x68] sm:$0xff]  ;;  %v256_v23 = vld [vmem:[#allocation2 + $0x60] sm:$0xff]  ;;  %vm481_vm5 = vcmask 916480  }
  0x48   : > { %597 = vmatprep.subr.bf16.mxu0 %v596_v9  ;;  %v240_v18 = vld [vmem:[%s231_s24] sm:$0xff]  ;;  %v602_v20 = vpack.c.bf16 %v254_v17, %v252_v16  ;;  %v356_v25 = vld [vmem:[#allocation4 + $0x8] sm:$0xff]  ;;  %v358_v26 = vld [vmem:[#allocation4 + $0x18] sm:$0xff]  ;;  %s239_s5 = scalar_lea.vmem %s883_s4, %s862_s19 }
  0x49   : > { %v241_v19 = vld [vmem:[%s235_s26] sm:$0xff]  ;;  %v355_v27 = vld [vmem:[#allocation4] sm:$0xff]  ;;  %v604_v28 = vpack.c.bf16 %v358_v26, %v356_v25  ;;  %v360_v30 = vld [vmem:[#allocation4 + $0x28] sm:$0xff] }
  0x4a   : > { %v242_v21 = vadd.f32 %v241_v19, %v240_v18  ;;  %v357_v29 = vld [vmem:[#allocation4 + $0x10] sm:$0xff]  ;;  %v362_v31 = vld [vmem:[#allocation4 + $0x38] sm:$0xff]  ;;  %v359_v34 = vld [vmem:[#allocation4 + $0x20] sm:$0xff] }
  0x4b   : > { %599 = vmatpush1.bf16.msra.mxu0 %v598_v14  ;;  %v606_v32 = vpack.c.bf16 %v357_v29, %v355_v27  ;;  %v608_v33 = vpack.c.bf16 %v362_v31, %v360_v30  ;;  %v361_v35 = vld [vmem:[#allocation4 + $0x30] sm:$0xff]  ;;  %v364_v36 = vld [vmem:[#allocation4 + $0x48] sm:$0xff]  ;;  %605 = vmatprep.subr.bf16.mxu1 %v604_v28  ;;  %v366_v37 = vld [vmem:[#allocation4 + $0x58] sm:$0xff] }
  0x4c   : > { %601 = vmatprep.subr.bf16.mxu0 %v600_v15  ;;  %v243_v24 = vmax.f32 %v242_v21, 0.0  ;;  %v610_v38 = vpack.c.bf16 %v361_v35, %v359_v34  ;;  %v612_v39 = vpack.c.bf16 %v366_v37, %v364_v36  ;;  %v363_v40 = vld [vmem:[#allocation4 + $0x40] sm:$0xff]  ;;  %v365_v41 = vld [vmem:[#allocation4 + $0x50] sm:$0xff]  ;;  %v368_v42 = vld [vmem:[#allocation4 + $0x68] sm:$0xff] }
  0x4d   : > { %607 = vmatpush1.bf16.msra.mxu1 %v606_v32  ;;  %v370_v43 = vld [vmem:[#allocation4 + $0x78] sm:$0xff]  ;;  %v614_v44 = vpack.c.bf16 %v365_v41, %v363_v40  ;;  %v367_v46 = vld [vmem:[#allocation4 + $0x60] sm:$0xff]  ;;  %v369_v47 = vld [vmem:[#allocation4 + $0x70] sm:$0xff] }
  0x4e   : > { %609 = vmatprep.subr.bf16.mxu1 %v608_v33  ;;  %v616_v45 = vpack.c.bf16 %v370_v43, %v368_v42  ;;  %v618_v48 = vpack.c.bf16 %v369_v47, %v367_v46  ;;  %v372_v53 = vld [vmem:[#allocation4 + $0x88] sm:$0xff]  ;;  %v374_v54 = vld [vmem:[#allocation4 + $0x98] sm:$0xff]  ;;  %v371_v57 = vld [vmem:[#allocation4 + $0x80] sm:$0xff] }
  0x4f   : > { %603 = vmatpush1.bf16.msra.mxu0 %v602_v20  ;;  %v620_v56 = vpack.c.bf16 %v374_v54, %v372_v53  ;;  %v373_v58 = vld [vmem:[#allocation4 + $0x90] sm:$0xff]  ;;  %v376_v63 = vld [vmem:[#allocation4 + $0xa8] sm:$0xf]  ;;  %v375_v0 = vld [vmem:[#allocation4 + $0xa0] sm:$0xf] }
  0x50   : > { %274 = vmatprep.subr.mxu0 %v257_v22  ;;  %v622_v61 = vpack.c.bf16 %v373_v58, %v371_v57 }
  0x51   : > { %611 = vmatpush1.bf16.msra.mxu1 %v610_v38 }
  0x52   : > { %613 = vmatprep.subr.bf16.mxu1 %v612_v39 }
  0x53   : > { %275 = vmatpush1.msra.mxu0 %v256_v23 }
  0x54   : > { %582 = vmatmul.mubr.msk.f32.vlgmr.msra.gmra.mrb[0].mxu0 %vm258_vm0, %v243_v24 }
  0x55   : > { %615 = vmatpush1.bf16.msra.mxu1 %v614_v44 }
  0x56   : > { %617 = vmatprep.subr.bf16.mxu1 %v616_v45 }
  0x59   : > { %619 = vmatpush1.bf16.msra.mxu1 %v618_v48 }
  0x5a   : > { %621 = vmatprep.subr.bf16.mxu1 %v620_v56 }
  0x5d   : > { %623 = vmatpush1.bf16.msra.mxu1 %v622_v61 }
  0x5e   : > { %585 = vmatprep.subr.msk.mxu1 %vm381_vm1, %v376_v63 }
  0x61   : > { %586 = vmatpush1.msk.msra.mxu1 %vm381_vm1, %v375_v0 }
 0x127   : > { %v328_v49 = vpop.f32.mrb[0].mxu0 }
 0x128   : > { %v583_v50 = vmul.f32 -1.442695, %v328_v49  ;;  %v330_v51 = vpop.f32.mrb[1].mxu0 }
 0x129   : > { %v584_v52 = vmul.f32 -1.442695, %v330_v51 }
 0x12a   : > { %658 = vpow2.f32 %v583_v50 }
 0x12b   : > { %660 = vpow2.f32 %v584_v52 }
 0x134   : > { %v659_v55 = vpop.eup %658 }
 0x135   : > { %v661_v59 = vpop.eup %660  ;;  %v339_v60 = vadd.f32 1.0, %v659_v55 }
 0x136   : > { %v340_v62 = vadd.f32 1.0, %v661_v59 }
 0x137   : > { %662 = vrcp.f32 %v339_v60 }
 0x138   : > { %664 = vrcp.f32 %v340_v62 }
 0x141   : > { %v663_v1 = vpop.eup %662 }
 0x142   : > { %347 = vrot.lane.b32.xlu0 %v663_v1, %s751_s27  ;;  %v665_v2 = vpop.eup %664 }
 0x146   : > { %349 = vrot.lane.b32.xlu0 %v665_v2, %s751_s27 }
 0x1b4   : > { %v348_v3 = vpop.permute.xlu0 %347 }
 0x1b8   : > { %v350_v4 = vpop.permute.xlu0 %349 }
 0x1b9   : > { %v352_v5 = vsel %vm351_vm2, %v348_v3, %v350_v4 }
 0x1ba   : > { %v354_v6 = vmul.f32 %v352_v5, %v328_v49 }
 0x1bc   : > { %587 = vmatmul.mubr.msk.f32.vlgmr.msra.gmra.mrb[0].mxu1 %vm377_vm3, %v354_v6 }
 0x28f   : > { %v454_v7 = vpop.f32.mrb[0].mxu1 }
 0x290   : > { %v588_v8 = vmul.f32 -1.442695, %v454_v7  ;;  %v456_v9 = vpop.f32.mrb[1].mxu1 }
 0x291   : > { %v589_v10 = vmul.f32 -1.442695, %v456_v9 }
 0x292   : > { %666 = vpow2.f32 %v588_v8 }
 0x293   : > { %668 = vpow2.f32 %v589_v10 }
 0x29c   : > { %v667_v11 = vpop.eup %666 }
 0x29d   : > { %v669_v12 = vpop.eup %668  ;;  %v465_v13 = vadd.f32 1.0, %v667_v11 }
 0x29e   : > { %v466_v14 = vadd.f32 1.0, %v669_v12 }
 0x29f   : > { %670 = vrcp.f32 %v465_v13 }
 0x2a0   : > { %672 = vrcp.f32 %v466_v14 }
 0x2a9   : > { %v671_v15 = vpop.eup %670 }
 0x2aa   : > { %473 = vrot.lane.b32.xlu1 %v671_v15, %s752_s28  ;;  %v673_v16 = vpop.eup %672 }
 0x2ae   : > { %475 = vrot.lane.b32.xlu1 %v673_v16, %s752_s28 }
 0x31c   : > { %v474_v17 = vpop.permute.xlu1 %473 }
 0x320   : > { %v476_v18 = vpop.permute.xlu1 %475 }
 0x321   : > { %v478_v19 = vsel %vm477_vm4, %v474_v17, %v476_v18 }
 0x322   : > { %v480_v20 = vmul.f32 %v478_v19, %v454_v7 }
 0x324   : > { %482 = vst.msk [vmem:[%s239_s5] sm:$0xff] %vm481_vm5, %v480_v20 }
 0x325 PF: > { %s16_s15 = sadd.s32 1, %s744_s15  }
 0x326   : > { %p13_p5 = scmp.ge.s32.totalorder %s16_s15, 4  }
 0x328   :  { %15 = sbr.rel (!%p13_p5) target bundleno = 2 (0x2), region = 78 }
 0x32f   :  { %502 = vsyncpa [#allocation3], 1 }
 0x330   :  { %504 = vsyncpa [#allocation3 + $0x1], 1 }
 0x331   :  { %505 = vsyncpa [#allocation5], 1 }

// kernel: armband_forward.5
= control target key start
LH: loop header
LB: loop body
LE: loop exit
PB: predicated region body
PF: predicated region fallthrough
CT: control target
= control target key end

     0   :  { %12 = vsyncpa [#allocation6], 0  ;;  %s4987_s24 = smov 0   ;;  %s4989_s25 = smov 0   ;;  %s6228_s0 = inlined_call_operand.vmem [shape: f32[2,896], index: 0, kind: input, shape index: {}]   ;;  %s6229_s1 = inlined_call_operand.vmem [shape: bf16[896,500], index: 1, kind: input, shape index: {}]   ;;  %s6230_s2 = inlined_call_operand.vmem [shape: f32[1,500], index: 2, kind: input, shape index: {}]   ;;  %s6231_s3 = inlined_call_operand.vmem [shape: bf16[500,2048], index: 3, kind: input, shape index: {}]   ;;  %s6232_s4 = inlined_call_operand.vmem [shape: f32[1,2048], index: 4, kind: input, shape index: {}]   ;;  %s6233_s5 = inlined_call_operand.vmem [shape: bf16[2048,7], index: 5, kind: input, shape index: {}]   ;;  %s6234_s6 = inlined_call_operand.vmem [shape: f32[1,7], index: 6, kind: input, shape index: {}]   ;;  %s6235_s7 = inlined_call_operand.hbm [shape: f32[2,7], index: 7, kind: output, shape index: {}]  }
   0x1   :  { %s4991_s26 = smov 0  }
   0x2 LB: > { %s5003_s27 = sadd.s32 4294967295, %s4940_s26   ;;  %s5006_s28 = sadd.s32 1, %s4940_s26   ;;  %s4940_s26 = sphi %s4991_s26, %s6238_s26   ;;  %s4936_s25 = sphi %s4989_s25, %s6237_s25   ;;  %s4932_s24 = sphi %s4987_s24, %s6236_s24  }
   0x3   : > { %s85_s29 = ssub.s32 %s4940_s26, %s5006_s28  ;;  %s88_s30 = sadd.s32 1, %s4936_s25 }
   0x4   : > { %p86_p0 = scmp.eq.s32.totalorder %s85_s29, 0  ;;  %p95_p1 = scmp.ne.s32.totalorder %s4936_s25, %s4932_s24 }
   0x5   : > { %p96_p2 = scmp.eq.s32.totalorder %s4940_s26, 0  ;;  %p3799_p4 = scmp.ge.s32.totalorder %s4940_s26, 4 }
   0x6   : > { %s5015_s8 = scalar_select %p86_p0, %s4936_s25, %s88_s30  }
   0x7   : > { %p97_p3 = por %p96_p2, %p95_p1  ;;  %227 = sbr.rel (%p3799_p4) target bundleno = 81 (0x51), region = 32 }
   0xe   : > { %230 = sbr.rel (!%p97_p3) target bundleno = 81 (0x51), region = 36  ;;  %s232_s9 = sand.u32 (%p97_p3), 1, %s4936_s25  }
   0xf   : > { %s4201_s10 = sshll.u32 (%p97_p3), %s4940_s26, 4  ;;  %s4286_s11 = smul.u32 (%p97_p3), 1008, %s232_s9 }
  0x10   : > { %s5023_s14 = scalar_lea.vmem (%p97_p3), %s6231_s3, %s4201_s10 }
  0x11   : > { %v250_v0 = vld [vmem:[%s5023_s14] sm:$0xff] (%p97_p3)  ;;  %v252_v1 = vld [vmem:[%s5023_s14 + $0x8] sm:$0xff] (%p97_p3)  ;;  %s5031_s15 = scalar_lea.vmem (%p97_p3), [#allocation4], %s4286_s11 }
  0x12   : > { %v254_v2 = vld [vmem:[%s5023_s14 + $0x40] sm:$0xff] (%p97_p3)  ;;  %v256_v3 = vld [vmem:[%s5023_s14 + $0x48] sm:$0xff] (%p97_p3)  ;;  %251 = vst [vmem:[%s5031_s15] sm:$0xff] (%p97_p3), %v250_v0  ;;  %253 = vst [vmem:[%s5031_s15 + $0x8] sm:$0xff] (%p97_p3), %v252_v1 }
  0x13   : > { %v258_v4 = vld [vmem:[%s5023_s14 + $0x80] sm:$0xff] (%p97_p3)  ;;  %v260_v5 = vld [vmem:[%s5023_s14 + $0x88] sm:$0xff] (%p97_p3)  ;;  %255 = vst [vmem:[%s5031_s15 + $0x10] sm:$0xff] (%p97_p3), %v254_v2  ;;  %257 = vst [vmem:[%s5031_s15 + $0x18] sm:$0xff] (%p97_p3), %v256_v3 }
  0x14   : > { %259 = vst [vmem:[%s5031_s15 + $0x20] sm:$0xff] (%p97_p3), %v258_v4  ;;  %261 = vst [vmem:[%s5031_s15 + $0x28] sm:$0xff] (%p97_p3), %v260_v5  ;;  %v262_v6 = vld [vmem:[%s5023_s14 + $0xc0] sm:$0xff] (%p97_p3)  ;;  %v264_v7 = vld [vmem:[%s5023_s14 + $0xc8] sm:$0xff] (%p97_p3) }
  0x15   : > { %v266_v8 = vld [vmem:[%s5023_s14 + $0x100] sm:$0xff]  ;;  %263 = vst [vmem:[%s5031_s15 + $0x30] sm:$0xff] %v262_v6  ;;  %265 = vst [vmem:[%s5031_s15 + $0x38] sm:$0xff] %v264_v7  ;;  %v268_v9 = vld [vmem:[%s5023_s14 + $0x108] sm:$0xff] }
  0x16   : > { %267 = vst [vmem:[%s5031_s15 + $0x40] sm:$0xff] %v266_v8  ;;  %v270_v10 = vld [vmem:[%s5023_s14 + $0x140] sm:$0xff]  ;;  %v272_v11 = vld [vmem:[%s5023_s14 + $0x148] sm:$0xff]  ;;  %269 = vst [vmem:[%s5031_s15 + $0x48] sm:$0xff] %v268_v9 }
  0x17   : > { %271 = vst [vmem:[%s5031_s15 + $0x50] sm:$0xff] %v270_v10  ;;  %273 = vst [vmem:[%s5031_s15 + $0x58] sm:$0xff] %v272_v11  ;;  %v274_v12 = vld [vmem:[%s5023_s14 + $0x180] sm:$0xff]  ;;  %v276_v13 = vld [vmem:[%s5023_s14 + $0x188] sm:$0xff] }
  0x18   : > { %v278_v14 = vld [vmem:[%s5023_s14 + $0x1c0] sm:$0xff]  ;;  %275 = vst [vmem:[%s5031_s15 + $0x60] sm:$0xff] %v274_v12  ;;  %277 = vst [vmem:[%s5031_s15 + $0x68] sm:$0xff] %v276_v13  ;;  %v280_v15 = vld [vmem:[%s5023_s14 + $0x1c8] sm:$0xff] }
  0x19   : > { %279 = vst [vmem:[%s5031_s15 + $0x70] sm:$0xff] %v278_v14  ;;  %v282_v16 = vld [vmem:[%s5023_s14 + $0x200] sm:$0xff]  ;;  %v284_v17 = vld [vmem:[%s5023_s14 + $0x208] sm:$0xff]  ;;  %281 = vst [vmem:[%s5031_s15 + $0x78] sm:$0xff] %v280_v15 }
  0x1a   : > { %283 = vst [vmem:[%s5031_s15 + $0x80] sm:$0xff] %v282_v16  ;;  %285 = vst [vmem:[%s5031_s15 + $0x88] sm:$0xff] %v284_v17  ;;  %v286_v18 = vld [vmem:[%s5023_s14 + $0x240] sm:$0xff]  ;;  %v288_v19 = vld [vmem:[%s5023_s14 + $0x248] sm:$0xff] }
  0x1b   : > { %v290_v20 = vld [vmem:[%s5023_s14 + $0x280] sm:$0xff]  ;;  %287 = vst [vmem:[%s5031_s15 + $0x90] sm:$0xff] %v286_v18  ;;  %289 = vst [vmem:[%s5031_s15 + $0x98] sm:$0xff] %v288_v19  ;;  %v292_v21 = vld [vmem:[%s5023_s14 + $0x288] sm:$0xff] }
  0x1c   : > { %291 = vst [vmem:[%s5031_s15 + $0xa0] sm:$0xff] %v290_v20  ;;  %v294_v22 = vld [vmem:[%s5023_s14 + $0x2c0] sm:$0xff]  ;;  %v296_v23 = vld [vmem:[%s5023_s14 + $0x2c8] sm:$0xff]  ;;  %293 = vst [vmem:[%s5031_s15 + $0xa8] sm:$0xff] %v292_v21 }
  0x1d   : > { %295 = vst [vmem:[%s5031_s15 + $0xb0] sm:$0xff] %v294_v22  ;;  %297 = vst [vmem:[%s5031_s15 + $0xb8] sm:$0xff] %v296_v23  ;;  %v298_v24 = vld [vmem:[%s5023_s14 + $0x300] sm:$0xff]  ;;  %v300_v25 = vld [vmem:[%s5023_s14 + $0x308] sm:$0xff] }
  0x1e   : > { %v302_v26 = vld [vmem:[%s5023_s14 + $0x340] sm:$0xff]  ;;  %299 = vst [vmem:[%s5031_s15 + $0xc0] sm:$0xff] %v298_v24  ;;  %301 = vst [vmem:[%s5031_s15 + $0xc8] sm:$0xff] %v300_v25  ;;  %v304_v27 = vld [vmem:[%s5023_s14 + $0x348] sm:$0xff] }
  0x1f   : > { %303 = vst [vmem:[%s5031_s15 + $0xd0] sm:$0xff] %v302_v26  ;;  %v306_v28 = vld [vmem:[%s5023_s14 + $0x380] sm:$0xff]  ;;  %v308_v29 = vld [vmem:[%s5023_s14 + $0x388] sm:$0xff]  ;;  %305 = vst [vmem:[%s5031_s15 + $0xd8] sm:$0xff] %v304_v27 }
  0x20   : > { %307 = vst [vmem:[%s5031_s15 + $0xe0] sm:$0xff] %v306_v28  ;;  %309 = vst [vmem:[%s5031_s15 + $0xe8] sm:$0xff] %v308_v29  ;;  %v310_v30 = vld [vmem:[%s5023_s14 + $0x3c0] sm:$0xff]  ;;  %v312_v31 = vld [vmem:[%s5023_s14 + $0x3c8] sm:$0xff] }
  0x21   : > { %v314_v32 = vld [vmem:[%s5023_s14 + $0x400] sm:$0xff]  ;;  %311 = vst [vmem:[%s5031_s15 + $0xf0] sm:$0xff] %v310_v30  ;;  %313 = vst [vmem:[%s5031_s15 + $0xf8] sm:$0xff] %v312_v31  ;;  %v316_v33 = vld [vmem:[%s5023_s14 + $0x408] sm:$0xff] }
  0x22   : > { %315 = vst [vmem:[%s5031_s15 + $0x100] sm:$0xff] %v314_v32  ;;  %v318_v34 = vld [vmem:[%s5023_s14 + $0x440] sm:$0xff]  ;;  %v320_v35 = vld [vmem:[%s5023_s14 + $0x448] sm:$0xff]  ;;  %317 = vst [vmem:[%s5031_s15 + $0x108] sm:$0xff] %v316_v33 }
  0x23   : > { %319 = vst [vmem:[%s5031_s15 + $0x110] sm:$0xff] %v318_v34  ;;  %321 = vst [vmem:[%s5031_s15 + $0x118] sm:$0xff] %v320_v35  ;;  %v322_v36 = vld [vmem:[%s5023_s14 + $0x480] sm:$0xff]  ;;  %v324_v37 = vld [vmem:[%s5023_s14 + $0x488] sm:$0xff] }
  0x24   : > { %v326_v38 = vld [vmem:[%s5023_s14 + $0x4c0] sm:$0xff]  ;;  %323 = vst [vmem:[%s5031_s15 + $0x120] sm:$0xff] %v322_v36  ;;  %325 = vst [vmem:[%s5031_s15 + $0x128] sm:$0xff] %v324_v37  ;;  %v328_v39 = vld [vmem:[%s5023_s14 + $0x4c8] sm:$0xff] }
  0x25   : > { %327 = vst [vmem:[%s5031_s15 + $0x130] sm:$0xff] %v326_v38  ;;  %v330_v40 = vld [vmem:[%s5023_s14 + $0x500] sm:$0xff]  ;;  %v332_v41 = vld [vmem:[%s5023_s14 + $0x508] sm:$0xff]  ;;  %329 = vst [vmem:[%s5031_s15 + $0x138] sm:$0xff] %v328_v39 }
  0x26   : > { %331 = vst [vmem:[%s5031_s15 + $0x140] sm:$0xff] %v330_v40  ;;  %333 = vst [vmem:[%s5031_s15 + $0x148] sm:$0xff] %v332_v41  ;;  %v334_v42 = vld [vmem:[%s5023_s14 + $0x540] sm:$0xff]  ;;  %v336_v43 = vld [vmem:[%s5023_s14 + $0x548] sm:$0xff] }
  0x27   : > { %v338_v44 = vld [vmem:[%s5023_s14 + $0x580] sm:$0xff]  ;;  %335 = vst [vmem:[%s5031_s15 + $0x150] sm:$0xff] %v334_v42  ;;  %337 = vst [vmem:[%s5031_s15 + $0x158] sm:$0xff] %v336_v43  ;;  %v340_v45 = vld [vmem:[%s5023_s14 + $0x588] sm:$0xff] }
  0x28   : > { %339 = vst [vmem:[%s5031_s15 + $0x160] sm:$0xff] %v338_v44  ;;  %v342_v46 = vld [vmem:[%s5023_s14 + $0x5c0] sm:$0xff]  ;;  %v344_v47 = vld [vmem:[%s5023_s14 + $0x5c8] sm:$0xff]  ;;  %341 = vst [vmem:[%s5031_s15 + $0x168] sm:$0xff] %v340_v45 }
  0x29   : > { %343 = vst [vmem:[%s5031_s15 + $0x170] sm:$0xff] %v342_v46  ;;  %345 = vst [vmem:[%s5031_s15 + $0x178] sm:$0xff] %v344_v47  ;;  %v346_v48 = vld [vmem:[%s5023_s14 + $0x600] sm:$0xff]  ;;  %v348_v49 = vld [vmem:[%s5023_s14 + $0x608] sm:$0xff] }
  0x2a   : > { %v350_v50 = vld [vmem:[%s5023_s14 + $0x640] sm:$0xff]  ;;  %347 = vst [vmem:[%s5031_s15 + $0x180] sm:$0xff] %v346_v48  ;;  %349 = vst [vmem:[%s5031_s15 + $0x188] sm:$0xff] %v348_v49  ;;  %v352_v51 = vld [vmem:[%s5023_s14 + $0x648] sm:$0xff] }
  0x2b   : > { %351 = vst [vmem:[%s5031_s15 + $0x190] sm:$0xff] %v350_v50  ;;  %v354_v52 = vld [vmem:[%s5023_s14 + $0x680] sm:$0xff]  ;;  %v356_v53 = vld [vmem:[%s5023_s14 + $0x688] sm:$0xff]  ;;  %353 = vst [vmem:[%s5031_s15 + $0x198] sm:$0xff] %v352_v51 }
  0x2c   : > { %355 = vst [vmem:[%s5031_s15 + $0x1a0] sm:$0xff] %v354_v52  ;;  %357 = vst [vmem:[%s5031_s15 + $0x1a8] sm:$0xff] %v356_v53  ;;  %v358_v54 = vld [vmem:[%s5023_s14 + $0x6c0] sm:$0xff]  ;;  %v360_v55 = vld [vmem:[%s5023_s14 + $0x6c8] sm:$0xff] }
  0x2d   : > { %v362_v56 = vld [vmem:[%s5023_s14 + $0x700] sm:$0xff]  ;;  %359 = vst [vmem:[%s5031_s15 + $0x1b0] sm:$0xff] %v358_v54  ;;  %361 = vst [vmem:[%s5031_s15 + $0x1b8] sm:$0xff] %v360_v55  ;;  %v364_v57 = vld [vmem:[%s5023_s14 + $0x708] sm:$0xff] }
  0x2e   : > { %363 = vst [vmem:[%s5031_s15 + $0x1c0] sm:$0xff] %v362_v56  ;;  %v366_v58 = vld [vmem:[%s5023_s14 + $0x740] sm:$0xff]  ;;  %v368_v59 = vld [vmem:[%s5023_s14 + $0x748] sm:$0xff]  ;;  %365 = vst [vmem:[%s5031_s15 + $0x1c8] sm:$0xff] %v364_v57 }
  0x2f   : > { %367 = vst [vmem:[%s5031_s15 + $0x1d0] sm:$0xff] %v366_v58  ;;  %369 = vst [vmem:[%s5031_s15 + $0x1d8] sm:$0xff] %v368_v59  ;;  %v370_v60 = vld [vmem:[%s5023_s14 + $0x780] sm:$0xff]  ;;  %v372_v61 = vld [vmem:[%s5023_s14 + $0x788] sm:$0xff] }
  0x30   : > { %v374_v62 = vld [vmem:[%s5023_s14 + $0x7c0] sm:$0xff]  ;;  %371 = vst [vmem:[%s5031_s15 + $0x1e0] sm:$0xff] %v370_v60  ;;  %373 = vst [vmem:[%s5031_s15 + $0x1e8] sm:$0xff] %v372_v61  ;;  %v376_v63 = vld [vmem:[%s5023_s14 + $0x7c8] sm:$0xff] }
  0x31   : > { %375 = vst [vmem:[%s5031_s15 + $0x1f0] sm:$0xff] %v374_v62  ;;  %v378_v0 = vld [vmem:[%s5023_s14 + $0x800] sm:$0xff]  ;;  %v380_v1 = vld [vmem:[%s5023_s14 + $0x808] sm:$0xff]  ;;  %377 = vst [vmem:[%s5031_s15 + $0x1f8] sm:$0xff] %v376_v63 }
  0x32   : > { %379 = vst [vmem:[%s5031_s15 + $0x200] sm:$0xff] %v378_v0  ;;  %381 = vst [vmem:[%s5031_s15 + $0x208] sm:$0xff] %v380_v1  ;;  %v382_v2 = vld [vmem:[%s5023_s14 + $0x840] sm:$0xff]  ;;  %v384_v3 = vld [vmem:[%s5023_s14 + $0x848] sm:$0xff] }
  0x33   : > { %v386_v4 = vld [vmem:[%s5023_s14 + $0x880] sm:$0xff]  ;;  %383 = vst [vmem:[%s5031_s15 + $0x210] sm:$0xff] %v382_v2  ;;  %385 = vst [vmem:[%s5031_s15 + $0x218] sm:$0xff] %v384_v3  ;;  %v388_v5 = vld [vmem:[%s5023_s14 + $0x888] sm:$0xff] }
  0x34   : > { %387 = vst [vmem:[%s5031_s15 + $0x220] sm:$0xff] %v386_v4  ;;  %v390_v6 = vld [vmem:[%s5023_s14 + $0x8c0] sm:$0xff]  ;;  %v392_v7 = vld [vmem:[%s5023_s14 + $0x8c8] sm:$0xff]  ;;  %389 = vst [vmem:[%s5031_s15 + $0x228] sm:$0xff] %v388_v5 }
  0x35   : > { %391 = vst [vmem:[%s5031_s15 + $0x230] sm:$0xff] %v390_v6  ;;  %393 = vst [vmem:[%s5031_s15 + $0x238] sm:$0xff] %v392_v7  ;;  %v394_v8 = vld [vmem:[%s5023_s14 + $0x900] sm:$0xff]  ;;  %v396_v9 = vld [vmem:[%s5023_s14 + $0x908] sm:$0xff] }
  0x36   : > { %v398_v10 = vld [vmem:[%s5023_s14 + $0x940] sm:$0xff]  ;;  %395 = vst [vmem:[%s5031_s15 + $0x240] sm:$0xff] %v394_v8  ;;  %397 = vst [vmem:[%s5031_s15 + $0x248] sm:$0xff] %v396_v9  ;;  %v400_v11 = vld [vmem:[%s5023_s14 + $0x948] sm:$0xff] }
  0x37   : > { %399 = vst [vmem:[%s5031_s15 + $0x250] sm:$0xff] %v398_v10  ;;  %v402_v12 = vld [vmem:[%s5023_s14 + $0x980] sm:$0xff]  ;;  %v404_v13 = vld [vmem:[%s5023_s14 + $0x988] sm:$0xff]  ;;  %401 = vst [vmem:[%s5031_s15 + $0x258] sm:$0xff] %v400_v11 }
  0x38   : > { %403 = vst [vmem:[%s5031_s15 + $0x260] sm:$0xff] %v402_v12  ;;  %405 = vst [vmem:[%s5031_s15 + $0x268] sm:$0xff] %v404_v13  ;;  %v406_v14 = vld [vmem:[%s5023_s14 + $0x9c0] sm:$0xff]  ;;  %v408_v15 = vld [vmem:[%s5023_s14 + $0x9c8] sm:$0xff] }
  0x39   : > { %v410_v16 = vld [vmem:[%s5023_s14 + $0xa00] sm:$0xff]  ;;  %407 = vst [vmem:[%s5031_s15 + $0x270] sm:$0xff] %v406_v14  ;;  %409 = vst [vmem:[%s5031_s15 + $0x278] sm:$0xff] %v408_v15  ;;  %v412_v17 = vld [vmem:[%s5023_s14 + $0xa08] sm:$0xff] }
  0x3a   : > { %411 = vst [vmem:[%s5031_s15 + $0x280] sm:$0xff] %v410_v16  ;;  %v414_v18 = vld [vmem:[%s5023_s14 + $0xa40] sm:$0xff]  ;;  %v416_v19 = vld [vmem:[%s5023_s14 + $0xa48] sm:$0xff]  ;;  %413 = vst [vmem:[%s5031_s15 + $0x288] sm:$0xff] %v412_v17 }
  0x3b   : > { %415 = vst [vmem:[%s5031_s15 + $0x290] sm:$0xff] %v414_v18  ;;  %417 = vst [vmem:[%s5031_s15 + $0x298] sm:$0xff] %v416_v19  ;;  %v418_v20 = vld [vmem:[%s5023_s14 + $0xa80] sm:$0xff]  ;;  %v420_v21 = vld [vmem:[%s5023_s14 + $0xa88] sm:$0xff] }
  0x3c   : > { %v422_v22 = vld [vmem:[%s5023_s14 + $0xac0] sm:$0xff]  ;;  %419 = vst [vmem:[%s5031_s15 + $0x2a0] sm:$0xff] %v418_v20  ;;  %421 = vst [vmem:[%s5031_s15 + $0x2a8] sm:$0xff] %v420_v21  ;;  %v424_v23 = vld [vmem:[%s5023_s14 + $0xac8] sm:$0xff] }
  0x3d   : > { %423 = vst [vmem:[%s5031_s15 + $0x2b0] sm:$0xff] %v422_v22  ;;  %v426_v24 = vld [vmem:[%s5023_s14 + $0xb00] sm:$0xff]  ;;  %v428_v25 = vld [vmem:[%s5023_s14 + $0xb08] sm:$0xff]  ;;  %425 = vst [vmem:[%s5031_s15 + $0x2b8] sm:$0xff] %v424_v23 }
  0x3e   : > { %427 = vst [vmem:[%s5031_s15 + $0x2c0] sm:$0xff] %v426_v24  ;;  %429 = vst [vmem:[%s5031_s15 + $0x2c8] sm:$0xff] %v428_v25  ;;  %v430_v26 = vld [vmem:[%s5023_s14 + $0xb40] sm:$0xff]  ;;  %v432_v27 = vld [vmem:[%s5023_s14 + $0xb48] sm:$0xff] }
  0x3f   : > { %v434_v28 = vld [vmem:[%s5023_s14 + $0xb80] sm:$0xff]  ;;  %431 = vst [vmem:[%s5031_s15 + $0x2d0] sm:$0xff] %v430_v26  ;;  %433 = vst [vmem:[%s5031_s15 + $0x2d8] sm:$0xff] %v432_v27  ;;  %v436_v29 = vld [vmem:[%s5023_s14 + $0xb88] sm:$0xff] }
  0x40   : > { %435 = vst [vmem:[%s5031_s15 + $0x2e0] sm:$0xff] %v434_v28  ;;  %v438_v30 = vld [vmem:[%s5023_s14 + $0xbc0] sm:$0xff]  ;;  %v440_v31 = vld [vmem:[%s5023_s14 + $0xbc8] sm:$0xff]  ;;  %437 = vst [vmem:[%s5031_s15 + $0x2e8] sm:$0xff] %v436_v29 }
  0x41   : > { %439 = vst [vmem:[%s5031_s15 + $0x2f0] sm:$0xff] %v438_v30  ;;  %441 = vst [vmem:[%s5031_s15 + $0x2f8] sm:$0xff] %v440_v31  ;;  %v442_v32 = vld [vmem:[%s5023_s14 + $0xc00] sm:$0xff]  ;;  %v444_v33 = vld [vmem:[%s5023_s14 + $0xc08] sm:$0xff] }
  0x42   : > { %v446_v34 = vld [vmem:[%s5023_s14 + $0xc40] sm:$0xff]  ;;  %443 = vst [vmem:[%s5031_s15 + $0x300] sm:$0xff] %v442_v32  ;;  %445 = vst [vmem:[%s5031_s15 + $0x308] sm:$0xff] %v444_v33  ;;  %v448_v35 = vld [vmem:[%s5023_s14 + $0xc48] sm:$0xff] }
  0x43   : > { %447 = vst [vmem:[%s5031_s15 + $0x310] sm:$0xff] %v446_v34  ;;  %v450_v36 = vld [vmem:[%s5023_s14 + $0xc80] sm:$0xff]  ;;  %v452_v37 = vld [vmem:[%s5023_s14 + $0xc88] sm:$0xff]  ;;  %449 = vst [vmem:[%s5031_s15 + $0x318] sm:$0xff] %v448_v35 }
  0x44   : > { %451 = vst [vmem:[%s5031_s15 + $0x320] sm:$0xff] %v450_v36  ;;  %453 = vst [vmem:[%s5031_s15 + $0x328] sm:$0xff] %v452_v37  ;;  %v454_v38 = vld [vmem:[%s5023_s14 + $0xcc0] sm:$0xff]  ;;  %v456_v39 = vld [vmem:[%s5023_s14 + $0xcc8] sm:$0xff] }
  0x45   : > { %v458_v40 = vld [vmem:[%s5023_s14 + $0xd00] sm:$0xff]  ;;  %455 = vst [vmem:[%s5031_s15 + $0x330] sm:$0xff] %v454_v38  ;;  %457 = vst [vmem:[%s5031_s15 + $0x338] sm:$0xff] %v456_v39  ;;  %v460_v41 = vld [vmem:[%s5023_s14 + $0xd08] sm:$0xff] }
  0x46   : > { %459 = vst [vmem:[%s5031_s15 + $0x340] sm:$0xff] %v458_v40  ;;  %v462_v42 = vld [vmem:[%s5023_s14 + $0xd40] sm:$0xff]  ;;  %v464_v43 = vld [vmem:[%s5023_s14 + $0xd48] sm:$0xff]  ;;  %461 = vst [vmem:[%s5031_s15 + $0x348] sm:$0xff] %v460_v41 }
  0x47   : > { %463 = vst [vmem:[%s5031_s15 + $0x350] sm:$0xff] %v462_v42  ;;  %465 = vst [vmem:[%s5031_s15 + $0x358] sm:$0xff] %v464_v43  ;;  %v466_v44 = vld [vmem:[%s5023_s14 + $0xd80] sm:$0xff]  ;;  %v468_v45 = vld [vmem:[%s5023_s14 + $0xd88] sm:$0xff] }
  0x48   : > { %v470_v46 = vld [vmem:[%s5023_s14 + $0xdc0] sm:$0xff]  ;;  %467 = vst [vmem:[%s5031_s15 + $0x360] sm:$0xff] %v466_v44  ;;  %469 = vst [vmem:[%s5031_s15 + $0x368] sm:$0xff] %v468_v45  ;;  %v472_v47 = vld [vmem:[%s5023_s14 + $0xdc8] sm:$0xff] }
  0x49   : > { %471 = vst [vmem:[%s5031_s15 + $0x370] sm:$0xff] %v470_v46  ;;  %v474_v48 = vld [vmem:[%s5023_s14 + $0xe00] sm:$0xff]  ;;  %v476_v49 = vld [vmem:[%s5023_s14 + $0xe08] sm:$0xff]  ;;  %473 = vst [vmem:[%s5031_s15 + $0x378] sm:$0xff] %v472_v47 }
  0x4a   : > { %475 = vst [vmem:[%s5031_s15 + $0x380] sm:$0xff] %v474_v48  ;;  %477 = vst [vmem:[%s5031_s15 + $0x388] sm:$0xff] %v476_v49  ;;  %v478_v50 = vld [vmem:[%s5023_s14 + $0xe40] sm:$0xff]  ;;  %v480_v51 = vld [vmem:[%s5023_s14 + $0xe48] sm:$0xff] }
  0x4b   : > { %v482_v52 = vld [vmem:[%s5023_s14 + $0xe80] sm:$0xff]  ;;  %479 = vst [vmem:[%s5031_s15 + $0x390] sm:$0xff] %v478_v50  ;;  %481 = vst [vmem:[%s5031_s15 + $0x398] sm:$0xff] %v480_v51  ;;  %v484_v53 = vld [vmem:[%s5023_s14 + $0xe88] sm:$0xff] }
  0x4c   : > { %483 = vst [vmem:[%s5031_s15 + $0x3a0] sm:$0xff] %v482_v52  ;;  %v486_v54 = vld [vmem:[%s5023_s14 + $0xec0] sm:$0xff]  ;;  %v488_v55 = vld [vmem:[%s5023_s14 + $0xec8] sm:$0xff]  ;;  %485 = vst [vmem:[%s5031_s15 + $0x3a8] sm:$0xff] %v484_v53 }
  0x4d   : > { %487 = vst [vmem:[%s5031_s15 + $0x3b0] sm:$0xff] %v486_v54  ;;  %489 = vst [vmem:[%s5031_s15 + $0x3b8] sm:$0xff] %v488_v55  ;;  %v490_v56 = vld [vmem:[%s5023_s14 + $0xf00] sm:$0xff]  ;;  %v492_v57 = vld [vmem:[%s5023_s14 + $0xf08] sm:$0xff] }
  0x4e   : > { %v494_v58 = vld [vmem:[%s5023_s14 + $0xf40] sm:$0xff]  ;;  %491 = vst [vmem:[%s5031_s15 + $0x3c0] sm:$0xff] %v490_v56  ;;  %493 = vst [vmem:[%s5031_s15 + $0x3c8] sm:$0xff] %v492_v57  ;;  %v496_v59 = vld [vmem:[%s5023_s14 + $0xf48] sm:$0xff] }
  0x4f   : > { %495 = vst [vmem:[%s5031_s15 + $0x3d0] sm:$0xff] %v494_v58  ;;  %v498_v60 = vld [vmem:[%s5023_s14 + $0xf80] sm:$0xff]  ;;  %v500_v61 = vld [vmem:[%s5023_s14 + $0xf88] sm:$0xff]  ;;  %497 = vst [vmem:[%s5031_s15 + $0x3d8] sm:$0xff] %v496_v59 }
  0x50   : > { %499 = vst [vmem:[%s5031_s15 + $0x3e0] sm:$0xff] %v498_v60  ;;  %501 = vst [vmem:[%s5031_s15 + $0x3e8] sm:$0xff] %v500_v61 }
  0x51 PF: > { %p3802_p5 = scmp.ge.s32.totalorder %s4940_s26, 1  ;;  %p523_p6 = scmp.lt.s32.totalorder %s4940_s26, 5 }
  0x53   : > { %p524_p7 = pnand %p3802_p5, %p523_p6 }
  0x54   : > { %s530_s16 = sand.u32 (!%p524_p7), 1, %s4932_s24   ;;  %s3803_s17 = sshll.u32 (!%p524_p7), %s5003_s27, 2 }
  0x55   : > { %527 = sbr.rel (%p524_p7) target bundleno = 1464 (0x5b8), region = 67  ;;  %p567_p8 = scmp.lt.s32.totalorder (!%p524_p7), %s3803_s17, 15 }
  0x56   : > { %s4287_s18 = smul.u32 (!%p524_p7), 1008, %s530_s16  ;;  %s3804_s19 = sshll.u32 (!%p524_p7), %s5003_s27, 6 }
  0x57   : > { %p572_p9 = scmp.lt.s32.totalorder (!%p524_p7), %s3804_s19, 255  ;;  %p3806_p10 = scmp.ne.s32.totalorder (!%p524_p7), %s5003_s27, 0 }
  0x58   : > { %s5295_s24 = scalar_lea.vmem (!%p524_p7), [#allocation4], %s4287_s18 }
  0x5c   : > { %s6240_s17 = smov (!%p567_p8, %s3803_s17), 15  ;;  %s6242_s19 = smov (!%p572_p9, %s3804_s19), 255 }
  0x5d   : > { %s569_s22 = scalar_lea.vmem %s6232_s4, %s6240_s17  ;;  %s3805_s23 = sshll.u32 %s6242_s19, 2  ;;  %v4323_v62 = vld [vmem:[%s6229_s1 + $0x4] ss:$16 sps:$4 sm:$0xff] (!%p3806_p10)   ;;  %v4325_v63 = vld [vmem:[%s6229_s1 + $0xc] ss:$16 sps:$4 sm:$0xff] (!%p3806_p10)   ;;  %v590_v36 = vlaneseq (!%p3806_p10)  ;;  %vm2361_vm0 = vcmask (!%p3806_p10), 50176  }
  0x5e   : > { %s5293_s30 = scalar_lea.vmem %s6233_s5, %s3805_s23  ;;  %581 = sbr.rel (%p3806_p10) target bundleno = 542 (0x21e), region = 75  ;;  %1999 = vmatprep.subr.bf16.mxu0 (!%p3806_p10), %v4323_v62  ;;  %v4327_v0 = vld [vmem:[%s6229_s1] ss:$16 sps:$4 sm:$0xff] (!%p3806_p10)   ;;  %v4328_v1 = vld [vmem:[%s6229_s1 + $0x8] ss:$16 sps:$4 sm:$0xff] (!%p3806_p10)   ;;  %2163 = vmatprep.subr.bf16.mxu1 (!%p3806_p10), %v4325_v63  ;;  %vm2353_vm1 = vcmask (!%p3806_p10), 1041408  }
  0x5f   : > { %v4329_v2 = vld [vmem:[%s6229_s1 + $0x24] ss:$16 sps:$4 sm:$0xff] (!%p3806_p10)   ;;  %2000 = vmatpush1.bf16.msra.mxu0 (!%p3806_p10), %v4327_v0  ;;  %2164 = vmatpush1.bf16.msra.mxu1 (!%p3806_p10), %v4328_v1  ;;  %v4331_v3 = vld [vmem:[%s6229_s1 + $0x2c] ss:$16 sps:$4 sm:$0xff] (!%p3806_p10)   ;;  %v4333_v4 = vld [vmem:[%s6229_s1 + $0x20] ss:$16 sps:$4 sm:$0xff] (!%p3806_p10)  }
  0x60   : > { %2001 = vmatprep.subr.bf16.mxu0 (!%p3806_p10), %v4329_v2  ;;  %v4334_v5 = vld [vmem:[%s6229_s1 + $0x28] ss:$16 sps:$4 sm:$0xff] (!%p3806_p10)   ;;  %2165 = vmatprep.subr.bf16.mxu1 (!%p3806_p10), %v4331_v3  ;;  %v4335_v6 = vld [vmem:[%s6229_s1 + $0x44] ss:$16 sps:$4 sm:$0xff] (!%p3806_p10)   ;;  %v4337_v7 = vld [vmem:[%s6229_s1 + $0x4c] ss:$16 sps:$4 sm:$0xff] (!%p3806_p10)  }
  0x61   : > { %v4339_v8 = vld [vmem:[%s6229_s1 + $0x40] ss:$16 sps:$4 sm:$0xff] (!%p3806_p10)   ;;  %v4340_v9 = vld [vmem:[%s6229_s1 + $0x48] ss:$16 sps:$4 sm:$0xff] (!%p3806_p10)   ;;  %v4341_v10 = vld [vmem:[%s6229_s1 + $0x64] ss:$16 sps:$4 sm:$0xff] (!%p3806_p10)  }
  0x62   : > { %v4343_v11 = vld [vmem:[%s6229_s1 + $0x6c] ss:$16 sps:$4 sm:$0xff] (!%p3806_p10)   ;;  %v4345_v12 = vld [vmem:[%s6229_s1 + $0x60] ss:$16 sps:$4 sm:$0xff] (!%p3806_p10)   ;;  %v4346_v13 = vld [vmem:[%s6229_s1 + $0x68] ss:$16 sps:$4 sm:$0xff] (!%p3806_p10)  }
  0x63   : > { %2002 = vmatpush1.bf16.msra.mxu0 (!%p3806_p10), %v4333_v4  ;;  %2166 = vmatpush1.bf16.msra.mxu1 (!%p3806_p10), %v4334_v5  ;;  %v4347_v14 = vld [vmem:[%s6229_s1 + $0x84] ss:$16 sps:$4 sm:$0xff] (!%p3806_p10)   ;;  %v4349_v15 = vld [vmem:[%s6229_s1 + $0x8c] ss:$16 sps:$4 sm:$0xff] (!%p3806_p10)   ;;  %v4351_v16 = vld [vmem:[%s6229_s1 + $0x80] ss:$16 sps:$4 sm:$0xff] (!%p3806_p10)  }
  0x64   : > { %2003 = vmatprep.subr.bf16.mxu0 (!%p3806_p10), %v4335_v6  ;;  %2167 = vmatprep.subr.bf16.mxu1 (!%p3806_p10), %v4337_v7  ;;  %v4352_v17 = vld [vmem:[%s6229_s1 + $0x88] ss:$16 sps:$4 sm:$0xff] (!%p3806_p10)   ;;  %v4353_v18 = vld [vmem:[%s6229_s1 + $0xa4] ss:$16 sps:$4 sm:$0xff] (!%p3806_p10)   ;;  %v4355_v19 = vld [vmem:[%s6229_s1 + $0xac] ss:$16 sps:$4 sm:$0xff] (!%p3806_p10)  }
  0x65   : > { %v4357_v20 = vld [vmem:[%s6229_s1 + $0xa0] ss:$16 sps:$4 sm:$0xff]   ;;  %v4358_v21 = vld [vmem:[%s6229_s1 + $0xa8] ss:$16 sps:$4 sm:$0xff]   ;;  %v4359_v22 = vld [vmem:[%s6229_s1 + $0xc4] ss:$16 sps:$4 sm:$0xff]  }
  0x66   : > { %v4361_v23 = vld [vmem:[%s6229_s1 + $0xcc] ss:$16 sps:$4 sm:$0xff]   ;;  %v4363_v24 = vld [vmem:[%s6229_s1 + $0xc0] ss:$16 sps:$4 sm:$0xff]   ;;  %v4364_v25 = vld [vmem:[%s6229_s1 + $0xc8] ss:$16 sps:$4 sm:$0xff]  }
  0x67   : > { %2004 = vmatpush1.bf16.msra.mxu0 %v4339_v8  ;;  %2168 = vmatpush1.bf16.msra.mxu1 %v4340_v9  ;;  %v4365_v26 = vld [vmem:[%s6229_s1 + $0xe4] ss:$16 sps:$4 sm:$0xff]   ;;  %v4367_v27 = vld [vmem:[%s6229_s1 + $0xec] ss:$16 sps:$4 sm:$0xff]   ;;  %v4369_v28 = vld [vmem:[%s6229_s1 + $0xe0] ss:$16 sps:$4 sm:$0xff]  }
  0x68   : > { %2005 = vmatprep.subr.bf16.mxu0 %v4341_v10  ;;  %2169 = vmatprep.subr.bf16.mxu1 %v4343_v11  ;;  %v4370_v29 = vld [vmem:[%s6229_s1 + $0xe8] ss:$16 sps:$4 sm:$0xff]   ;;  %v4371_v30 = vld [vmem:[%s6229_s1 + $0x104] ss:$16 sps:$4 sm:$0xff]   ;;  %v4373_v31 = vld [vmem:[%s6229_s1 + $0x10c] ss:$16 sps:$4 sm:$0xff]  }
  0x69   : > { %v4375_v32 = vld [vmem:[%s6229_s1 + $0x100] ss:$16 sps:$4 sm:$0xff]   ;;  %v4376_v33 = vld [vmem:[%s6229_s1 + $0x108] ss:$16 sps:$4 sm:$0xff]   ;;  %v4942_v34 = vmov 1983009808  }
  0x6a   : > { %v588_v35 = vunpack.c.l.s4 %v4942_v34  ;;  %v4377_v37 = vld [vmem:[%s6229_s1 + $0x124] ss:$16 sps:$4 sm:$0xff]   ;;  %v4379_v38 = vld [vmem:[%s6229_s1 + $0x12c] ss:$16 sps:$4 sm:$0xff]   ;;  %v4381_v39 = vld [vmem:[%s6229_s1 + $0x120] ss:$16 sps:$4 sm:$0xff]  }
  0x6b   : > { %2006 = vmatpush1.bf16.msra.mxu0 %v4345_v12  ;;  %2170 = vmatpush1.bf16.msra.mxu1 %v4346_v13  ;;  %v5415_v41 = vshrl.u32 %v590_v36, 7  ;;  %v4382_v42 = vld [vmem:[%s6229_s1 + $0x128] ss:$16 sps:$4 sm:$0xff]   ;;  %v4383_v43 = vld [vmem:[%s6229_s1 + $0x144] ss:$16 sps:$4 sm:$0xff]   ;;  %vm2354_vm2 = vcmask 1043458  }
  0x6c   : > { %2007 = vmatprep.subr.bf16.mxu0 %v4347_v14  ;;  %2171 = vmatprep.subr.bf16.mxu1 %v4349_v15  ;;  %v589_v40 = vunpack.c.0.s8 %v588_v35  ;;  %v4385_v44 = vld [vmem:[%s6229_s1 + $0x14c] ss:$16 sps:$4 sm:$0xff]   ;;  %v4387_v45 = vld [vmem:[%s6229_s1 + $0x140] ss:$16 sps:$4 sm:$0xff]   ;;  %v4388_v46 = vld [vmem:[%s6229_s1 + $0x148] ss:$16 sps:$4 sm:$0xff]  }
  0x6d   : > { %v4389_v48 = vld [vmem:[%s6229_s1 + $0x164] ss:$16 sps:$4 sm:$0xff]   ;;  %v4391_v49 = vld [vmem:[%s6229_s1 + $0x16c] ss:$16 sps:$4 sm:$0xff]   ;;  %v4393_v51 = vld [vmem:[%s6229_s1 + $0x160] ss:$16 sps:$4 sm:$0xff]  }
  0x6e   : > { %v5433_v47 = vsub.s32 %v589_v40, %v5415_v41  ;;  %v582_v50 = vld [vmem:[%s6228_s0] sm:$0xff]  ;;  %v4394_v53 = vld [vmem:[%s6229_s1 + $0x168] ss:$16 sps:$4 sm:$0xff]   ;;  %v4397_v55 = vld [vmem:[%s6229_s1 + $0x18c] ss:$16 sps:$4 sm:$0xff]   ;;  %vm2356_vm4 = vcmask 1045508  }
  0x6f   : > { %2008 = vmatpush1.bf16.msra.mxu0 %v4351_v16  ;;  %2172 = vmatpush1.bf16.msra.mxu1 %v4352_v17  ;;  %v4395_v54 = vld [vmem:[%s6229_s1 + $0x184] ss:$16 sps:$4 sm:$0xff]   ;;  %v4399_v57 = vld [vmem:[%s6229_s1 + $0x180] ss:$16 sps:$4 sm:$0xff]   ;;  %v4400_v59 = vld [vmem:[%s6229_s1 + $0x188] ss:$16 sps:$4 sm:$0xff]   ;;  %v586_v2 = vcombine.high %v582_v50, %v582_v50 }
  0x70   : > { %2009 = vmatprep.subr.bf16.mxu0 %v4353_v18  ;;  %2173 = vmatprep.subr.bf16.mxu1 %v4355_v19  ;;  %v593_v52 = vrot.slane %v582_v50, %v5433_v47  ;;  %v4401_v60 = vld [vmem:[%s6229_s1 + $0x1a4] ss:$16 sps:$4 sm:$0xff]   ;;  %v4403_v61 = vld [vmem:[%s6229_s1 + $0x1ac] ss:$16 sps:$4 sm:$0xff]   ;;  %v4405_v62 = vld [vmem:[%s6229_s1 + $0x1a0] ss:$16 sps:$4 sm:$0xff]  }
  0x71   : > { %v4406_v63 = vld [vmem:[%s6229_s1 + $0x1a8] ss:$16 sps:$4 sm:$0xff]   ;;  %v4407_v0 = vld [vmem:[%s6229_s1 + $0x1c4] ss:$16 sps:$4 sm:$0xff]   ;;  %v4409_v1 = vld [vmem:[%s6229_s1 + $0x1cc] ss:$16 sps:$4 sm:$0xff]   ;;  %v5494_v7 = vrot.slane %v586_v2, %v5433_v47 }
  0x72   : > { %v601_v56 = vcombine.high %v593_v52, %v593_v52  ;;  %v4411_v3 = vld [vmem:[%s6229_s1 + $0x1c0] ss:$16 sps:$4 sm:$0xff]   ;;  %v4412_v4 = vld [vmem:[%s6229_s1 + $0x1c8] ss:$16 sps:$4 sm:$0xff]   ;;  %v4413_v5 = vld [vmem:[%s6229_s1 + $0x1e4] ss:$16 sps:$4 sm:$0xff]   ;;  %v626_v14 = vpack.c.bf16 %v593_v52, %v593_v52 }
  0x73   : > { %2010 = vmatpush1.bf16.msra.mxu0 %v4357_v20  ;;  %2174 = vmatpush1.bf16.msra.mxu1 %v4358_v21  ;;  %v4415_v6 = vld [vmem:[%s6229_s1 + $0x1ec] ss:$16 sps:$4 sm:$0xff]   ;;  %v4417_v8 = vld [vmem:[%s6229_s1 + $0x1e0] ss:$16 sps:$4 sm:$0xff]   ;;  %v4418_v9 = vld [vmem:[%s6229_s1 + $0x1e8] ss:$16 sps:$4 sm:$0xff]   ;;  %v602_v12 = vcombine.high %v5494_v7, %v5494_v7 }
  0x74   : > { %2011 = vmatprep.subr.bf16.mxu0 %v4359_v22  ;;  %2175 = vmatprep.subr.bf16.mxu1 %v4361_v23  ;;  %v627_v58 = vpack.c.bf16 %v601_v56, %v601_v56  ;;  %v4422_v10 = vld [vmem:[%s6229_s1 + $0x204] ss:$16 sps:$4 sm:$0xff]   ;;  %v4425_v11 = vld [vmem:[%s6229_s1 + $0x20c] ss:$16 sps:$4 sm:$0xff]   ;;  %v4420_v13 = vld [vmem:[%s6229_s1 + $0x200] ss:$16 sps:$4 sm:$0xff]  }
  0x75   : > { %v4423_v15 = vld [vmem:[%s6229_s1 + $0x208] ss:$16 sps:$4 sm:$0xff]   ;;  %v4428_v16 = vld [vmem:[%s6229_s1 + $0x224] ss:$16 sps:$4 sm:$0xff]   ;;  %v4431_v17 = vld [vmem:[%s6229_s1 + $0x22c] ss:$16 sps:$4 sm:$0xff]   ;;  %v629_v18 = vpack.c.bf16 %v602_v12, %v602_v12 }
  0x76   : > { %2031 = vmatprep.mubr.bf16.mxu0 %v627_v58  ;;  %2195 = vmatprep.mubr.bf16.mxu1 %v627_v58  ;;  %v4426_v19 = vld [vmem:[%s6229_s1 + $0x220] ss:$16 sps:$4 sm:$0xff]   ;;  %v4429_v20 = vld [vmem:[%s6229_s1 + $0x228] ss:$16 sps:$4 sm:$0xff]   ;;  %v4434_v21 = vld [vmem:[%s6229_s1 + $0x244] ss:$16 sps:$4 sm:$0xff]  }
  0x77   : > { %2012 = vmatpush1.bf16.msra.mxu0 %v4363_v24  ;;  %2176 = vmatpush1.bf16.msra.mxu1 %v4364_v25  ;;  %v4437_v22 = vld [vmem:[%s6229_s1 + $0x24c] ss:$16 sps:$4 sm:$0xff]   ;;  %v4432_v23 = vld [vmem:[%s6229_s1 + $0x240] ss:$16 sps:$4 sm:$0xff]   ;;  %v4435_v24 = vld [vmem:[%s6229_s1 + $0x248] ss:$16 sps:$4 sm:$0xff]  }
  0x78   : > { %2013 = vmatprep.subr.bf16.mxu0 %v4365_v26  ;;  %2177 = vmatprep.subr.bf16.mxu1 %v4367_v27  ;;  %v4440_v25 = vld [vmem:[%s6229_s1 + $0x264] ss:$16 sps:$4 sm:$0xff]   ;;  %v4443_v26 = vld [vmem:[%s6229_s1 + $0x26c] ss:$16 sps:$4 sm:$0xff]   ;;  %v4438_v27 = vld [vmem:[%s6229_s1 + $0x260] ss:$16 sps:$4 sm:$0xff]  }
  0x79   : > { %v4455_v34 = vld [vmem:[%s6229_s1 + $0x2ac] ss:$16 sps:$4 sm:$0xff]   ;;  %v4450_v35 = vld [vmem:[%s6229_s1 + $0x2a0] ss:$16 sps:$4 sm:$0xff]   ;;  %v4453_v36 = vld [vmem:[%s6229_s1 + $0x2a8] ss:$16 sps:$4 sm:$0xff]  }
  0x7a   : > { %v4459_v40 = vld [vmem:[%s6229_s1 + $0x2c8] ss:$16 sps:$4 sm:$0xff]   ;;  %v4479_v52 = vld [vmem:[%s6229_s1 + $0x32c] ss:$16 sps:$4 sm:$0xff]   ;;  %v4512_v12 = vld [vmem:[%s6229_s1 + $0x3e4] ss:$16 sps:$4 sm:$0xff]  }
  0x7b   : > { %2014 = vmatpush1.bf16.msra.mxu0 %v4369_v28  ;;  %2178 = vmatpush1.bf16.msra.mxu1 %v4370_v29  ;;  %v4441_v28 = vld [vmem:[%s6229_s1 + $0x268] ss:$16 sps:$4 sm:$0xff]   ;;  %v4446_v29 = vld [vmem:[%s6229_s1 + $0x284] ss:$16 sps:$4 sm:$0xff]   ;;  %v4485_v56 = vld [vmem:[%s6229_s1 + $0x34c] ss:$16 sps:$4 sm:$0xff]  }
  0x7c   : > { %2015 = vmatprep.subr.bf16.mxu0 %v4371_v30  ;;  %2179 = vmatprep.subr.bf16.mxu1 %v4373_v31  ;;  %v4449_v30 = vld [vmem:[%s6229_s1 + $0x28c] ss:$16 sps:$4 sm:$0xff]   ;;  %v4444_v31 = vld [vmem:[%s6229_s1 + $0x280] ss:$16 sps:$4 sm:$0xff]   ;;  %v4471_v50 = vld [vmem:[%s6229_s1 + $0x308] ss:$16 sps:$4 sm:$0xff]  }
  0x7d   : > { %v4483_v58 = vld [vmem:[%s6229_s1 + $0x348] ss:$16 sps:$4 sm:$0xff]   ;;  %vm2355_vm3 = vmor %vm2354_vm2, %vm2353_vm1  ;;  %vm2358_vm6 = vcmask 949254  }
  0x7e   : > { %v4495_v2 = vld [vmem:[%s6229_s1 + $0x388] ss:$16 sps:$4 sm:$0xff]   ;;  %vm2357_vm5 = vmor %vm2356_vm4, %vm2355_vm3 }
  0x7f   : > { %2016 = vmatpush1.bf16.msra.mxu0 %v4375_v32  ;;  %2180 = vmatpush1.bf16.msra.mxu1 %v4376_v33  ;;  %v4447_v32 = vld [vmem:[%s6229_s1 + $0x288] ss:$16 sps:$4 sm:$0xff]   ;;  %v4452_v33 = vld [vmem:[%s6229_s1 + $0x2a4] ss:$16 sps:$4 sm:$0xff]   ;;  %vm2359_vm7 = vmor %vm2358_vm6, %vm2357_vm5 }
  0x80   : > { %2017 = vmatprep.subr.bf16.mxu0 %v4377_v37  ;;  %2181 = vmatprep.subr.bf16.mxu1 %v4379_v38  ;;  %v4458_v37 = vld [vmem:[%s6229_s1 + $0x2c4] ss:$16 sps:$4 sm:$0xff]   ;;  %v4461_v38 = vld [vmem:[%s6229_s1 + $0x2cc] ss:$16 sps:$4 sm:$0xff]  }
  0x83   : > { %2018 = vmatpush1.bf16.msra.mxu0 %v4381_v39  ;;  %2182 = vmatpush1.bf16.msra.mxu1 %v4382_v42  ;;  %v4456_v39 = vld [vmem:[%s6229_s1 + $0x2c0] ss:$16 sps:$4 sm:$0xff]   ;;  %v4464_v42 = vld [vmem:[%s6229_s1 + $0x2e4] ss:$16 sps:$4 sm:$0xff]  }
  0x84   : > { %2019 = vmatprep.subr.bf16.mxu0 %v4383_v43  ;;  %2183 = vmatprep.subr.bf16.mxu1 %v4385_v44  ;;  %v4467_v43 = vld [vmem:[%s6229_s1 + $0x2ec] ss:$16 sps:$4 sm:$0xff]   ;;  %v4462_v44 = vld [vmem:[%s6229_s1 + $0x2e0] ss:$16 sps:$4 sm:$0xff]  }
  0x87   : > { %2020 = vmatpush1.bf16.msra.mxu0 %v4387_v45  ;;  %2184 = vmatpush1.bf16.msra.mxu1 %v4388_v46  ;;  %v4465_v45 = vld [vmem:[%s6229_s1 + $0x2e8] ss:$16 sps:$4 sm:$0xff]   ;;  %v4470_v46 = vld [vmem:[%s6229_s1 + $0x304] ss:$16 sps:$4 sm:$0xff]  }
  0x88   : > { %2021 = vmatprep.subr.bf16.mxu0 %v4389_v48  ;;  %2185 = vmatprep.subr.bf16.mxu1 %v4391_v49  ;;  %v4473_v48 = vld [vmem:[%s6229_s1 + $0x30c] ss:$16 sps:$4 sm:$0xff]   ;;  %v4468_v49 = vld [vmem:[%s6229_s1 + $0x300] ss:$16 sps:$4 sm:$0xff]  }
  0x8b   : > { %2022 = vmatpush1.bf16.msra.mxu0 %v4393_v51  ;;  %2186 = vmatpush1.bf16.msra.mxu1 %v4394_v53  ;;  %v4476_v51 = vld [vmem:[%s6229_s1 + $0x324] ss:$16 sps:$4 sm:$0xff]   ;;  %v4474_v53 = vld [vmem:[%s6229_s1 + $0x320] ss:$16 sps:$4 sm:$0xff]  }
  0x8c   : > { %2023 = vmatprep.subr.bf16.mxu0 %v4395_v54  ;;  %2187 = vmatprep.subr.bf16.mxu1 %v4397_v55  ;;  %v4477_v54 = vld [vmem:[%s6229_s1 + $0x328] ss:$16 sps:$4 sm:$0xff]   ;;  %v4482_v55 = vld [vmem:[%s6229_s1 + $0x344] ss:$16 sps:$4 sm:$0xff]  }
  0x8f   : > { %2024 = vmatpush1.bf16.msra.mxu0 %v4399_v57  ;;  %2188 = vmatpush1.bf16.msra.mxu1 %v4400_v59  ;;  %v4480_v57 = vld [vmem:[%s6229_s1 + $0x340] ss:$16 sps:$4 sm:$0xff]   ;;  %v4488_v59 = vld [vmem:[%s6229_s1 + $0x364] ss:$16 sps:$4 sm:$0xff]  }
  0x90   : > { %2025 = vmatprep.subr.bf16.mxu0 %v4401_v60  ;;  %2189 = vmatprep.subr.bf16.mxu1 %v4403_v61  ;;  %v4491_v60 = vld [vmem:[%s6229_s1 + $0x36c] ss:$16 sps:$4 sm:$0xff]   ;;  %v4486_v61 = vld [vmem:[%s6229_s1 + $0x360] ss:$16 sps:$4 sm:$0xff]  }
  0x93   : > { %2026 = vmatpush1.bf16.msra.mxu0 %v4405_v62  ;;  %2190 = vmatpush1.bf16.msra.mxu1 %v4406_v63  ;;  %v4489_v62 = vld [vmem:[%s6229_s1 + $0x368] ss:$16 sps:$4 sm:$0xff]   ;;  %v4494_v63 = vld [vmem:[%s6229_s1 + $0x384] ss:$16 sps:$4 sm:$0xff]  }
  0x94   : > { %2027 = vmatprep.subr.bf16.mxu0 %v4407_v0  ;;  %2191 = vmatprep.subr.bf16.mxu1 %v4409_v1  ;;  %v4497_v0 = vld [vmem:[%s6229_s1 + $0x38c] ss:$16 sps:$4 sm:$0xff]   ;;  %v4492_v1 = vld [vmem:[%s6229_s1 + $0x380] ss:$16 sps:$4 sm:$0xff]  }
  0x97   : > { %2028 = vmatpush1.bf16.msra.mxu0 %v4411_v3  ;;  %2192 = vmatpush1.bf16.msra.mxu1 %v4412_v4  ;;  %v4500_v3 = vld [vmem:[%s6229_s1 + $0x3a4] ss:$16 sps:$4 sm:$0xff]   ;;  %v4503_v4 = vld [vmem:[%s6229_s1 + $0x3ac] ss:$16 sps:$4 sm:$0xff]  }
  0x98   : > { %2029 = vmatprep.subr.bf16.mxu0 %v4413_v5  ;;  %2193 = vmatprep.subr.bf16.mxu1 %v4415_v6  ;;  %v4498_v5 = vld [vmem:[%s6229_s1 + $0x3a0] ss:$16 sps:$4 sm:$0xff]   ;;  %v4501_v6 = vld [vmem:[%s6229_s1 + $0x3a8] ss:$16 sps:$4 sm:$0xff]  }
  0x9b   : > { %2030 = vmatpush1.bf16.msra.mxu0 %v4417_v8  ;;  %2194 = vmatpush1.bf16.msra.mxu1 %v4418_v9  ;;  %v4506_v8 = vld [vmem:[%s6229_s1 + $0x3c4] ss:$16 sps:$4 sm:$0xff]   ;;  %v4509_v9 = vld [vmem:[%s6229_s1 + $0x3cc] ss:$16 sps:$4 sm:$0xff]  }
  0x9c   : > { %2040 = vmatprep.subr.bf16.mxu0 %v4422_v10  ;;  %2204 = vmatprep.subr.bf16.mxu1 %v4425_v11  ;;  %v4504_v10 = vld [vmem:[%s6229_s1 + $0x3c0] ss:$16 sps:$4 sm:$0xff]   ;;  %v4507_v11 = vld [vmem:[%s6229_s1 + $0x3c8] ss:$16 sps:$4 sm:$0xff]  }
  0x9e   : > { %2032 = vmatmul.mubr.bf16.vlgmr.msra.gmra.mrb[0].mxu0 %v626_v14  ;;  %2196 = vmatmul.mubr.bf16.vlgmr.msra.gmra.mrb[0].mxu1 %v626_v14  ;;  %v4510_v14 = vld [vmem:[%s6229_s1 + $0x3e0] ss:$16 sps:$4 sm:$0xff]  }
  0x9f   : > { %2041 = vmatpush1.bf16.msra.mxu0 %v4420_v13  ;;  %2205 = vmatpush1.bf16.msra.mxu1 %v4423_v15  ;;  %v4515_v13 = vld [vmem:[%s6229_s1 + $0x3ec] ss:$16 sps:$4 sm:$0xff]   ;;  %v4513_v15 = vld [vmem:[%s6229_s1 + $0x3e8] ss:$16 sps:$4 sm:$0xff]  }
  0xa0   : > { %2042 = vmatprep.subr.bf16.mxu0 %v4428_v16  ;;  %2206 = vmatprep.subr.bf16.mxu1 %v4431_v17  ;;  %v4518_v16 = vld [vmem:[%s6229_s1 + $0x404] ss:$16 sps:$4 sm:$0xff]   ;;  %v4521_v17 = vld [vmem:[%s6229_s1 + $0x40c] ss:$16 sps:$4 sm:$0xff]  }
  0xa1   : > { %2072 = vmatprep.mubr.bf16.mxu0 %v629_v18  ;;  %2236 = vmatprep.mubr.bf16.mxu1 %v629_v18  ;;  %v4516_v18 = vld [vmem:[%s6229_s1 + $0x400] ss:$16 sps:$4 sm:$0xff]  }
  0xa3   : > { %2043 = vmatpush1.bf16.msra.mxu0 %v4426_v19  ;;  %2207 = vmatpush1.bf16.msra.mxu1 %v4429_v20  ;;  %v628_v19 = vpack.c.bf16 %v5494_v7, %v5494_v7  ;;  %v4519_v20 = vld [vmem:[%s6229_s1 + $0x408] ss:$16 sps:$4 sm:$0xff]   ;;  %v4527_v7 = vld [vmem:[%s6229_s1 + $0x42c] ss:$16 sps:$4 sm:$0xff]  }
  0xa4   : > { %2044 = vmatprep.subr.bf16.mxu0 %v4434_v21  ;;  %2208 = vmatprep.subr.bf16.mxu1 %v4437_v22  ;;  %v5713_v21 = vld [vmem:[%s6228_s0 + $0x8] sm:$0x3f]  ;;  %v4524_v22 = vld [vmem:[%s6229_s1 + $0x424] ss:$16 sps:$4 sm:$0xff]  }
  0xa7   : > { %2045 = vmatpush1.bf16.msra.mxu0 %v4432_v23  ;;  %2209 = vmatpush1.bf16.msra.mxu1 %v4435_v24  ;;  %v5723_v23 = vrot.slane %v5713_v21, %v5433_v47 }
  0xa8   : > { %2046 = vmatprep.subr.bf16.mxu0 %v4440_v25  ;;  %2210 = vmatprep.subr.bf16.mxu1 %v4443_v26  ;;  %v4522_v25 = vld [vmem:[%s6229_s1 + $0x420] ss:$16 sps:$4 sm:$0xff]   ;;  %v4525_v26 = vld [vmem:[%s6229_s1 + $0x428] ss:$16 sps:$4 sm:$0xff]  }
  0xa9   : > { %v618_v24 = vcombine.high %v5723_v23, %v5723_v23 }
  0xab   : > { %2047 = vmatpush1.bf16.msra.mxu0 %v4438_v27  ;;  %2211 = vmatpush1.bf16.msra.mxu1 %v4441_v28  ;;  %v4530_v27 = vld [vmem:[%s6229_s1 + $0x444] ss:$16 sps:$4 sm:$0xff]   ;;  %v4533_v28 = vld [vmem:[%s6229_s1 + $0x44c] ss:$16 sps:$4 sm:$0xff]  }
  0xac   : > { %2048 = vmatprep.subr.bf16.mxu0 %v4446_v29  ;;  %2212 = vmatprep.subr.bf16.mxu1 %v4449_v30  ;;  %v631_v29 = vpack.c.bf16 %v618_v24, %v618_v24  ;;  %v4528_v30 = vld [vmem:[%s6229_s1 + $0x440] ss:$16 sps:$4 sm:$0xff]   ;;  %v4615_v24 = vld [vmem:[%s6229_s1 + $0x604] ss:$16 sps:$4 sm:$0xff]  }
  0xaf   : > { %2049 = vmatpush1.bf16.msra.mxu0 %v4444_v31  ;;  %2213 = vmatpush1.bf16.msra.mxu1 %v4447_v32  ;;  %v4531_v31 = vld [vmem:[%s6229_s1 + $0x448] ss:$16 sps:$4 sm:$0xff]   ;;  %v4536_v32 = vld [vmem:[%s6229_s1 + $0x464] ss:$16 sps:$4 sm:$0xff]  }
  0xb0   : > { %2050 = vmatprep.subr.bf16.mxu0 %v4452_v33  ;;  %2214 = vmatprep.subr.bf16.mxu1 %v4455_v34  ;;  %v4539_v33 = vld [vmem:[%s6229_s1 + $0x46c] ss:$16 sps:$4 sm:$0xff]   ;;  %v4534_v34 = vld [vmem:[%s6229_s1 + $0x460] ss:$16 sps:$4 sm:$0xff]  }
  0xb3   : > { %2051 = vmatpush1.bf16.msra.mxu0 %v4450_v35  ;;  %2215 = vmatpush1.bf16.msra.mxu1 %v4453_v36  ;;  %v4537_v35 = vld [vmem:[%s6229_s1 + $0x468] ss:$16 sps:$4 sm:$0xff]   ;;  %v4542_v36 = vld [vmem:[%s6229_s1 + $0x484] ss:$16 sps:$4 sm:$0xff]  }
  0xb4   : > { %2052 = vmatprep.subr.bf16.mxu0 %v4458_v37  ;;  %2216 = vmatprep.subr.bf16.mxu1 %v4461_v38  ;;  %v4545_v37 = vld [vmem:[%s6229_s1 + $0x48c] ss:$16 sps:$4 sm:$0xff]   ;;  %v4540_v38 = vld [vmem:[%s6229_s1 + $0x480] ss:$16 sps:$4 sm:$0xff]  }
  0xb7   : > { %2053 = vmatpush1.bf16.msra.mxu0 %v4456_v39  ;;  %2217 = vmatpush1.bf16.msra.mxu1 %v4459_v40  ;;  %v4543_v39 = vld [vmem:[%s6229_s1 + $0x488] ss:$16 sps:$4 sm:$0xff]   ;;  %v4548_v40 = vld [vmem:[%s6229_s1 + $0x4a4] ss:$16 sps:$4 sm:$0xff]  }
  0xb8   : > { %2054 = vmatprep.subr.bf16.mxu0 %v4464_v42  ;;  %2218 = vmatprep.subr.bf16.mxu1 %v4467_v43  ;;  %v4551_v42 = vld [vmem:[%s6229_s1 + $0x4ac] ss:$16 sps:$4 sm:$0xff]   ;;  %v4546_v43 = vld [vmem:[%s6229_s1 + $0x4a0] ss:$16 sps:$4 sm:$0xff]  }
  0xbb   : > { %2055 = vmatpush1.bf16.msra.mxu0 %v4462_v44  ;;  %2219 = vmatpush1.bf16.msra.mxu1 %v4465_v45  ;;  %v4549_v44 = vld [vmem:[%s6229_s1 + $0x4a8] ss:$16 sps:$4 sm:$0xff]   ;;  %v4554_v45 = vld [vmem:[%s6229_s1 + $0x4c4] ss:$16 sps:$4 sm:$0xff]  }
  0xbc   : > { %2056 = vmatprep.subr.bf16.mxu0 %v4470_v46  ;;  %2220 = vmatprep.subr.bf16.mxu1 %v4473_v48  ;;  %v4557_v46 = vld [vmem:[%s6229_s1 + $0x4cc] ss:$16 sps:$4 sm:$0xff]   ;;  %v4552_v48 = vld [vmem:[%s6229_s1 + $0x4c0] ss:$16 sps:$4 sm:$0xff]  }
  0xbf   : > { %2057 = vmatpush1.bf16.msra.mxu0 %v4468_v49  ;;  %2221 = vmatpush1.bf16.msra.mxu1 %v4471_v50  ;;  %v4555_v49 = vld [vmem:[%s6229_s1 + $0x4c8] ss:$16 sps:$4 sm:$0xff]   ;;  %v4560_v50 = vld [vmem:[%s6229_s1 + $0x4e4] ss:$16 sps:$4 sm:$0xff]  }
  0xc0   : > { %2058 = vmatprep.subr.bf16.mxu0 %v4476_v51  ;;  %2222 = vmatprep.subr.bf16.mxu1 %v4479_v52  ;;  %v4563_v51 = vld [vmem:[%s6229_s1 + $0x4ec] ss:$16 sps:$4 sm:$0xff]   ;;  %v4558_v52 = vld [vmem:[%s6229_s1 + $0x4e0] ss:$16 sps:$4 sm:$0xff]  }
  0xc3   : > { %2059 = vmatpush1.bf16.msra.mxu0 %v4474_v53  ;;  %2223 = vmatpush1.bf16.msra.mxu1 %v4477_v54  ;;  %v4561_v53 = vld [vmem:[%s6229_s1 + $0x4e8] ss:$16 sps:$4 sm:$0xff]   ;;  %v4566_v54 = vld [vmem:[%s6229_s1 + $0x504] ss:$16 sps:$4 sm:$0xff]  }
  0xc4   : > { %2060 = vmatprep.subr.bf16.mxu0 %v4482_v55  ;;  %2224 = vmatprep.subr.bf16.mxu1 %v4485_v56  ;;  %v4569_v55 = vld [vmem:[%s6229_s1 + $0x50c] ss:$16 sps:$4 sm:$0xff]   ;;  %v4564_v56 = vld [vmem:[%s6229_s1 + $0x500] ss:$16 sps:$4 sm:$0xff]  }
  0xc7   : > { %2061 = vmatpush1.bf16.msra.mxu0 %v4480_v57  ;;  %2225 = vmatpush1.bf16.msra.mxu1 %v4483_v58  ;;  %v4567_v57 = vld [vmem:[%s6229_s1 + $0x508] ss:$16 sps:$4 sm:$0xff]   ;;  %v4572_v58 = vld [vmem:[%s6229_s1 + $0x524] ss:$16 sps:$4 sm:$0xff]  }
  0xc8   : > { %2062 = vmatprep.subr.bf16.mxu0 %v4488_v59  ;;  %2226 = vmatprep.subr.bf16.mxu1 %v4491_v60  ;;  %v4575_v59 = vld [vmem:[%s6229_s1 + $0x52c] ss:$16 sps:$4 sm:$0xff]   ;;  %v4570_v60 = vld [vmem:[%s6229_s1 + $0x520] ss:$16 sps:$4 sm:$0xff]  }
  0xcb   : > { %2063 = vmatpush1.bf16.msra.mxu0 %v4486_v61  ;;  %2227 = vmatpush1.bf16.msra.mxu1 %v4489_v62  ;;  %v4573_v61 = vld [vmem:[%s6229_s1 + $0x528] ss:$16 sps:$4 sm:$0xff]   ;;  %v4578_v62 = vld [vmem:[%s6229_s1 + $0x544] ss:$16 sps:$4 sm:$0xff]  }
  0xcc   : > { %2064 = vmatprep.subr.bf16.mxu0 %v4494_v63  ;;  %2228 = vmatprep.subr.bf16.mxu1 %v4497_v0  ;;  %v4581_v63 = vld [vmem:[%s6229_s1 + $0x54c] ss:$16 sps:$4 sm:$0xff]   ;;  %v4576_v0 = vld [vmem:[%s6229_s1 + $0x540] ss:$16 sps:$4 sm:$0xff]  }
  0xcf   : > { %2065 = vmatpush1.bf16.msra.mxu0 %v4492_v1  ;;  %2229 = vmatpush1.bf16.msra.mxu1 %v4495_v2  ;;  %v4579_v1 = vld [vmem:[%s6229_s1 + $0x548] ss:$16 sps:$4 sm:$0xff]   ;;  %v4584_v2 = vld [vmem:[%s6229_s1 + $0x564] ss:$16 sps:$4 sm:$0xff]  }
  0xd0   : > { %2066 = vmatprep.subr.bf16.mxu0 %v4500_v3  ;;  %2230 = vmatprep.subr.bf16.mxu1 %v4503_v4  ;;  %v4587_v3 = vld [vmem:[%s6229_s1 + $0x56c] ss:$16 sps:$4 sm:$0xff]   ;;  %v4582_v4 = vld [vmem:[%s6229_s1 + $0x560] ss:$16 sps:$4 sm:$0xff]  }
  0xd3   : > { %2067 = vmatpush1.bf16.msra.mxu0 %v4498_v5  ;;  %2231 = vmatpush1.bf16.msra.mxu1 %v4501_v6  ;;  %v4585_v5 = vld [vmem:[%s6229_s1 + $0x568] ss:$16 sps:$4 sm:$0xff]   ;;  %v4590_v6 = vld [vmem:[%s6229_s1 + $0x584] ss:$16 sps:$4 sm:$0xff]  }
  0xd4   : > { %2068 = vmatprep.subr.bf16.mxu0 %v4506_v8  ;;  %2232 = vmatprep.subr.bf16.mxu1 %v4509_v9  ;;  %v4593_v8 = vld [vmem:[%s6229_s1 + $0x58c] ss:$16 sps:$4 sm:$0xff]   ;;  %v4588_v9 = vld [vmem:[%s6229_s1 + $0x580] ss:$16 sps:$4 sm:$0xff]  }
  0xd7   : > { %2069 = vmatpush1.bf16.msra.mxu0 %v4504_v10  ;;  %2233 = vmatpush1.bf16.msra.mxu1 %v4507_v11  ;;  %v4591_v10 = vld [vmem:[%s6229_s1 + $0x588] ss:$16 sps:$4 sm:$0xff]   ;;  %v4596_v11 = vld [vmem:[%s6229_s1 + $0x5a4] ss:$16 sps:$4 sm:$0xff]  }
  0xd8   : > { %2070 = vmatprep.subr.bf16.mxu0 %v4512_v12  ;;  %2234 = vmatprep.subr.bf16.mxu1 %v4515_v13  ;;  %v4599_v12 = vld [vmem:[%s6229_s1 + $0x5ac] ss:$16 sps:$4 sm:$0xff]   ;;  %v4594_v13 = vld [vmem:[%s6229_s1 + $0x5a0] ss:$16 sps:$4 sm:$0xff]  }
  0xdb   : > { %2071 = vmatpush1.bf16.msra.mxu0 %v4510_v14  ;;  %2235 = vmatpush1.bf16.msra.mxu1 %v4513_v15  ;;  %v4597_v14 = vld [vmem:[%s6229_s1 + $0x5a8] ss:$16 sps:$4 sm:$0xff]   ;;  %v4602_v15 = vld [vmem:[%s6229_s1 + $0x5c4] ss:$16 sps:$4 sm:$0xff]  }
  0xdc   : > { %2081 = vmatprep.subr.bf16.mxu0 %v4518_v16  ;;  %2245 = vmatprep.subr.bf16.mxu1 %v4521_v17  ;;  %v4605_v16 = vld [vmem:[%s6229_s1 + $0x5cc] ss:$16 sps:$4 sm:$0xff]   ;;  %v4600_v17 = vld [vmem:[%s6229_s1 + $0x5c0] ss:$16 sps:$4 sm:$0xff]  }
  0xde   : > { %2073 = vmatmul.mubr.bf16.vlgmr.msra.gmra.mrb[0].mxu0 %v628_v19  ;;  %2237 = vmatmul.mubr.bf16.vlgmr.msra.gmra.mrb[0].mxu1 %v628_v19  ;;  %v4608_v19 = vld [vmem:[%s6229_s1 + $0x5e4] ss:$16 sps:$4 sm:$0xff]  }
  0xdf   : > { %2082 = vmatpush1.bf16.msra.mxu0 %v4516_v18  ;;  %2246 = vmatpush1.bf16.msra.mxu1 %v4519_v20  ;;  %v4603_v18 = vld [vmem:[%s6229_s1 + $0x5c8] ss:$16 sps:$4 sm:$0xff]   ;;  %v4611_v20 = vld [vmem:[%s6229_s1 + $0x5ec] ss:$16 sps:$4 sm:$0xff]  }
  0xe0   : > { %2083 = vmatprep.subr.bf16.mxu0 %v4524_v22  ;;  %2247 = vmatprep.subr.bf16.mxu1 %v4527_v7  ;;  %v4606_v22 = vld [vmem:[%s6229_s1 + $0x5e0] ss:$16 sps:$4 sm:$0xff]   ;;  %v4609_v7 = vld [vmem:[%s6229_s1 + $0x5e8] ss:$16 sps:$4 sm:$0xff]  }
  0xe1   : > { %2113 = vmatprep.mubr.bf16.mxu0 %v631_v29  ;;  %2277 = vmatprep.mubr.bf16.mxu1 %v631_v29  ;;  %v4621_v29 = vld [vmem:[%s6229_s1 + $0x624] ss:$16 sps:$4 sm:$0xff]  }
  0xe3   : > { %2084 = vmatpush1.bf16.msra.mxu0 %v4522_v25  ;;  %2248 = vmatpush1.bf16.msra.mxu1 %v4525_v26  ;;  %v4618_v25 = vld [vmem:[%s6229_s1 + $0x60c] ss:$16 sps:$4 sm:$0xff]   ;;  %v630_v26 = vpack.c.bf16 %v5723_v23, %v5723_v23 }
  0xe4   : > { %2085 = vmatprep.subr.bf16.mxu0 %v4530_v27  ;;  %2249 = vmatprep.subr.bf16.mxu1 %v4533_v28  ;;  %v4613_v27 = vld [vmem:[%s6229_s1 + $0x600] ss:$16 sps:$4 sm:$0xff]   ;;  %v4616_v28 = vld [vmem:[%s6229_s1 + $0x608] ss:$16 sps:$4 sm:$0xff]   ;;  %v4624_v23 = vld [vmem:[%s6229_s1 + $0x62c] ss:$16 sps:$4 sm:$0xff]  }
  0xe7   : > { %2086 = vmatpush1.bf16.msra.mxu0 %v4528_v30  ;;  %2250 = vmatpush1.bf16.msra.mxu1 %v4531_v31  ;;  %v4619_v30 = vld [vmem:[%s6229_s1 + $0x620] ss:$16 sps:$4 sm:$0xff]   ;;  %v4622_v31 = vld [vmem:[%s6229_s1 + $0x628] ss:$16 sps:$4 sm:$0xff]  }
  0xe8   : > { %2087 = vmatprep.subr.bf16.mxu0 %v4536_v32  ;;  %2251 = vmatprep.subr.bf16.mxu1 %v4539_v33  ;;  %v4627_v32 = vld [vmem:[%s6229_s1 + $0x644] ss:$16 sps:$4 sm:$0xff]   ;;  %v4630_v33 = vld [vmem:[%s6229_s1 + $0x64c] ss:$16 sps:$4 sm:$0xff]  }
  0xeb   : > { %2088 = vmatpush1.bf16.msra.mxu0 %v4534_v34  ;;  %2252 = vmatpush1.bf16.msra.mxu1 %v4537_v35  ;;  %v4943_v34 = vmov 0   ;;  %v4625_v35 = vld [vmem:[%s6229_s1 + $0x640] ss:$16 sps:$4 sm:$0xff]  }
  0xec   : > { %2089 = vmatprep.subr.bf16.mxu0 %v4542_v36  ;;  %2253 = vmatprep.subr.bf16.mxu1 %v4545_v37  ;;  %v4628_v36 = vld [vmem:[%s6229_s1 + $0x648] ss:$16 sps:$4 sm:$0xff]   ;;  %v4633_v37 = vld [vmem:[%s6229_s1 + $0x664] ss:$16 sps:$4 sm:$0xff]  }
  0xef   : > { %2090 = vmatpush1.bf16.msra.mxu0 %v4540_v38  ;;  %2254 = vmatpush1.bf16.msra.mxu1 %v4543_v39  ;;  %v4636_v38 = vld [vmem:[%s6229_s1 + $0x66c] ss:$16 sps:$4 sm:$0xff]   ;;  %v4631_v39 = vld [vmem:[%s6229_s1 + $0x660] ss:$16 sps:$4 sm:$0xff]  }
  0xf0   : > { %2091 = vmatprep.subr.bf16.mxu0 %v4548_v40  ;;  %2255 = vmatprep.subr.bf16.mxu1 %v4551_v42  ;;  %v4634_v40 = vld [vmem:[%s6229_s1 + $0x668] ss:$16 sps:$4 sm:$0xff]   ;;  %v4639_v42 = vld [vmem:[%s6229_s1 + $0x684] ss:$16 sps:$4 sm:$0xff]  }
  0xf3   : > { %2092 = vmatpush1.bf16.msra.mxu0 %v4546_v43  ;;  %2256 = vmatpush1.bf16.msra.mxu1 %v4549_v44  ;;  %v4642_v43 = vld [vmem:[%s6229_s1 + $0x68c] ss:$16 sps:$4 sm:$0xff]   ;;  %v4637_v44 = vld [vmem:[%s6229_s1 + $0x680] ss:$16 sps:$4 sm:$0xff]  }
  0xf4   : > { %2093 = vmatprep.subr.bf16.mxu0 %v4554_v45  ;;  %2257 = vmatprep.subr.bf16.mxu1 %v4557_v46  ;;  %v4640_v45 = vld [vmem:[%s6229_s1 + $0x688] ss:$16 sps:$4 sm:$0xff]   ;;  %v4645_v46 = vld [vmem:[%s6229_s1 + $0x6a4] ss:$16 sps:$4 sm:$0xff]  }
  0xf7   : > { %2094 = vmatpush1.bf16.msra.mxu0 %v4552_v48  ;;  %2258 = vmatpush1.bf16.msra.mxu1 %v4555_v49  ;;  %v4648_v48 = vld [vmem:[%s6229_s1 + $0x6ac] ss:$16 sps:$4 sm:$0xff]   ;;  %v4643_v49 = vld [vmem:[%s6229_s1 + $0x6a0] ss:$16 sps:$4 sm:$0xff]  }
  0xf8   : > { %2095 = vmatprep.subr.bf16.mxu0 %v4560_v50  ;;  %2259 = vmatprep.subr.bf16.mxu1 %v4563_v51  ;;  %v4646_v50 = vld [vmem:[%s6229_s1 + $0x6a8] ss:$16 sps:$4 sm:$0xff]   ;;  %v4651_v51 = vld [vmem:[%s6229_s1 + $0x6c4] ss:$16 sps:$4 sm:$0xff]  }
  0xfb   : > { %2096 = vmatpush1.bf16.msra.mxu0 %v4558_v52  ;;  %2260 = vmatpush1.bf16.msra.mxu1 %v4561_v53  ;;  %v4654_v52 = vld [vmem:[%s6229_s1 + $0x6cc] ss:$16 sps:$4 sm:$0xff]   ;;  %v603_v53 = vcombine.high %v5713_v21, %v5713_v21 }
  0xfc   : > { %2097 = vmatprep.subr.bf16.mxu0 %v4566_v54  ;;  %2261 = vmatprep.subr.bf16.mxu1 %v4569_v55  ;;  %v4649_v54 = vld [vmem:[%s6229_s1 + $0x6c0] ss:$16 sps:$4 sm:$0xff]   ;;  %v4652_v55 = vld [vmem:[%s6229_s1 + $0x6c8] ss:$16 sps:$4 sm:$0xff]   ;;  %v4660_v21 = vld [vmem:[%s6229_s1 + $0x6ec] ss:$16 sps:$4 sm:$0xff]  }
  0xff   : > { %2098 = vmatpush1.bf16.msra.mxu0 %v4564_v56  ;;  %2262 = vmatpush1.bf16.msra.mxu1 %v4567_v57  ;;  %v4657_v56 = vld [vmem:[%s6229_s1 + $0x6e4] ss:$16 sps:$4 sm:$0xff]   ;;  %v617_v57 = vrot.slane %v603_v53, %v5433_v47 }
 0x100   : > { %2099 = vmatprep.subr.bf16.mxu0 %v4572_v58  ;;  %2263 = vmatprep.subr.bf16.mxu1 %v4575_v59  ;;  %v4655_v58 = vld [vmem:[%s6229_s1 + $0x6e0] ss:$16 sps:$4 sm:$0xff]   ;;  %v4658_v59 = vld [vmem:[%s6229_s1 + $0x6e8] ss:$16 sps:$4 sm:$0xff]  }
 0x103   : > { %2100 = vmatpush1.bf16.msra.mxu0 %v4570_v60  ;;  %2264 = vmatpush1.bf16.msra.mxu1 %v4573_v61  ;;  %v632_v60 = vpack.c.bf16 %v617_v57, %v617_v57  ;;  %v4944_v61 = vmov 0.0  }
 0x104   : > { %2101 = vmatprep.subr.bf16.mxu0 %v4578_v62  ;;  %2265 = vmatprep.subr.bf16.mxu1 %v4581_v63  ;;  %2362 = vst.msk [vmem:[#allocation3] sm:$0x3] %vm2361_vm0, %v4944_v61  ;;  %v861_v62 = vsub.s32 0, %v5415_v41  ;;  %v869_v63 = vsub.s32 2, %v5415_v41 }
 0x107   : > { %2102 = vmatpush1.bf16.msra.mxu0 %v4576_v0  ;;  %2266 = vmatpush1.bf16.msra.mxu1 %v4579_v1  ;;  %v857_v0 = vld [vmem:[%s6230_s2] sm:$0xf]  ;;  %v865_v1 = vsub.s32 1, %v5415_v41 }
 0x108   : > { %2103 = vmatprep.subr.bf16.mxu0 %v4584_v2  ;;  %2267 = vmatprep.subr.bf16.mxu1 %v4587_v3  ;;  %v873_v2 = vsub.s32 3, %v5415_v41  ;;  %v862_v3 = vrot.slane %v857_v0, %v861_v62 }
 0x10b   : > { %2104 = vmatpush1.bf16.msra.mxu0 %v4582_v4  ;;  %2268 = vmatpush1.bf16.msra.mxu1 %v4585_v5  ;;  %v870_v4 = vrot.slane %v857_v0, %v869_v63  ;;  %v866_v5 = vrot.slane %v857_v0, %v865_v1 }
 0x10c   : > { %2105 = vmatprep.subr.bf16.mxu0 %v4590_v6  ;;  %2269 = vmatprep.subr.bf16.mxu1 %v4593_v8  ;;  %v874_v6 = vrot.slane %v857_v0, %v873_v2 }
 0x10f   : > { %2106 = vmatpush1.bf16.msra.mxu0 %v4588_v9  ;;  %2270 = vmatpush1.bf16.msra.mxu1 %v4591_v10 }
 0x110   : > { %2107 = vmatprep.subr.bf16.mxu0 %v4596_v11  ;;  %2271 = vmatprep.subr.bf16.mxu1 %v4599_v12 }
 0x113   : > { %2108 = vmatpush1.bf16.msra.mxu0 %v4594_v13  ;;  %2272 = vmatpush1.bf16.msra.mxu1 %v4597_v14 }
 0x114   : > { %2109 = vmatprep.subr.bf16.mxu0 %v4602_v15  ;;  %2273 = vmatprep.subr.bf16.mxu1 %v4605_v16 }
 0x117   : > { %2110 = vmatpush1.bf16.msra.mxu0 %v4600_v17  ;;  %2274 = vmatpush1.bf16.msra.mxu1 %v4603_v18 }
 0x118   : > { %2111 = vmatprep.subr.bf16.mxu0 %v4608_v19  ;;  %2275 = vmatprep.subr.bf16.mxu1 %v4611_v20 }
 0x11b   : > { %2112 = vmatpush1.bf16.msra.mxu0 %v4606_v22  ;;  %2276 = vmatpush1.bf16.msra.mxu1 %v4609_v7 }
 0x11c   : > { %2122 = vmatprep.subr.bf16.mxu0 %v4615_v24  ;;  %2286 = vmatprep.subr.bf16.mxu1 %v4618_v25 }
 0x11e   : > { %2114 = vmatmul.mubr.bf16.vlgmr.msra.gmra.mrb[0].mxu0 %v630_v26  ;;  %2278 = vmatmul.mubr.bf16.vlgmr.msra.gmra.mrb[0].mxu1 %v630_v26 }
 0x11f   : > { %2123 = vmatpush1.bf16.msra.mxu0 %v4613_v27  ;;  %2287 = vmatpush1.bf16.msra.mxu1 %v4616_v28 }
 0x120   : > { %2124 = vmatprep.subr.bf16.mxu0 %v4621_v29  ;;  %2288 = vmatprep.subr.bf16.mxu1 %v4624_v23 }
 0x121   : > { %2154 = vmatprep.mubr.bf16.mxu0 %v4943_v34  ;;  %2318 = vmatprep.mubr.bf16.mxu1 %v4943_v34 }
 0x123   : > { %2125 = vmatpush1.bf16.msra.mxu0 %v4619_v30  ;;  %2289 = vmatpush1.bf16.msra.mxu1 %v4622_v31 }
 0x124   : > { %2126 = vmatprep.subr.bf16.mxu0 %v4627_v32  ;;  %2290 = vmatprep.subr.bf16.mxu1 %v4630_v33 }
 0x127   : > { %2127 = vmatpush1.bf16.msra.mxu0 %v4625_v35  ;;  %2291 = vmatpush1.bf16.msra.mxu1 %v4628_v36 }
 0x128   : > { %2128 = vmatprep.subr.bf16.mxu0 %v4633_v37  ;;  %2292 = vmatprep.subr.bf16.mxu1 %v4636_v38 }
 0x12b   : > { %2129 = vmatpush1.bf16.msra.mxu0 %v4631_v39  ;;  %2293 = vmatpush1.bf16.msra.mxu1 %v4634_v40 }
 0x12c   : > { %2130 = vmatprep.subr.bf16.mxu0 %v4639_v42  ;;  %2294 = vmatprep.subr.bf16.mxu1 %v4642_v43 }
 0x12f   : > { %2131 = vmatpush1.bf16.msra.mxu0 %v4637_v44  ;;  %2295 = vmatpush1.bf16.msra.mxu1 %v4640_v45 }
 0x130   : > { %2132 = vmatprep.subr.bf16.mxu0 %v4645_v46  ;;  %2296 = vmatprep.subr.bf16.mxu1 %v4648_v48 }
 0x133   : > { %2133 = vmatpush1.bf16.msra.mxu0 %v4643_v49  ;;  %2297 = vmatpush1.bf16.msra.mxu1 %v4646_v50 }
 0x134   : > { %2134 = vmatprep.subr.bf16.mxu0 %v4651_v51  ;;  %2298 = vmatprep.subr.bf16.mxu1 %v4654_v52 }
 0x137   : > { %2135 = vmatpush1.bf16.msra.mxu0 %v4649_v54  ;;  %2299 = vmatpush1.bf16.msra.mxu1 %v4652_v55 }
 0x138   : > { %2136 = vmatprep.subr.bf16.mxu0 %v4657_v56  ;;  %2300 = vmatprep.subr.bf16.mxu1 %v4660_v21 }
 0x13b   : > { %2137 = vmatpush1.bf16.msra.mxu0 %v4655_v58  ;;  %2301 = vmatpush1.bf16.msra.mxu1 %v4658_v59 }
 0x13e   : > { %2155 = vmatmul.mubr.bf16.vlgmr.msra.gmra.mrb[0].mxu0 %v632_v60  ;;  %2319 = vmatmul.mubr.bf16.vlgmr.msra.gmra.mrb[0].mxu1 %v632_v60 }
 0x211   : > { %v2156_v8 = vpop.f32.mrb[0].mxu0  ;;  %v2320_v9 = vpop.f32.mrb[0].mxu1 }
 0x212   : > { %v4246_v10 = vadd.f32 %v2156_v8, %v862_v3  ;;  %v4248_v11 = vadd.f32 %v2320_v9, %v870_v4  ;;  %v2158_v12 = vpop.f32.mrb[1].mxu0  ;;  %v2322_v13 = vpop.f32.mrb[1].mxu1 }
 0x213   : > { %v4247_v14 = vadd.f32 %v2158_v12, %v866_v5  ;;  %v4249_v15 = vadd.f32 %v2322_v13, %v874_v6  ;;  %v2160_v16 = vpop.f32.mrb[2].mxu0  ;;  %v2324_v17 = vpop.f32.mrb[2].mxu1 }
 0x214   : > { %v2327_v18 = vmax.f32 %v4246_v10, 0.0  ;;  %v2329_v19 = vmax.f32 %v4248_v11, 0.0  ;;  %v2161_v41 = vpop.f32.mrb[3].mxu0  ;;  %v2325_v20 = vpop.f32.mrb[3].mxu1 }
 0x215   : > { %v2328_v22 = vmax.f32 %v4247_v14, 0.0  ;;  %v2330_v7 = vmax.f32 %v4249_v15, 0.0 }
 0x217   : > { %v2335_v24 = vcombine.low %v2327_v18, %v2328_v22  ;;  %v2336_v25 = vcombine.low %v2329_v19, %v2330_v7 }
 0x219   : > { %v2343_v26 = vrot.slane %v2335_v24, %v5433_v47  ;;  %v2350_v27 = vrot.slane %v2336_v25, %v5433_v47 }
 0x21b   : > { %v2351_v28 = vcombine.low %v2343_v26, %v2350_v27 }
 0x21d   : > { %2360 = vst.msk [vmem:[#allocation2] sm:$0xff] %vm2359_vm7, %v2351_v28 }
 0x21e PF: > { %v4661_v29 = vld [vmem:[%s5295_s24 + $0x4] ss:$16 sps:$4 sm:$0xff]   ;;  %v4663_v23 = vld [vmem:[%s5295_s24 + $0xc] ss:$16 sps:$4 sm:$0xff]   ;;  %v4665_v47 = vld [vmem:[%s5295_s24] ss:$16 sps:$4 sm:$0xff]   ;;  %v2369_v2 = vlaneseq }
 0x21f   : > { %3185 = vmatprep.subr.bf16.mxu0 %v4661_v29  ;;  %v4666_v30 = vld [vmem:[%s5295_s24 + $0x8] ss:$16 sps:$4 sm:$0xff]   ;;  %3267 = vmatprep.subr.bf16.mxu1 %v4663_v23  ;;  %v4667_v31 = vld [vmem:[%s5295_s24 + $0x24] ss:$16 sps:$4 sm:$0xff]   ;;  %v4669_v32 = vld [vmem:[%s5295_s24 + $0x2c] ss:$16 sps:$4 sm:$0xff]  }
 0x220   : > { %3186 = vmatpush1.bf16.msra.mxu0 %v4665_v47  ;;  %3268 = vmatpush1.bf16.msra.mxu1 %v4666_v30  ;;  %v4671_v33 = vld [vmem:[%s5295_s24 + $0x20] ss:$16 sps:$4 sm:$0xff]   ;;  %v4672_v34 = vld [vmem:[%s5295_s24 + $0x28] ss:$16 sps:$4 sm:$0xff]   ;;  %v4673_v35 = vld [vmem:[%s5295_s24 + $0x44] ss:$16 sps:$4 sm:$0xff]  }
 0x221   : > { %3187 = vmatprep.subr.bf16.mxu0 %v4667_v31  ;;  %3269 = vmatprep.subr.bf16.mxu1 %v4669_v32  ;;  %v4675_v36 = vld [vmem:[%s5295_s24 + $0x4c] ss:$16 sps:$4 sm:$0xff]   ;;  %v4677_v37 = vld [vmem:[%s5295_s24 + $0x40] ss:$16 sps:$4 sm:$0xff]   ;;  %v4678_v38 = vld [vmem:[%s5295_s24 + $0x48] ss:$16 sps:$4 sm:$0xff]  }
 0x222   : > { %v4679_v39 = vld [vmem:[%s5295_s24 + $0x64] ss:$16 sps:$4 sm:$0xff]   ;;  %v4681_v40 = vld [vmem:[%s5295_s24 + $0x6c] ss:$16 sps:$4 sm:$0xff]   ;;  %v4683_v42 = vld [vmem:[%s5295_s24 + $0x60] ss:$16 sps:$4 sm:$0xff]  }
 0x223   : > { %v4684_v43 = vld [vmem:[%s5295_s24 + $0x68] ss:$16 sps:$4 sm:$0xff]   ;;  %v4685_v44 = vld [vmem:[%s5295_s24 + $0x84] ss:$16 sps:$4 sm:$0xff]   ;;  %v4687_v45 = vld [vmem:[%s5295_s24 + $0x8c] ss:$16 sps:$4 sm:$0xff]  }
 0x224   : > { %3188 = vmatpush1.bf16.msra.mxu0 %v4671_v33  ;;  %3270 = vmatpush1.bf16.msra.mxu1 %v4672_v34  ;;  %v4689_v46 = vld [vmem:[%s5295_s24 + $0x80] ss:$16 sps:$4 sm:$0xff]   ;;  %v4690_v48 = vld [vmem:[%s5295_s24 + $0x88] ss:$16 sps:$4 sm:$0xff]   ;;  %v4691_v49 = vld [vmem:[%s5295_s24 + $0xa4] ss:$16 sps:$4 sm:$0xff]  }
 0x225   : > { %3189 = vmatprep.subr.bf16.mxu0 %v4673_v35  ;;  %3271 = vmatprep.subr.bf16.mxu1 %v4675_v36  ;;  %v4693_v50 = vld [vmem:[%s5295_s24 + $0xac] ss:$16 sps:$4 sm:$0xff]   ;;  %v4695_v51 = vld [vmem:[%s5295_s24 + $0xa0] ss:$16 sps:$4 sm:$0xff]   ;;  %v4696_v52 = vld [vmem:[%s5295_s24 + $0xa8] ss:$16 sps:$4 sm:$0xff]  }
 0x226   : > { %v4697_v53 = vld [vmem:[%s5295_s24 + $0xc4] ss:$16 sps:$4 sm:$0xff]   ;;  %v4699_v54 = vld [vmem:[%s5295_s24 + $0xcc] ss:$16 sps:$4 sm:$0xff]   ;;  %v4701_v55 = vld [vmem:[%s5295_s24 + $0xc0] ss:$16 sps:$4 sm:$0xff]  }
 0x227   : > { %v4702_v56 = vld [vmem:[%s5295_s24 + $0xc8] ss:$16 sps:$4 sm:$0xff]   ;;  %v4703_v21 = vld [vmem:[%s5295_s24 + $0xe4] ss:$16 sps:$4 sm:$0xff]   ;;  %v4705_v57 = vld [vmem:[%s5295_s24 + $0xec] ss:$16 sps:$4 sm:$0xff]  }
 0x228   : > { %3190 = vmatpush1.bf16.msra.mxu0 %v4677_v37  ;;  %3272 = vmatpush1.bf16.msra.mxu1 %v4678_v38  ;;  %v4707_v58 = vld [vmem:[%s5295_s24 + $0xe0] ss:$16 sps:$4 sm:$0xff]   ;;  %v4708_v59 = vld [vmem:[%s5295_s24 + $0xe8] ss:$16 sps:$4 sm:$0xff]   ;;  %v4709_v60 = vld [vmem:[%s5295_s24 + $0x104] ss:$16 sps:$4 sm:$0xff]  }
 0x229   : > { %3191 = vmatprep.subr.bf16.mxu0 %v4679_v39  ;;  %3273 = vmatprep.subr.bf16.mxu1 %v4681_v40  ;;  %v4711_v61 = vld [vmem:[%s5295_s24 + $0x10c] ss:$16 sps:$4 sm:$0xff]   ;;  %v4713_v62 = vld [vmem:[%s5295_s24 + $0x100] ss:$16 sps:$4 sm:$0xff]   ;;  %v4714_v63 = vld [vmem:[%s5295_s24 + $0x108] ss:$16 sps:$4 sm:$0xff]  }
 0x22a   : > { %v4945_v0 = vmov 1983009808   ;;  %v4715_v3 = vld [vmem:[%s5295_s24 + $0x124] ss:$16 sps:$4 sm:$0xff]   ;;  %v4717_v4 = vld [vmem:[%s5295_s24 + $0x12c] ss:$16 sps:$4 sm:$0xff]  }
 0x22b   : > { %v2367_v1 = vunpack.c.l.s4 %v4945_v0  ;;  %v4719_v5 = vld [vmem:[%s5295_s24 + $0x120] ss:$16 sps:$4 sm:$0xff]   ;;  %v6050_v8 = vshrl.u32 %v2369_v2, 7  ;;  %v4720_v9 = vld [vmem:[%s5295_s24 + $0x128] ss:$16 sps:$4 sm:$0xff]   ;;  %vm3168_vm8 = vcmask 949248  }
 0x22c   : > { %3192 = vmatpush1.bf16.msra.mxu0 %v4683_v42  ;;  %3274 = vmatpush1.bf16.msra.mxu1 %v4684_v43  ;;  %v4721_v10 = vld [vmem:[%s5295_s24 + $0x144] ss:$16 sps:$4 sm:$0xff]   ;;  %v4723_v11 = vld [vmem:[%s5295_s24 + $0x14c] ss:$16 sps:$4 sm:$0xff]   ;;  %v4725_v12 = vld [vmem:[%s5295_s24 + $0x140] ss:$16 sps:$4 sm:$0xff]  }
 0x22d   : > { %3193 = vmatprep.subr.bf16.mxu0 %v4685_v44  ;;  %3275 = vmatprep.subr.bf16.mxu1 %v4687_v45  ;;  %v2368_v6 = vunpack.c.0.s8 %v2367_v1  ;;  %v4726_v13 = vld [vmem:[%s5295_s24 + $0x148] ss:$16 sps:$4 sm:$0xff]   ;;  %v4727_v15 = vld [vmem:[%s5295_s24 + $0x164] ss:$16 sps:$4 sm:$0xff]   ;;  %v4729_v16 = vld [vmem:[%s5295_s24 + $0x16c] ss:$16 sps:$4 sm:$0xff]  }
 0x22e   : > { %v2363_v17 = vld [vmem:[#allocation2] sm:$0xff]  ;;  %v4731_v18 = vld [vmem:[%s5295_s24 + $0x160] ss:$16 sps:$4 sm:$0xff]   ;;  %vm3172_vm9 = vcmask 1041408   ;;  %vm3695_vm10 = vcmask 50176   ;;  %p4195_p11 = scmp.ne.s32.totalorder %s5003_s27, 3 }
 0x22f   : > { %v2371_v14 = vsub.s32 %v2368_v6, %v6050_v8  ;;  %v4732_v41 = vld [vmem:[%s5295_s24 + $0x168] ss:$16 sps:$4 sm:$0xff]   ;;  %v4733_v20 = vld [vmem:[%s5295_s24 + $0x184] ss:$16 sps:$4 sm:$0xff]   ;;  %v4735_v22 = vld [vmem:[%s5295_s24 + $0x18c] ss:$16 sps:$4 sm:$0xff]   ;;  %v2365_v31 = vcombine.high %v2363_v17, %v2363_v17 }
 0x230   : > { %3194 = vmatpush1.bf16.msra.mxu0 %v4689_v46  ;;  %3276 = vmatpush1.bf16.msra.mxu1 %v4690_v48  ;;  %v4737_v24 = vld [vmem:[%s5295_s24 + $0x180] ss:$16 sps:$4 sm:$0xff]   ;;  %v4738_v26 = vld [vmem:[%s5295_s24 + $0x188] ss:$16 sps:$4 sm:$0xff]   ;;  %v4739_v27 = vld [vmem:[%s5295_s24 + $0x1a4] ss:$16 sps:$4 sm:$0xff]  }
 0x231   : > { %3195 = vmatprep.subr.bf16.mxu0 %v4691_v49  ;;  %3277 = vmatprep.subr.bf16.mxu1 %v4693_v50  ;;  %v2372_v19 = vrot.slane %v2363_v17, %v2371_v14  ;;  %v4741_v28 = vld [vmem:[%s5295_s24 + $0x1ac] ss:$16 sps:$4 sm:$0xff]   ;;  %v4743_v29 = vld [vmem:[%s5295_s24 + $0x1a0] ss:$16 sps:$4 sm:$0xff]   ;;  %v4744_v23 = vld [vmem:[%s5295_s24 + $0x1a8] ss:$16 sps:$4 sm:$0xff]   ;;  %v6076_v36 = vrot.slane %v2365_v31, %v2371_v14 }
 0x232   : > { %v4745_v47 = vld [vmem:[%s5295_s24 + $0x1c4] ss:$16 sps:$4 sm:$0xff]   ;;  %v4747_v30 = vld [vmem:[%s5295_s24 + $0x1cc] ss:$16 sps:$4 sm:$0xff]   ;;  %v4749_v32 = vld [vmem:[%s5295_s24 + $0x1c0] ss:$16 sps:$4 sm:$0xff]  }
 0x233   : > { %v2380_v7 = vcombine.high %v2372_v19, %v2372_v19  ;;  %v4750_v33 = vld [vmem:[%s5295_s24 + $0x1c8] ss:$16 sps:$4 sm:$0xff]   ;;  %v4751_v34 = vld [vmem:[%s5295_s24 + $0x1e4] ss:$16 sps:$4 sm:$0xff]   ;;  %v4753_v35 = vld [vmem:[%s5295_s24 + $0x1ec] ss:$16 sps:$4 sm:$0xff]   ;;  %v2381_v42 = vcombine.high %v6076_v36, %v6076_v36  ;;  %v2386_v44 = vpack.c.bf16 %v2372_v19, %v2372_v19 }
 0x234   : > { %3196 = vmatpush1.bf16.msra.mxu0 %v4695_v51  ;;  %3278 = vmatpush1.bf16.msra.mxu1 %v4696_v52  ;;  %v4755_v37 = vld [vmem:[%s5295_s24 + $0x1e0] ss:$16 sps:$4 sm:$0xff]   ;;  %v4756_v38 = vld [vmem:[%s5295_s24 + $0x1e8] ss:$16 sps:$4 sm:$0xff]   ;;  %v4760_v39 = vld [vmem:[%s5295_s24 + $0x204] ss:$16 sps:$4 sm:$0xff]  }
 0x235   : > { %3197 = vmatprep.subr.bf16.mxu0 %v4697_v53  ;;  %3279 = vmatprep.subr.bf16.mxu1 %v4699_v54  ;;  %v2387_v25 = vpack.c.bf16 %v2380_v7, %v2380_v7  ;;  %v4763_v40 = vld [vmem:[%s5295_s24 + $0x20c] ss:$16 sps:$4 sm:$0xff]   ;;  %v4758_v43 = vld [vmem:[%s5295_s24 + $0x200] ss:$16 sps:$4 sm:$0xff]   ;;  %v4761_v45 = vld [vmem:[%s5295_s24 + $0x208] ss:$16 sps:$4 sm:$0xff]   ;;  %v2389_v49 = vpack.c.bf16 %v2381_v42, %v2381_v42 }
 0x236   : > { %v4766_v46 = vld [vmem:[%s5295_s24 + $0x224] ss:$16 sps:$4 sm:$0xff]   ;;  %v4769_v48 = vld [vmem:[%s5295_s24 + $0x22c] ss:$16 sps:$4 sm:$0xff]   ;;  %v4764_v50 = vld [vmem:[%s5295_s24 + $0x220] ss:$16 sps:$4 sm:$0xff]  }
 0x237   : > { %3217 = vmatprep.mubr.bf16.mxu0 %v2387_v25  ;;  %3299 = vmatprep.mubr.bf16.mxu1 %v2387_v25  ;;  %v4767_v51 = vld [vmem:[%s5295_s24 + $0x228] ss:$16 sps:$4 sm:$0xff]   ;;  %v4772_v52 = vld [vmem:[%s5295_s24 + $0x244] ss:$16 sps:$4 sm:$0xff]   ;;  %v4775_v53 = vld [vmem:[%s5295_s24 + $0x24c] ss:$16 sps:$4 sm:$0xff]  }
 0x238   : > { %3198 = vmatpush1.bf16.msra.mxu0 %v4701_v55  ;;  %3280 = vmatpush1.bf16.msra.mxu1 %v4702_v56  ;;  %v4770_v54 = vld [vmem:[%s5295_s24 + $0x240] ss:$16 sps:$4 sm:$0xff]   ;;  %v4773_v55 = vld [vmem:[%s5295_s24 + $0x248] ss:$16 sps:$4 sm:$0xff]   ;;  %v4778_v56 = vld [vmem:[%s5295_s24 + $0x264] ss:$16 sps:$4 sm:$0xff]  }
 0x239   : > { %3199 = vmatprep.subr.bf16.mxu0 %v4703_v21  ;;  %3281 = vmatprep.subr.bf16.mxu1 %v4705_v57  ;;  %v4781_v21 = vld [vmem:[%s5295_s24 + $0x26c] ss:$16 sps:$4 sm:$0xff]   ;;  %v4776_v57 = vld [vmem:[%s5295_s24 + $0x260] ss:$16 sps:$4 sm:$0xff]   ;;  %v4791_v2 = vld [vmem:[%s5295_s24 + $0x2a8] ss:$16 sps:$4 sm:$0xff]  }
 0x23a   : > { %v4793_v0 = vld [vmem:[%s5295_s24 + $0x2ac] ss:$16 sps:$4 sm:$0xff]   ;;  %v4788_v1 = vld [vmem:[%s5295_s24 + $0x2a0] ss:$16 sps:$4 sm:$0xff]   ;;  %v4797_v6 = vld [vmem:[%s5295_s24 + $0x2c8] ss:$16 sps:$4 sm:$0xff]  }
 0x23b   : > { %v4811_v14 = vld [vmem:[%s5295_s24 + $0x30c] ss:$16 sps:$4 sm:$0xff]   ;;  %v4814_v17 = vld [vmem:[%s5295_s24 + $0x324] ss:$16 sps:$4 sm:$0xff]   ;;  %v4812_v19 = vld [vmem:[%s5295_s24 + $0x320] ss:$16 sps:$4 sm:$0xff]  }
 0x23c   : > { %3200 = vmatpush1.bf16.msra.mxu0 %v4707_v58  ;;  %3282 = vmatpush1.bf16.msra.mxu1 %v4708_v59  ;;  %v4779_v58 = vld [vmem:[%s5295_s24 + $0x268] ss:$16 sps:$4 sm:$0xff]   ;;  %v4784_v59 = vld [vmem:[%s5295_s24 + $0x284] ss:$16 sps:$4 sm:$0xff]   ;;  %v4818_v7 = vld [vmem:[%s5295_s24 + $0x340] ss:$16 sps:$4 sm:$0xff]  }
 0x23d   : > { %3201 = vmatprep.subr.bf16.mxu0 %v4709_v60  ;;  %3283 = vmatprep.subr.bf16.mxu1 %v4711_v61  ;;  %v4787_v60 = vld [vmem:[%s5295_s24 + $0x28c] ss:$16 sps:$4 sm:$0xff]   ;;  %v4782_v61 = vld [vmem:[%s5295_s24 + $0x280] ss:$16 sps:$4 sm:$0xff]   ;;  %v4826_v25 = vld [vmem:[%s5295_s24 + $0x364] ss:$16 sps:$4 sm:$0xff]  }
 0x23e   : > { %v4838_v31 = vld [vmem:[%s5295_s24 + $0x3a4] ss:$16 sps:$4 sm:$0xff]   ;;  %v4845_v42 = vld [vmem:[%s5295_s24 + $0x3c8] ss:$16 sps:$4 sm:$0xff]  }
 0x240   : > { %3202 = vmatpush1.bf16.msra.mxu0 %v4713_v62  ;;  %3284 = vmatpush1.bf16.msra.mxu1 %v4714_v63  ;;  %v4785_v62 = vld [vmem:[%s5295_s24 + $0x288] ss:$16 sps:$4 sm:$0xff]   ;;  %v4790_v63 = vld [vmem:[%s5295_s24 + $0x2a4] ss:$16 sps:$4 sm:$0xff]  }
 0x241   : > { %3203 = vmatprep.subr.bf16.mxu0 %v4715_v3  ;;  %3285 = vmatprep.subr.bf16.mxu1 %v4717_v4  ;;  %v4796_v3 = vld [vmem:[%s5295_s24 + $0x2c4] ss:$16 sps:$4 sm:$0xff]   ;;  %v4799_v4 = vld [vmem:[%s5295_s24 + $0x2cc] ss:$16 sps:$4 sm:$0xff]  }
 0x244   : > { %3204 = vmatpush1.bf16.msra.mxu0 %v4719_v5  ;;  %3286 = vmatpush1.bf16.msra.mxu1 %v4720_v9  ;;  %v4794_v5 = vld [vmem:[%s5295_s24 + $0x2c0] ss:$16 sps:$4 sm:$0xff]   ;;  %v4802_v9 = vld [vmem:[%s5295_s24 + $0x2e4] ss:$16 sps:$4 sm:$0xff]  }
 0x245   : > { %3205 = vmatprep.subr.bf16.mxu0 %v4721_v10  ;;  %3287 = vmatprep.subr.bf16.mxu1 %v4723_v11  ;;  %v4805_v10 = vld [vmem:[%s5295_s24 + $0x2ec] ss:$16 sps:$4 sm:$0xff]   ;;  %v4800_v11 = vld [vmem:[%s5295_s24 + $0x2e0] ss:$16 sps:$4 sm:$0xff]  }
 0x248   : > { %3206 = vmatpush1.bf16.msra.mxu0 %v4725_v12  ;;  %3288 = vmatpush1.bf16.msra.mxu1 %v4726_v13  ;;  %v4803_v12 = vld [vmem:[%s5295_s24 + $0x2e8] ss:$16 sps:$4 sm:$0xff]   ;;  %v4808_v13 = vld [vmem:[%s5295_s24 + $0x304] ss:$16 sps:$4 sm:$0xff]  }
 0x249   : > { %3207 = vmatprep.subr.bf16.mxu0 %v4727_v15  ;;  %3289 = vmatprep.subr.bf16.mxu1 %v4729_v16  ;;  %v4806_v15 = vld [vmem:[%s5295_s24 + $0x300] ss:$16 sps:$4 sm:$0xff]   ;;  %v4809_v16 = vld [vmem:[%s5295_s24 + $0x308] ss:$16 sps:$4 sm:$0xff]  }
 0x24c   : > { %3208 = vmatpush1.bf16.msra.mxu0 %v4731_v18  ;;  %3290 = vmatpush1.bf16.msra.mxu1 %v4732_v41  ;;  %v4817_v18 = vld [vmem:[%s5295_s24 + $0x32c] ss:$16 sps:$4 sm:$0xff]   ;;  %v4815_v41 = vld [vmem:[%s5295_s24 + $0x328] ss:$16 sps:$4 sm:$0xff]  }
 0x24d   : > { %3209 = vmatprep.subr.bf16.mxu0 %v4733_v20  ;;  %3291 = vmatprep.subr.bf16.mxu1 %v4735_v22  ;;  %v4820_v20 = vld [vmem:[%s5295_s24 + $0x344] ss:$16 sps:$4 sm:$0xff]   ;;  %v4823_v22 = vld [vmem:[%s5295_s24 + $0x34c] ss:$16 sps:$4 sm:$0xff]  }
 0x250   : > { %3210 = vmatpush1.bf16.msra.mxu0 %v4737_v24  ;;  %3292 = vmatpush1.bf16.msra.mxu1 %v4738_v26  ;;  %v4821_v24 = vld [vmem:[%s5295_s24 + $0x348] ss:$16 sps:$4 sm:$0xff]   ;;  %v4829_v26 = vld [vmem:[%s5295_s24 + $0x36c] ss:$16 sps:$4 sm:$0xff]  }
 0x251   : > { %3211 = vmatprep.subr.bf16.mxu0 %v4739_v27  ;;  %3293 = vmatprep.subr.bf16.mxu1 %v4741_v28  ;;  %v4824_v27 = vld [vmem:[%s5295_s24 + $0x360] ss:$16 sps:$4 sm:$0xff]   ;;  %v4827_v28 = vld [vmem:[%s5295_s24 + $0x368] ss:$16 sps:$4 sm:$0xff]  }
 0x254   : > { %3212 = vmatpush1.bf16.msra.mxu0 %v4743_v29  ;;  %3294 = vmatpush1.bf16.msra.mxu1 %v4744_v23  ;;  %v4832_v29 = vld [vmem:[%s5295_s24 + $0x384] ss:$16 sps:$4 sm:$0xff]   ;;  %v4835_v23 = vld [vmem:[%s5295_s24 + $0x38c] ss:$16 sps:$4 sm:$0xff]  }
 0x255   : > { %3213 = vmatprep.subr.bf16.mxu0 %v4745_v47  ;;  %3295 = vmatprep.subr.bf16.mxu1 %v4747_v30  ;;  %v4830_v47 = vld [vmem:[%s5295_s24 + $0x380] ss:$16 sps:$4 sm:$0xff]   ;;  %v4833_v30 = vld [vmem:[%s5295_s24 + $0x388] ss:$16 sps:$4 sm:$0xff]  }
 0x258   : > { %3214 = vmatpush1.bf16.msra.mxu0 %v4749_v32  ;;  %3296 = vmatpush1.bf16.msra.mxu1 %v4750_v33  ;;  %v4841_v32 = vld [vmem:[%s5295_s24 + $0x3ac] ss:$16 sps:$4 sm:$0xff]   ;;  %v4836_v33 = vld [vmem:[%s5295_s24 + $0x3a0] ss:$16 sps:$4 sm:$0xff]  }
 0x259   : > { %3215 = vmatprep.subr.bf16.mxu0 %v4751_v34  ;;  %3297 = vmatprep.subr.bf16.mxu1 %v4753_v35  ;;  %v4839_v34 = vld [vmem:[%s5295_s24 + $0x3a8] ss:$16 sps:$4 sm:$0xff]   ;;  %v4844_v35 = vld [vmem:[%s5295_s24 + $0x3c4] ss:$16 sps:$4 sm:$0xff]  }
 0x25c   : > { %3216 = vmatpush1.bf16.msra.mxu0 %v4755_v37  ;;  %3298 = vmatpush1.bf16.msra.mxu1 %v4756_v38  ;;  %v4847_v37 = vld [vmem:[%s5295_s24 + $0x3cc] ss:$16 sps:$4 sm:$0xff]   ;;  %v2514_v38 = vld [vmem:[%s5295_s24 + $0x3e0] sm:$0x33] }
 0x25d   : > { %3226 = vmatprep.subr.bf16.mxu0 %v4760_v39  ;;  %3308 = vmatprep.subr.bf16.mxu1 %v4763_v40  ;;  %v2515_v39 = vld [vmem:[%s5295_s24 + $0x3e8] sm:$0x33]  ;;  %v4842_v40 = vld [vmem:[%s5295_s24 + $0x3c0] ss:$16 sps:$4 sm:$0xff]  }
 0x25f   : > { %3218 = vmatmul.mubr.bf16.vlgmr.msra.gmra.mrb[0].mxu0 %v2386_v44  ;;  %3300 = vmatmul.mubr.bf16.vlgmr.msra.gmra.mrb[0].mxu1 %v2386_v44  ;;  %v4158_v44 = vcombine.high %v2515_v39, %v2515_v39 }
 0x260   : > { %3227 = vmatpush1.bf16.msra.mxu0 %v4758_v43  ;;  %3309 = vmatpush1.bf16.msra.mxu1 %v4761_v45  ;;  %v4156_v43 = vcombine.high %v2514_v38, %v2514_v38  ;;  %v4155_v45 = vcombine.low %v2514_v38, %v2514_v38 }
 0x261   : > { %3228 = vmatprep.subr.bf16.mxu0 %v4766_v46  ;;  %3310 = vmatprep.subr.bf16.mxu1 %v4769_v48  ;;  %v4157_v46 = vcombine.low %v2515_v39, %v2515_v39 }
 0x262   : > { %4160 = vmatprep.mubr.msk.bf16.mxu0 %vm3168_vm8, %v2389_v49  ;;  %4162 = vmatprep.mubr.msk.bf16.mxu1 %vm3168_vm8, %v2389_v49  ;;  %v3174_v48 = vsel %vm3172_vm9, %v4155_v45, 0 }
 0x263   : > { %v3180_v49 = vsel %vm3172_vm9, %v4157_v46, 0 }
 0x264   : > { %3229 = vmatpush1.bf16.msra.mxu0 %v4764_v50  ;;  %3311 = vmatpush1.bf16.msra.mxu1 %v4767_v51  ;;  %v4852_v50 = vld [vmem:[%s5293_s30 + $0x40] sm:$0xff]  }
 0x265   : > { %3230 = vmatprep.subr.bf16.mxu0 %v4772_v52  ;;  %3312 = vmatprep.subr.bf16.mxu1 %v4775_v53  ;;  %v4853_v51 = vld [vmem:[%s5293_s30 + $0xc0] sm:$0xff]   ;;  %v2388_v52 = vpack.c.bf16 %v6076_v36, %v6076_v36  ;;  %v4859_v36 = vld [vmem:[%s5293_s30 + $0x88] sm:$0xff]  }
 0x266   : > { %v4854_v53 = vld [vmem:[%s5293_s30] sm:$0xff]  }
 0x268   : > { %3231 = vmatpush1.bf16.msra.mxu0 %v4770_v54  ;;  %3313 = vmatpush1.bf16.msra.mxu1 %v4773_v55  ;;  %v4855_v54 = vld [vmem:[%s5293_s30 + $0x80] sm:$0xff]   ;;  %v4856_v55 = vld [vmem:[%s5293_s30 + $0x48] sm:$0xff]  }
 0x269   : > { %3232 = vmatprep.subr.bf16.mxu0 %v4778_v56  ;;  %3314 = vmatprep.subr.bf16.mxu1 %v4781_v21  ;;  %v4857_v56 = vld [vmem:[%s5293_s30 + $0xc8] sm:$0xff]  }
 0x26a   : > { %v4858_v21 = vld [vmem:[%s5293_s30 + $0x8] sm:$0xff]  }
 0x26c   : > { %3233 = vmatpush1.bf16.msra.mxu0 %v4776_v57  ;;  %3315 = vmatpush1.bf16.msra.mxu1 %v4779_v58  ;;  %v4860_v57 = vld [vmem:[%s5293_s30 + $0x50] sm:$0xff]  }
 0x26d   : > { %3234 = vmatprep.subr.bf16.mxu0 %v4784_v59  ;;  %3316 = vmatprep.subr.bf16.mxu1 %v4787_v60  ;;  %v4861_v58 = vld [vmem:[%s5293_s30 + $0xd0] sm:$0xff]  }
 0x26e   : > { %v4862_v59 = vld [vmem:[%s5293_s30 + $0x10] sm:$0xff]  }
 0x26f   : > { %v4863_v60 = vld [vmem:[%s5293_s30 + $0x90] sm:$0xff]  }
 0x270   : > { %3235 = vmatpush1.bf16.msra.mxu0 %v4782_v61  ;;  %3317 = vmatpush1.bf16.msra.mxu1 %v4785_v62  ;;  %v4864_v61 = vld [vmem:[%s5293_s30 + $0x58] sm:$0xff]  }
 0x271   : > { %3236 = vmatprep.subr.bf16.mxu0 %v4790_v63  ;;  %3318 = vmatprep.subr.bf16.mxu1 %v4793_v0  ;;  %v4865_v62 = vld [vmem:[%s5293_s30 + $0xd8] sm:$0xff]  }
 0x272   : > { %v4866_v63 = vld [vmem:[%s5293_s30 + $0x18] sm:$0xff]  }
 0x273   : > { %v4867_v0 = vld [vmem:[%s5293_s30 + $0x98] sm:$0xff]  }
 0x274   : > { %3237 = vmatpush1.bf16.msra.mxu0 %v4788_v1  ;;  %3319 = vmatpush1.bf16.msra.mxu1 %v4791_v2  ;;  %v4868_v1 = vld [vmem:[%s5293_s30 + $0x60] sm:$0xff]  }
 0x275   : > { %3238 = vmatprep.subr.bf16.mxu0 %v4796_v3  ;;  %3320 = vmatprep.subr.bf16.mxu1 %v4799_v4  ;;  %v4869_v2 = vld [vmem:[%s5293_s30 + $0xe0] sm:$0xff]  }
 0x276   : > { %v4870_v3 = vld [vmem:[%s5293_s30 + $0x20] sm:$0xff]  }
 0x277   : > { %v4871_v4 = vld [vmem:[%s5293_s30 + $0xa0] sm:$0xff]  }
 0x278   : > { %3239 = vmatpush1.bf16.msra.mxu0 %v4794_v5  ;;  %3321 = vmatpush1.bf16.msra.mxu1 %v4797_v6  ;;  %v4872_v5 = vld [vmem:[%s5293_s30 + $0x68] sm:$0xff]  }
 0x279   : > { %3240 = vmatprep.subr.bf16.mxu0 %v4802_v9  ;;  %3322 = vmatprep.subr.bf16.mxu1 %v4805_v10  ;;  %v4873_v6 = vld [vmem:[%s5293_s30 + $0xe8] sm:$0xff]  }
 0x27a   : > { %v4874_v9 = vld [vmem:[%s5293_s30 + $0x28] sm:$0xff]  }
 0x27b   : > { %v4875_v10 = vld [vmem:[%s5293_s30 + $0xa8] sm:$0xff]  }
 0x27c   : > { %3241 = vmatpush1.bf16.msra.mxu0 %v4800_v11  ;;  %3323 = vmatpush1.bf16.msra.mxu1 %v4803_v12  ;;  %v4876_v11 = vld [vmem:[%s5293_s30 + $0x70] sm:$0xff]  }
 0x27d   : > { %3242 = vmatprep.subr.bf16.mxu0 %v4808_v13  ;;  %3324 = vmatprep.subr.bf16.mxu1 %v4811_v14  ;;  %v4877_v12 = vld [vmem:[%s5293_s30 + $0xf0] sm:$0xff]  }
 0x27e   : > { %v4878_v13 = vld [vmem:[%s5293_s30 + $0x30] sm:$0xff]  }
 0x27f   : > { %v4879_v14 = vld [vmem:[%s5293_s30 + $0xb0] sm:$0xff]  }
 0x280   : > { %3243 = vmatpush1.bf16.msra.mxu0 %v4806_v15  ;;  %3325 = vmatpush1.bf16.msra.mxu1 %v4809_v16  ;;  %v4880_v15 = vld [vmem:[%s5293_s30 + $0x78] sm:$0xff]  }
 0x281   : > { %3244 = vmatprep.subr.bf16.mxu0 %v4814_v17  ;;  %3326 = vmatprep.subr.bf16.mxu1 %v4817_v18  ;;  %v4881_v16 = vld [vmem:[%s5293_s30 + $0xf8] sm:$0xff]  }
 0x282   : > { %v4882_v17 = vld [vmem:[%s5293_s30 + $0x38] sm:$0xff]  }
 0x283   : > { %v4883_v18 = vld [vmem:[%s5293_s30 + $0xb8] sm:$0xff]  }
 0x284   : > { %3245 = vmatpush1.bf16.msra.mxu0 %v4812_v19  ;;  %3327 = vmatpush1.bf16.msra.mxu1 %v4815_v41  ;;  %v2520_v19 = vsub.s32 0, %v6050_v8  ;;  %v2528_v41 = vsub.s32 2, %v6050_v8 }
 0x285   : > { %3246 = vmatprep.subr.bf16.mxu0 %v4820_v20  ;;  %3328 = vmatprep.subr.bf16.mxu1 %v4823_v22  ;;  %v2516_v20 = vld [vmem:[%s569_s22] sm:$0xf]  ;;  %v2524_v22 = vsub.s32 1, %v6050_v8 }
 0x288   : > { %3247 = vmatpush1.bf16.msra.mxu0 %v4818_v7  ;;  %3329 = vmatpush1.bf16.msra.mxu1 %v4821_v24  ;;  %v2532_v7 = vsub.s32 3, %v6050_v8  ;;  %v2521_v24 = vrot.slane %v2516_v20, %v2520_v19 }
 0x289   : > { %3248 = vmatprep.subr.bf16.mxu0 %v4826_v25  ;;  %3330 = vmatprep.subr.bf16.mxu1 %v4829_v26  ;;  %v2529_v25 = vrot.slane %v2516_v20, %v2528_v41  ;;  %v2525_v26 = vrot.slane %v2516_v20, %v2524_v22 }
 0x28c   : > { %3249 = vmatpush1.bf16.msra.mxu0 %v4824_v27  ;;  %3331 = vmatpush1.bf16.msra.mxu1 %v4827_v28  ;;  %v2533_v27 = vrot.slane %v2516_v20, %v2532_v7 }
 0x28d   : > { %3250 = vmatprep.subr.bf16.mxu0 %v4832_v29  ;;  %3332 = vmatprep.subr.bf16.mxu1 %v4835_v23 }
 0x290   : > { %3251 = vmatpush1.bf16.msra.mxu0 %v4830_v47  ;;  %3333 = vmatpush1.bf16.msra.mxu1 %v4833_v30 }
 0x291   : > { %3252 = vmatprep.subr.bf16.mxu0 %v4838_v31  ;;  %3334 = vmatprep.subr.bf16.mxu1 %v4841_v32 }
 0x294   : > { %3253 = vmatpush1.bf16.msra.mxu0 %v4836_v33  ;;  %3335 = vmatpush1.bf16.msra.mxu1 %v4839_v34 }
 0x295   : > { %3254 = vmatprep.subr.bf16.mxu0 %v4844_v35  ;;  %3336 = vmatprep.subr.bf16.mxu1 %v4847_v37 }
 0x298   : > { %3255 = vmatpush1.bf16.msra.mxu0 %v4842_v40  ;;  %3337 = vmatpush1.bf16.msra.mxu1 %v4845_v42 }
 0x299   : > { %4159 = vmatprep.subr.msk.bf16.mxu0 %vm3172_vm9, %v4156_v43  ;;  %4161 = vmatprep.subr.msk.bf16.mxu1 %vm3172_vm9, %v4158_v44 }
 0x29c   : > { %3257 = vmatpush1.bf16.msra.mxu0 %v3174_v48  ;;  %3339 = vmatpush1.bf16.msra.mxu1 %v3180_v49 }
 0x29d   : > { %4202 = vmatprep.subr.bf16.mxu0 %v4852_v50  ;;  %4224 = vmatprep.subr.bf16.mxu1 %v4853_v51 }
 0x29f   : > { %3259 = vmatmul.mubr.bf16.vlgmr.msra.gmra.mrb[0].mxu0 %v2388_v52  ;;  %3341 = vmatmul.mubr.bf16.vlgmr.msra.gmra.mrb[0].mxu1 %v2388_v52 }
 0x2a0   : > { %4203 = vmatpush3.bf16.msra.mxu0 %v4854_v53  ;;  %4225 = vmatpush3.bf16.msra.mxu1 %v4855_v54 }
 0x2a1   : > { %4204 = vmatprep.subr.bf16.mxu0 %v4856_v55  ;;  %4226 = vmatprep.subr.bf16.mxu1 %v4857_v56  ;;  %v3353_v56 = vld [vmem:[#allocation3] sm:$0x3] }
 0x2a4   : > { %4205 = vmatpush3.bf16.msra.mxu0 %v4858_v21  ;;  %4227 = vmatpush3.bf16.msra.mxu1 %v4859_v36 }
 0x2a5   : > { %4206 = vmatprep.subr.bf16.mxu0 %v4860_v57  ;;  %4228 = vmatprep.subr.bf16.mxu1 %v4861_v58 }
 0x2a8   : > { %4207 = vmatpush3.bf16.msra.mxu0 %v4862_v59  ;;  %4229 = vmatpush3.bf16.msra.mxu1 %v4863_v60  ;;  %v4196_v60 = vld [vmem:[%s6234_s6] ss:$0 sm:$0xff] (!%p4195_p11) }
 0x2a9   : > { %4208 = vmatprep.subr.bf16.mxu0 %v4864_v61  ;;  %4230 = vmatprep.subr.bf16.mxu1 %v4865_v62 }
 0x2ac   : > { %4209 = vmatpush3.bf16.msra.mxu0 %v4866_v63  ;;  %4231 = vmatpush3.bf16.msra.mxu1 %v4867_v0 }
 0x2ad   : > { %4210 = vmatprep.subr.bf16.mxu0 %v4868_v1  ;;  %4232 = vmatprep.subr.bf16.mxu1 %v4869_v2 }
 0x2b0   : > { %4211 = vmatpush3.bf16.msra.mxu0 %v4870_v3  ;;  %4233 = vmatpush3.bf16.msra.mxu1 %v4871_v4 }
 0x2b1   : > { %4212 = vmatprep.subr.bf16.mxu0 %v4872_v5  ;;  %4234 = vmatprep.subr.bf16.mxu1 %v4873_v6 }
 0x2b4   : > { %4213 = vmatpush3.bf16.msra.mxu0 %v4874_v9  ;;  %4235 = vmatpush3.bf16.msra.mxu1 %v4875_v10 }
 0x2b5   : > { %4214 = vmatprep.subr.bf16.mxu0 %v4876_v11  ;;  %4236 = vmatprep.subr.bf16.mxu1 %v4877_v12 }
 0x2b8   : > { %4215 = vmatpush3.bf16.msra.mxu0 %v4878_v13  ;;  %4237 = vmatpush3.bf16.msra.mxu1 %v4879_v14 }
 0x2b9   : > { %4216 = vmatprep.subr.bf16.mxu0 %v4880_v15  ;;  %4238 = vmatprep.subr.bf16.mxu1 %v4881_v16 }
 0x2bc   : > { %4217 = vmatpush3.bf16.msra.mxu0 %v4882_v17  ;;  %4239 = vmatpush3.bf16.msra.mxu1 %v4883_v18 }
 0x372   : > { %v3260_v28 = vpop.f32.mrb[0].mxu0  ;;  %v3342_v29 = vpop.f32.mrb[0].mxu1 }
 0x373   : > { %v4274_v23 = vadd.f32 %v3260_v28, %v2521_v24  ;;  %v4276_v47 = vadd.f32 %v3342_v29, %v2529_v25  ;;  %v3262_v30 = vpop.f32.mrb[1].mxu0  ;;  %v3344_v31 = vpop.f32.mrb[1].mxu1 }
 0x374   : > { %v4275_v32 = vadd.f32 %v3262_v30, %v2525_v26  ;;  %v4277_v33 = vadd.f32 %v3344_v31, %v2533_v27  ;;  %v3264_v34 = vpop.f32.mrb[2].mxu0  ;;  %v3346_v35 = vpop.f32.mrb[2].mxu1 }
 0x375   : > { %v3349_v37 = vmax.f32 %v4274_v23, 0.0  ;;  %v3351_v38 = vmax.f32 %v4276_v47, 0.0  ;;  %v3265_v39 = vpop.f32.mrb[3].mxu0  ;;  %v3347_v40 = vpop.f32.mrb[3].mxu1 }
 0x376   : > { %v3350_v42 = vmax.f32 %v4275_v32, 0.0  ;;  %v3352_v8 = vmax.f32 %v4277_v33, 0.0 }
 0x377   : > { %v3354_v45 = vpack.c.bf16 %v3349_v37, %v3349_v37  ;;  %v3356_v46 = vpack.c.bf16 %v3351_v38, %v3351_v38 }
 0x378   : > { %v3355_v43 = vpack.c.bf16 %v3350_v42, %v3350_v42  ;;  %v3357_v44 = vpack.c.bf16 %v3352_v8, %v3352_v8 }
 0x37a   : > { %3646 = vmatprep.mubr.bf16.mxu0 %v3355_v43  ;;  %3686 = vmatprep.mubr.bf16.mxu1 %v3357_v44 }
 0x37b   : > { %3647 = vmatmul.mubr.bf16.vlgmr.msra.gmra.mrb[4].mxu0 %v3354_v45  ;;  %3687 = vmatmul.mubr.bf16.vlgmr.msra.gmra.mrb[4].mxu1 %v3356_v46 }
 0x44e   : > { %v4218_v48 = vpop.f32.mrb[4].mxu0  ;;  %v4240_v49 = vpop.f32.mrb[4].mxu1 }
 0x44f   : > { %v4219_v50 = vpop.f32.mrb[5].mxu0  ;;  %v4241_v51 = vpop.f32.mrb[5].mxu1 }
 0x450   : > { %v4220_v52 = vadd.f32 %v4219_v50, %v4218_v48  ;;  %v4242_v53 = vadd.f32 %v4241_v51, %v4240_v49  ;;  %v4221_v54 = vpop.f32.mrb[6].mxu0  ;;  %v4243_v55 = vpop.f32.mrb[6].mxu1  ;;  %3700 = sbr.rel (%p4195_p11) target bundleno = 1439 (0x59f), region = 79 }
 0x451   : > { %v4222_v21 = vpop.f32.mrb[7].mxu0  ;;  %v4244_v36 = vpop.f32.mrb[7].mxu1 }
 0x452   : > { %v3689_v57 = vadd.f32 %v4242_v53, %v4220_v52 }
 0x454   : > { %v3694_v58 = vadd.f32 %v3689_v57, %v3353_v56 }
 0x456   : > { %3696 = vst.msk [vmem:[#allocation3] sm:$0x3] %vm3695_vm10, %v3694_v58 }
 0x45d   : > { %v3701_v59 = vld [vmem:[#allocation3] sm:$0x3] }
 0x45e   : > { %v3709_v61 = vadd.f32 %v4196_v60, %v3701_v59 }
 0x460   : > { %v3710_v62 = vsel %vm3695_vm10, %v3709_v61, -inf }
 0x461   : > { %3711 = vmax.xlane.f32.xlu0 %v3710_v62 }
 0x4ee   : > { %v3712_v63 = vpop.xlane.xlu0 %3711 }
 0x4ef   : > { %v3713_v0 = vsub.f32 %v3709_v61, %v3712_v63 }
 0x4f1   : > { %v3714_v1 = vmul.f32 1.442695, %v3713_v0 }
 0x4f3   : > { %4884 = vpow2.f32 %v3714_v1 }
 0x4fd   : > { %v4885_v2 = vpop.eup %4884 }
 0x4fe   : > { %v3716_v3 = vsel %vm3695_vm10, %v4885_v2, 0.0 }
 0x4ff   : > { %3717 = vadd.xlane.f32.xlu0 %v3716_v3 }
 0x58c   : > { %v3718_v4 = vpop.xlane.xlu0 %3717 }
 0x58d   : > { %4886 = vlog2.f32 %v3718_v4 }
 0x597   : > { %v4887_v5 = vpop.eup %4886 }
 0x598   : > { %v3720_v6 = vmul.f32 0.6931472, %v4887_v5 }
 0x59a   : > { %v3721_v9 = vadd.f32 %v3720_v6, %v3712_v63 }
 0x59c   : > { %v3722_v10 = vsub.f32 %v3709_v61, %v3721_v9 }
 0x59e   : > { %3723 = vst.msk [vmem:[#allocation5] sm:$0x3] %vm3695_vm10, %v3722_v10 }
 0x59f PF: > { %p4292_p12 = scmp.eq.s32.totalorder %s5003_s27, 3  ;;  %s4946_s30 = smov [#allocation5]  }
 0x5a0   : > { %s3731_s14 = sshll.u32 %s4946_s30, 4  ;;  %s3732_s14 = int_to_ptr.vmem [resolvable:$true] %s3731_s14 }
 0x5a1   : > { %s4888_s15 = scalar_lea.vmem %s3732_s14, 32  ;;  %p4895_p2 = scmp.lt.s32.totalorder %s3732_s14, %s3732_s14 }
 0x5a2   : > { %p4889_p13 = scmp.ne.s32.totalorder %s3732_s14, %s4888_s15  ;;  %p4896_p3 = scmp.lt.s32.totalorder %s4888_s15, %s4888_s15 }
 0x5a4   : > { %p4890_p0 = pnand %p4889_p13, %p4292_p12  ;;  %p4897_p4 = por %p4896_p3, %p4895_p2 }
 0x5a6   : > { %p4891_p1 = pneg %p4890_p0 }
 0x5a8   : > { %p4898_p5 = pnand %p4897_p4, %p4891_p1 }
 0x5aa   : > { %4901 = shalt.err (!%p4898_p5)
}
 0x5ab   : > { %s4902_s19 = scalar_lea.hbm %s6235_s7, 32 }
 0x5ac   : > { %p4903_p6 = scmp.ne.s32.totalorder %s6235_s7, %s4902_s19  ;;  %p4908_p9 = scmp.lt.u32.totalorder %s4902_s19, %s6235_s7 }
 0x5ae   : > { %p4904_p7 = pnand %p4903_p6, %p4292_p12 }
 0x5b0   : > { %p4905_p8 = pneg %p4904_p7 }
 0x5b2   : > { %p4910_p10 = pnand %p4908_p9, %p4905_p8 }
 0x5b4   : > { %4913 = shalt.err (!%p4910_p10)
}
 0x5b5   : > { %4289 = dma.vmem_to_hbm [thread:$0]  (%p4292_p12), %s3732_s14, 32, %s6235_s7, [#allocation6]  }
 0x5b6   : > { %4927 = dma.done.wait (%p4292_p12), [#allocation6], 32  }
 0x5b7   : > { %4929 = vsyncadd (%p4292_p12), [#allocation6], 4294967264 }
 0x5b8 PF: > { %p15_p11 = scmp.ge.s32.totalorder %s5006_s28, 6   ;;  %s6236_s24 = smov %s4936_s25 }
 0x5b9   : > { %s6237_s25 = smov %s5015_s8  ;;  %s6238_s26 = smov %s5006_s28 }
 0x5ba   :  { %17 = sbr.rel (!%p15_p11) target bundleno = 2 (0x2), region = 117 }
 0x5c1   :  { %3744 = vsyncpa [#allocation6], 1 }
 0x5c2   :  { %3746 = vsyncpa [#allocation6 + $0x1], 1 }

</bundles_post_ra>
